<compile_context>
chip_gen: v5e
topology: v5e:2x2
jax: 0.10.0
libtpu: 0.0.40
codegen_flags: <defaults>
</compile_context>

<pallas_src>
import jax
import jax.numpy as jnp
from jax.experimental import pallas as pl
from jax.experimental.pallas import tpu as pltpu

K1_PAD = 896    # 784 padded up to a multiple of 128 lanes
OUT_PAD = 128   # 10 padded up to one full lane width


def mlp_kernel(x_ref, w1_ref, b1_ref, w2_ref, b2_ref, w3_ref, b3_ref, o_ref):
    # fc1 + relu  (bf16 operands, f32 accumulation on the MXU)
    h1 = jnp.dot(x_ref[...], w1_ref[...], preferred_element_type=jnp.float32)
    h1 = jnp.maximum(h1 + b1_ref[...], 0.0)
    # fc2 + relu
    h2 = jnp.dot(h1.astype(w2_ref.dtype), w2_ref[...],
                 preferred_element_type=jnp.float32)
    h2 = jnp.maximum(h2 + b2_ref[...], 0.0)
    # fc3 (lane-padded output, sliced back to 10 in the wrapper)
    o = jnp.dot(h2.astype(w3_ref.dtype), w3_ref[...],
                preferred_element_type=jnp.float32)
    o_ref[...] = (o + b3_ref[...]).astype(o_ref.dtype)


def init_params(key):
    """Raw f32 params, shapes matching nn.Linear(784,1024)/(1024,512)/(512,10),
    stored as (in_features, out_features) so the forward is x @ W + b."""
    k1, k2, k3, k4, k5, k6 = jax.random.split(key, 6)
    w1 = jax.random.normal(k1, (784, 1024), jnp.float32) * 0.02
    b1 = jax.random.normal(k2, (1, 1024), jnp.float32) * 0.01
    w2 = jax.random.normal(k3, (1024, 512), jnp.float32) * 0.02
    b2 = jax.random.normal(k4, (1, 512), jnp.float32) * 0.01
    w3 = jax.random.normal(k5, (512, 10), jnp.float32) * 0.02
    b3 = jax.random.normal(k6, (1, 10), jnp.float32) * 0.01
    return (w1, b1, w2, b2, w3, b3)


def prepare_params(params):
    """Kernel-ready layout: bf16 weights, zero-padded to MXU/lane-friendly
    shapes; biases stay f32 (fc3 bias lane-padded)."""
    w1, b1, w2, b2, w3, b3 = params
    w1p = jnp.zeros((K1_PAD, 1024), jnp.bfloat16).at[:784, :].set(
        w1.astype(jnp.bfloat16))
    w2p = w2.astype(jnp.bfloat16)
    w3p = jnp.zeros((512, OUT_PAD), jnp.bfloat16).at[:, :10].set(
        w3.astype(jnp.bfloat16))
    b3p = jnp.zeros((1, OUT_PAD), jnp.float32).at[:, :10].set(b3)
    return (w1p, b1.astype(jnp.float32), w2p, b2.astype(jnp.float32), w3p, b3p)


def simple_model_forward(x, prepared_params, *, block_b=256):
    """x: (B, 1, 28, 28) or (B, 784) float32. Returns (B, 10) float32."""
    w1, b1, w2, b2, w3, b3 = prepared_params
    x2d = x.reshape(-1, 28 * 28)
    B = x2d.shape[0]

    # Batch tile: multiple of 8 sublanes, capped at block_b rows.
    tb = min(block_b, max(8, ((B + 7) // 8) * 8))
    n_blocks = pl.cdiv(B, tb)
    bp = n_blocks * tb

    # Zero-pad batch rows and the contraction dim (784 -> 896); cast to bf16.
    x_pad = jnp.zeros((bp, K1_PAD), jnp.bfloat16)
    x_pad = x_pad.at[:B, :784].set(x2d.astype(jnp.bfloat16))

    const = lambda shape: pl.BlockSpec(shape, lambda i: (0, 0))

    flops = 2 * bp * (K1_PAD * 1024 + 1024 * 512 + 512 * OUT_PAD)
    bytes_accessed = (
        x_pad.size * 2 + w1.size * 2 + w2.size * 2 + w3.size * 2
        + (b1.size + b2.size + b3.size) * 4 + bp * OUT_PAD * 4)

    out = pl.pallas_call(
        mlp_kernel,
        out_shape=jax.ShapeDtypeStruct((bp, OUT_PAD), jnp.float32),
        grid=(n_blocks,),
        in_specs=[
            pl.BlockSpec((tb, K1_PAD), lambda i: (i, 0)),    # x: batch-tiled
            const((K1_PAD, 1024)), const((1, 1024)),         # fc1 (VMEM-resident)
            const((1024, 512)),    const((1, 512)),          # fc2 (VMEM-resident)
            const((512, OUT_PAD)), const((1, OUT_PAD)),      # fc3 (VMEM-resident)
        ],
        out_specs=pl.BlockSpec((tb, OUT_PAD), lambda i: (i, 0)),
        compiler_params=pltpu.CompilerParams(
            dimension_semantics=("parallel",),   # shard batch tiles across v7x's 2 TCs
            vmem_limit_bytes=32 << 20,           # actual need ~5 MB; leave headroom
        ),
        cost_estimate=pl.CostEstimate(
            flops=flops, transcendentals=0, bytes_accessed=bytes_accessed),
    )(x_pad, w1, b1, w2, b2, w3, b3)

    return out[:B, :10]


if __name__ == "__main__":
    key = jax.random.PRNGKey(0)
    kx, kp = jax.random.split(key)
    x = jax.random.normal(kx, (8, 1, 28, 28), jnp.float32)  # small MNIST-like batch
    raw_params = init_params(kp)
    prepared = prepare_params(raw_params)

    out = simple_model_forward(x, prepared)
    out = jax.block_until_ready(out)

    # Pure-JAX f32 reference (kernel uses bf16 weights -> relaxed tolerance).
    w1, b1, w2, b2, w3, b3 = raw_params
    xf = x.reshape(-1, 784)
    ref = jnp.maximum(xf @ w1 + b1, 0.0)
    ref = jnp.maximum(ref @ w2 + b2, 0.0)
    ref = ref @ w3 + b3

    assert out.shape == (8, 10)
    assert jnp.allclose(out, ref, atol=2e-2, rtol=2e-2), (
        "max abs err = %g" % float(jnp.max(jnp.abs(out - ref))))

    print("KERNEL_OK")
</pallas_src>

<mosaic_0001>
module attributes {stable_mosaic.version = 11 : i64} {
  func.func @mlp_kernel(%arg0: i32, %arg1: memref<8x896xbf16, #tpu.memory_space<vmem>>, %arg2: memref<896x1024xbf16, #tpu.memory_space<vmem>>, %arg3: memref<1x1024xf32, #tpu.memory_space<vmem>>, %arg4: memref<1024x512xbf16, #tpu.memory_space<vmem>>, %arg5: memref<1x512xf32, #tpu.memory_space<vmem>>, %arg6: memref<512x128xbf16, #tpu.memory_space<vmem>>, %arg7: memref<1x128xf32, #tpu.memory_space<vmem>>, %arg8: memref<8x128xf32, #tpu.memory_space<vmem>>) attributes {dimension_semantics = [#tpu.dimension_semantics<parallel>], iteration_bounds = array<i64: 1>, scalar_prefetch = 0 : i64, scratch_operands = 0 : i64, tpu.core_type = #tpu.core_type<tc>, window_params = [{transform_indices = @transform_0, window_bounds = array<i64: 8, 896>}, {pipeline_mode = #tpu.pipeline_mode<synchronous>, transform_indices = @transform_1, window_bounds = array<i64: 896, 1024>}, {pipeline_mode = #tpu.pipeline_mode<synchronous>, transform_indices = @transform_2, window_bounds = array<i64: 1, 1024>}, {pipeline_mode = #tpu.pipeline_mode<synchronous>, transform_indices = @transform_3, window_bounds = array<i64: 1024, 512>}, {pipeline_mode = #tpu.pipeline_mode<synchronous>, transform_indices = @transform_4, window_bounds = array<i64: 1, 512>}, {pipeline_mode = #tpu.pipeline_mode<synchronous>, transform_indices = @transform_5, window_bounds = array<i64: 512, 128>}, {pipeline_mode = #tpu.pipeline_mode<synchronous>, transform_indices = @transform_6, window_bounds = array<i64: 1, 128>}, {transform_indices = @transform_7, window_bounds = array<i64: 8, 128>}]} {
    %c0 = arith.constant 0 : index
    %c0_0 = arith.constant 0 : index
    %0 = vector.load %arg1[%c0, %c0_0] : memref<8x896xbf16, #tpu.memory_space<vmem>>, vector<8x896xbf16>
    %c0_1 = arith.constant 0 : index
    %c0_2 = arith.constant 0 : index
    %1 = vector.load %arg2[%c0_1, %c0_2] : memref<896x1024xbf16, #tpu.memory_space<vmem>>, vector<896x1024xbf16>
    %cst = arith.constant dense<0.000000e+00> : vector<8x1024xf32>
    %2 = tpu.matmul %0, %1, %cst {dimension_numbers = #tpu.dot_dimension_numbers<[1], [0], [0], [1], [0, 0, 1, 1], [], []>} : vector<8x896xbf16>, vector<896x1024xbf16>, vector<8x1024xf32> -> vector<8x1024xf32>
    %c0_3 = arith.constant 0 : index
    %c0_4 = arith.constant 0 : index
    %3 = vector.load %arg3[%c0_3, %c0_4] : memref<1x1024xf32, #tpu.memory_space<vmem>>, vector<1x1024xf32>
    %4 = vector.broadcast %3 : vector<1x1024xf32> to vector<8x1024xf32>
    %5 = arith.addf %2, %4 : vector<8x1024xf32>
    %cst_5 = arith.constant 0.000000e+00 : f32
    %6 = vector.broadcast %cst_5 : f32 to vector<8x1024xf32>
    %7 = arith.maximumf %5, %6 : vector<8x1024xf32>
    %8 = arith.truncf %7 : vector<8x1024xf32> to vector<8x1024xbf16>
    %c0_6 = arith.constant 0 : index
    %c0_7 = arith.constant 0 : index
    %9 = vector.load %arg4[%c0_6, %c0_7] : memref<1024x512xbf16, #tpu.memory_space<vmem>>, vector<1024x512xbf16>
    %cst_8 = arith.constant dense<0.000000e+00> : vector<8x512xf32>
    %10 = tpu.matmul %8, %9, %cst_8 {dimension_numbers = #tpu.dot_dimension_numbers<[1], [0], [0], [1], [0, 0, 1, 1], [], []>} : vector<8x1024xbf16>, vector<1024x512xbf16>, vector<8x512xf32> -> vector<8x512xf32>
    %c0_9 = arith.constant 0 : index
    %c0_10 = arith.constant 0 : index
    %11 = vector.load %arg5[%c0_9, %c0_10] : memref<1x512xf32, #tpu.memory_space<vmem>>, vector<1x512xf32>
    %12 = vector.broadcast %11 : vector<1x512xf32> to vector<8x512xf32>
    %13 = arith.addf %10, %12 : vector<8x512xf32>
    %cst_11 = arith.constant 0.000000e+00 : f32
    %14 = vector.broadcast %cst_11 : f32 to vector<8x512xf32>
    %15 = arith.maximumf %13, %14 : vector<8x512xf32>
    %16 = arith.truncf %15 : vector<8x512xf32> to vector<8x512xbf16>
    %c0_12 = arith.constant 0 : index
    %c0_13 = arith.constant 0 : index
    %17 = vector.load %arg6[%c0_12, %c0_13] : memref<512x128xbf16, #tpu.memory_space<vmem>>, vector<512x128xbf16>
    %cst_14 = arith.constant dense<0.000000e+00> : vector<8x128xf32>
    %18 = tpu.matmul %16, %17, %cst_14 {dimension_numbers = #tpu.dot_dimension_numbers<[1], [0], [0], [1], [0, 0, 1, 1], [], []>} : vector<8x512xbf16>, vector<512x128xbf16>, vector<8x128xf32> -> vector<8x128xf32>
    %c0_15 = arith.constant 0 : index
    %c0_16 = arith.constant 0 : index
    %19 = vector.load %arg7[%c0_15, %c0_16] : memref<1x128xf32, #tpu.memory_space<vmem>>, vector<1x128xf32>
    %20 = vector.broadcast %19 : vector<1x128xf32> to vector<8x128xf32>
    %21 = arith.addf %18, %20 : vector<8x128xf32>
    %c0_17 = arith.constant 0 : index
    %c0_18 = arith.constant 0 : index
    %22 = vector.load %arg8[%c0_17, %c0_18] : memref<8x128xf32, #tpu.memory_space<vmem>>, vector<8x128xf32>
    tpu.vector_store %arg8[%c0_17, %c0_18], %21 {strides = array<i32>} : memref<8x128xf32, #tpu.memory_space<vmem>>, vector<8x128xf32>,
    return
  }
  func.func @transform_0(%arg0: i32) -> (i32, i32) {
    %c0_i32 = arith.constant 0 : i32
    %c0_i32_0 = arith.constant 0 : i32
    return %arg0, %c0_i32 : i32, i32
  }
  func.func @transform_1(%arg0: i32) -> (i32, i32) {
    %c0_i32 = arith.constant 0 : i32
    %c0_i32_0 = arith.constant 0 : i32
    %c0_i32_1 = arith.constant 0 : i32
    return %c0_i32, %c0_i32_0 : i32, i32
  }
  func.func @transform_2(%arg0: i32) -> (i32, i32) {
    %c0_i32 = arith.constant 0 : i32
    %c0_i32_0 = arith.constant 0 : i32
    %c0_i32_1 = arith.constant 0 : i32
    return %c0_i32, %c0_i32_0 : i32, i32
  }
  func.func @transform_3(%arg0: i32) -> (i32, i32) {
    %c0_i32 = arith.constant 0 : i32
    %c0_i32_0 = arith.constant 0 : i32
    %c0_i32_1 = arith.constant 0 : i32
    return %c0_i32, %c0_i32_0 : i32, i32
  }
  func.func @transform_4(%arg0: i32) -> (i32, i32) {
    %c0_i32 = arith.constant 0 : i32
    %c0_i32_0 = arith.constant 0 : i32
    %c0_i32_1 = arith.constant 0 : i32
    return %c0_i32, %c0_i32_0 : i32, i32
  }
  func.func @transform_5(%arg0: i32) -> (i32, i32) {
    %c0_i32 = arith.constant 0 : i32
    %c0_i32_0 = arith.constant 0 : i32
    %c0_i32_1 = arith.constant 0 : i32
    return %c0_i32, %c0_i32_0 : i32, i32
  }
  func.func @transform_6(%arg0: i32) -> (i32, i32) {
    %c0_i32 = arith.constant 0 : i32
    %c0_i32_0 = arith.constant 0 : i32
    %c0_i32_1 = arith.constant 0 : i32
    return %c0_i32, %c0_i32_0 : i32, i32
  }
  func.func @transform_7(%arg0: i32) -> (i32, i32) {
    %c0_i32 = arith.constant 0 : i32
    %c0_i32_0 = arith.constant 0 : i32
    return %arg0, %c0_i32 : i32, i32
  }
}

</mosaic_0001>

<bundles_post_ra>
// kernel: tpu_custom_call.1
= control target key start
LH: loop header
LB: loop body
LE: loop exit
PB: predicated region body
PF: predicated region fallthrough
CT: control target
= control target key end

     0   :  { %12 = vsyncpa [#allocation3], 0  ;;  %s10127_s0 = inlined_call_operand.hbm [shape: bf16[8,896], index: 0, kind: input, shape index: {}]   ;;  %s10128_s1 = inlined_call_operand.hbm [shape: bf16[896,1024], index: 1, kind: input, shape index: {}]   ;;  %s10129_s2 = inlined_call_operand.hbm [shape: f32[1,1024], index: 2, kind: input, shape index: {}]   ;;  %s10130_s3 = inlined_call_operand.hbm [shape: bf16[1024,512], index: 3, kind: input, shape index: {}]   ;;  %s10131_s4 = inlined_call_operand.hbm [shape: f32[1,512], index: 4, kind: input, shape index: {}]   ;;  %s10132_s5 = inlined_call_operand.hbm [shape: bf16[512,128], index: 5, kind: input, shape index: {}]   ;;  %s10133_s6 = inlined_call_operand.hbm [shape: f32[1,128], index: 6, kind: input, shape index: {}]   ;;  %s10134_s7 = inlined_call_operand.hbm [shape: f32[8,128], index: 7, kind: output, shape index: {}]  }
   0x1   :  { %13 = vsyncpa [#allocation6], 0 }
   0x2   :  { %14 = vsyncpa [#allocation9], 0 }
   0x3   :  { %15 = vsyncpa [#allocation12], 0  ;;  %s32_s26 = sshll.u32 %s10128_s1, 4  ;;  %s33_s26 = int_to_ptr.hbm [resolvable:$true] %s32_s26 }
   0x4   :  { %16 = vsyncpa [#allocation4], 0  ;;  %s9810_s27 = smov [#allocation5]   ;;  %s56_s8 = sshll.u32 %s10130_s3, 4  ;;  %s57_s8 = int_to_ptr.hbm [resolvable:$true] %s56_s8 }
   0x5   :  { %s34_s28 = sshll.u32 %s9810_s27, 4  ;;  %s9811_s9 = smov 512   ;;  %s35_s28 = int_to_ptr.vmem [resolvable:$true] %s34_s28 }
   0x6   :  { %s9812_s10 = smov 32   ;;  %s9813_s11 = smov [#allocation8]  }
   0x7   :  { %40 = dma.hbm_to_vmem [thread:$0]  %s33_s26, 57344, %s35_s28, [#allocation6], %s9811_s9, %s9811_s9, %s9812_s10  }
   0x8   :  { %s58_s12 = sshll.u32 %s9813_s11, 4  ;;  %s9814_s13 = smov 256   ;;  %s59_s12 = int_to_ptr.vmem [resolvable:$true] %s58_s12 }
   0x9   :  { %s9815_s14 = smov 16   ;;  %s80_s16 = sshll.u32 %s10132_s5, 4  ;;  %s81_s16 = int_to_ptr.hbm [resolvable:$true] %s80_s16 }
   0xa   :  { %64 = dma.hbm_to_vmem [thread:$0]  %s57_s8, 32768, %s59_s12, [#allocation9], %s9814_s13, %s9814_s13, %s9815_s14  }
   0xb   :  { %s9816_s17 = smov [#allocation11]   ;;  %s22_s20 = sshll.u32 %s10127_s0, 4  ;;  %s23_s20 = int_to_ptr.hbm [resolvable:$true] %s22_s20 }
   0xc   :  { %s82_s18 = sshll.u32 %s9816_s17, 4  ;;  %s9817_s21 = smov 64   ;;  %s83_s18 = int_to_ptr.vmem [resolvable:$true] %s82_s18 }
   0xd   :  { %s9818_s22 = smov 4   ;;  %s9819_s23 = smov [#allocation2]  }
   0xe   :  { %88 = dma.hbm_to_vmem [thread:$0]  %s81_s16, 4096, %s83_s18, [#allocation12], %s9817_s21, %s9817_s21, %s9818_s22  }
   0xf   :  { %s24_s24 = sshll.u32 %s9819_s23, 4  ;;  %s46_s27 = sshll.u32 %s10129_s2, 4  ;;  %s25_s24 = int_to_ptr.vmem [resolvable:$true] %s24_s24  ;;  %s47_s27 = int_to_ptr.hbm [resolvable:$true] %s46_s27 }
  0x10   :  { %27 = dma.hbm_to_vmem [thread:$0]  %s23_s20, 448, %s25_s24, [#allocation3]  }
  0x11   :  { %s70_s29 = sshll.u32 %s10131_s4, 4  ;;  %s9820_s30 = smov [#allocation7]   ;;  %s71_s29 = int_to_ptr.hbm [resolvable:$true] %s70_s29 }
  0x12   :  { %s48_s8 = sshll.u32 %s9820_s30, 4  ;;  %s9821_s0 = smov [#allocation10]   ;;  %s49_s8 = int_to_ptr.vmem [resolvable:$true] %s48_s8 }
  0x13   :  { %51 = dma.hbm_to_vmem [thread:$0]  %s47_s27, 128, %s49_s8, [#allocation6]  }
  0x14   :  { %s72_s9 = sshll.u32 %s9821_s0, 4  ;;  %s94_s12 = sshll.u32 %s10133_s6, 4  ;;  %s73_s9 = int_to_ptr.vmem [resolvable:$true] %s72_s9  ;;  %s95_s12 = int_to_ptr.hbm [resolvable:$true] %s94_s12 }
  0x15   :  { %75 = dma.hbm_to_vmem [thread:$0]  %s71_s29, 64, %s73_s9, [#allocation9]  }
  0x16   :  { %s9822_s2 = smov [#allocation13]  }
  0x17   :  { %s96_s13 = sshll.u32 %s9822_s2, 4  ;;  %s97_s13 = int_to_ptr.vmem [resolvable:$true] %s96_s13 }
  0x18   :  { %99 = dma.hbm_to_vmem [thread:$0]  %s95_s12, 16, %s97_s13, [#allocation12]  }
  0x19   :  { %9800 = dma.done.wait [#allocation3], 448  }
  0x1a   :  { %9801 = vsyncadd [#allocation3], 4294966848 }
  0x1b   :  { %9802 = dma.done.wait [#allocation6], 57472  }
  0x1c   :  { %9803 = vsyncadd [#allocation6], 4294909824 }
  0x1d   :  { %9804 = dma.done.wait [#allocation9], 32832  }
  0x1e   :  { %9805 = vsyncadd [#allocation9], 4294934464 }
  0x1f   :  { %9806 = dma.done.wait [#allocation12], 4112  }
  0x20   :  { %9807 = vsyncadd [#allocation12], 4294963184  ;;  %v6136_v0 = vld [vmem:[#allocation5 + $0x1c0] sm:$0xf]  ;;  %s9823_s4 = smov [#allocation14]   ;;  %s5897_s15 = sshll.u32 %s10134_s7, 4  ;;  %s5898_s15 = int_to_ptr.hbm [resolvable:$true] %s5897_s15 }
  0x21   :  { %v8914_v1 = vld [vmem:[#allocation5 + $0x1dc] sm:$0xf0]  ;;  %s5895_s6 = sshll.u32 %s9823_s4, 4  ;;  %s5896_s6 = int_to_ptr.vmem [resolvable:$true] %s5895_s6 }
  0x22   :  { %v6392_v2 = vld [vmem:[#allocation5 + $0x3c0] sm:$0xf]  ;;  %v6137_v3 = vor.u32 %v8914_v1, %v6136_v0 }
  0x23   :  { %v8978_v4 = vld [vmem:[#allocation5 + $0x3dc] sm:$0xf0] }
  0x24   :  { %v6648_v5 = vld [vmem:[#allocation5 + $0x5c0] sm:$0xf]  ;;  %v6393_v7 = vor.u32 %v8978_v4, %v6392_v2  ;;  %2863 = vmatpush.bf16.msra.mxu0 %v6137_v3 }
  0x25   :  { %v9042_v6 = vld [vmem:[#allocation5 + $0x5dc] sm:$0xf0] }
  0x26   :  { %v6649_v8 = vor.u32 %v9042_v6, %v6648_v5  ;;  %v6904_v9 = vld [vmem:[#allocation5 + $0x7c0] sm:$0xf]  ;;  %2876 = vmatpush.bf16.msra.mxu1 %v6393_v7 }
  0x27   :  { %v9106_v10 = vld [vmem:[#allocation5 + $0x7dc] sm:$0xf0] }
  0x28   :  { %v6104_v11 = vld [vmem:[#allocation5 + $0x180] sm:$0xf]  ;;  %v6905_v12 = vor.u32 %v9106_v10, %v6904_v9  ;;  %2889 = vmatpush.bf16.msra.mxu2 %v6649_v8 }
  0x29   :  { %v8906_v13 = vld [vmem:[#allocation5 + $0x19c] sm:$0xf0] }
  0x2a   :  { %v6360_v14 = vld [vmem:[#allocation5 + $0x380] sm:$0xf]  ;;  %v6105_v16 = vor.u32 %v8906_v13, %v6104_v11  ;;  %2902 = vmatpush.bf16.msra.mxu3 %v6905_v12 }
  0x2b   :  { %v8970_v15 = vld [vmem:[#allocation5 + $0x39c] sm:$0xf0] }
  0x2c   :  { %v6361_v17 = vor.u32 %v8970_v15, %v6360_v14  ;;  %v6616_v18 = vld [vmem:[#allocation5 + $0x580] sm:$0xf]  ;;  %2864 = vmatpush.bf16.msra.mxu0 %v6105_v16 }
  0x2d   :  { %v9034_v19 = vld [vmem:[#allocation5 + $0x59c] sm:$0xf0] }
  0x2e   :  { %v6872_v20 = vld [vmem:[#allocation5 + $0x780] sm:$0xf]  ;;  %v6617_v21 = vor.u32 %v9034_v19, %v6616_v18  ;;  %2877 = vmatpush.bf16.msra.mxu1 %v6361_v17 }
  0x2f   :  { %v9098_v22 = vld [vmem:[#allocation5 + $0x79c] sm:$0xf0] }
  0x30   :  { %v6072_v23 = vld [vmem:[#allocation5 + $0x140] sm:$0xf]  ;;  %v6873_v25 = vor.u32 %v9098_v22, %v6872_v20  ;;  %2890 = vmatpush.bf16.msra.mxu2 %v6617_v21 }
  0x31   :  { %v8898_v24 = vld [vmem:[#allocation5 + $0x15c] sm:$0xf0] }
  0x32   :  { %v6328_v26 = vld [vmem:[#allocation5 + $0x340] sm:$0xf]  ;;  %v6073_v29 = vor.u32 %v8898_v24, %v6072_v23  ;;  %2903 = vmatpush.bf16.msra.mxu3 %v6873_v25 }
  0x33   :  { %v8962_v27 = vld [vmem:[#allocation5 + $0x35c] sm:$0xf0] }
  0x34   :  { %v6584_v28 = vld [vmem:[#allocation5 + $0x540] sm:$0xf]  ;;  %v6329_v33 = vor.u32 %v8962_v27, %v6328_v26  ;;  %2865 = vmatpush.bf16.msra.mxu0 %v6073_v29 }
  0x35   :  { %v9026_v30 = vld [vmem:[#allocation5 + $0x55c] sm:$0xf0] }
  0x36   :  { %v6840_v31 = vld [vmem:[#allocation5 + $0x740] sm:$0xf]  ;;  %v6585_v34 = vor.u32 %v9026_v30, %v6584_v28  ;;  %2878 = vmatpush.bf16.msra.mxu1 %v6329_v33 }
  0x37   :  { %v9090_v32 = vld [vmem:[#allocation5 + $0x75c] sm:$0xf0] }
  0x38   :  { %v6040_v35 = vld [vmem:[#allocation5 + $0x100] sm:$0xf]  ;;  %v6841_v38 = vor.u32 %v9090_v32, %v6840_v31  ;;  %2891 = vmatpush.bf16.msra.mxu2 %v6585_v34 }
  0x39   :  { %v8890_v36 = vld [vmem:[#allocation5 + $0x11c] sm:$0xf0] }
  0x3a   :  { %v6296_v37 = vld [vmem:[#allocation5 + $0x300] sm:$0xf]  ;;  %v6041_v44 = vor.u32 %v8890_v36, %v6040_v35  ;;  %2904 = vmatpush.bf16.msra.mxu3 %v6841_v38  ;;  %v6138_v38 = vld [vmem:[#allocation5 + $0x1e0] sm:$0xf0] }
  0x3b   :  { %v8954_v39 = vld [vmem:[#allocation5 + $0x31c] sm:$0xf0] }
  0x3c   :  { %v6552_v40 = vld [vmem:[#allocation5 + $0x500] sm:$0xf]  ;;  %v6297_v45 = vor.u32 %v8954_v39, %v6296_v37  ;;  %2866 = vmatpush.bf16.msra.mxu0 %v6041_v44  ;;  %v8910_v37 = vld [vmem:[#allocation5 + $0x1c4] sm:$0xf] }
  0x3d   :  { %v9018_v41 = vld [vmem:[#allocation5 + $0x51c] sm:$0xf0] }
  0x3e   :  { %v6808_v42 = vld [vmem:[#allocation5 + $0x700] sm:$0xf]  ;;  %v6553_v46 = vor.u32 %v9018_v41, %v6552_v40  ;;  %2879 = vmatpush.bf16.msra.mxu1 %v6297_v45 }
  0x3f   :  { %v9082_v43 = vld [vmem:[#allocation5 + $0x71c] sm:$0xf0] }
  0x40   :  { %v6008_v47 = vld [vmem:[#allocation5 + $0xc0] sm:$0xf]  ;;  %v6809_v50 = vor.u32 %v9082_v43, %v6808_v42  ;;  %2892 = vmatpush.bf16.msra.mxu2 %v6553_v46  ;;  %v6141_v46 = vor.u32 %v8910_v37, %v6138_v38 }
  0x41   :  { %v8882_v48 = vld [vmem:[#allocation5 + $0xdc] sm:$0xf0] }
  0x42   :  { %v6264_v49 = vld [vmem:[#allocation5 + $0x2c0] sm:$0xf]  ;;  %v6009_v56 = vor.u32 %v8882_v48, %v6008_v47  ;;  %2905 = vmatpush.bf16.msra.mxu3 %v6809_v50  ;;  %v8902_v50 = vld [vmem:[#allocation5 + $0x184] sm:$0xf] }
  0x43   :  { %v8946_v51 = vld [vmem:[#allocation5 + $0x2dc] sm:$0xf0] }
  0x44   :  { %v6520_v52 = vld [vmem:[#allocation5 + $0x4c0] sm:$0xf]  ;;  %v6265_v57 = vor.u32 %v8946_v51, %v6264_v49  ;;  %2867 = vmatpush.bf16.msra.mxu0 %v6009_v56  ;;  %v6106_v51 = vld [vmem:[#allocation5 + $0x1a0] sm:$0xf0] }
  0x45   :  { %v9010_v53 = vld [vmem:[#allocation5 + $0x4dc] sm:$0xf0] }
  0x46   :  { %v6776_v54 = vld [vmem:[#allocation5 + $0x6c0] sm:$0xf]  ;;  %v6521_v58 = vor.u32 %v9010_v53, %v6520_v52  ;;  %2880 = vmatpush.bf16.msra.mxu1 %v6265_v57 }
  0x47   :  { %v9074_v55 = vld [vmem:[#allocation5 + $0x6dc] sm:$0xf0] }
  0x48   :  { %v5976_v59 = vld [vmem:[#allocation5 + $0x80] sm:$0xf]  ;;  %v6777_v62 = vor.u32 %v9074_v55, %v6776_v54  ;;  %2893 = vmatpush.bf16.msra.mxu2 %v6521_v58 }
  0x49   :  { %v8874_v60 = vld [vmem:[#allocation5 + $0x9c] sm:$0xf0] }
  0x4a   :  { %v6232_v61 = vld [vmem:[#allocation5 + $0x280] sm:$0xf]  ;;  %v5977_v4 = vor.u32 %v8874_v60, %v5976_v59  ;;  %2906 = vmatpush.bf16.msra.mxu3 %v6777_v62  ;;  %v6109_v59 = vor.u32 %v8902_v50, %v6106_v51  ;;  %v8894_v62 = vld [vmem:[#allocation5 + $0x144] sm:$0xf] }
  0x4b   :  { %v8938_v63 = vld [vmem:[#allocation5 + $0x29c] sm:$0xf0] }
  0x4c   :  { %v6488_v0 = vld [vmem:[#allocation5 + $0x480] sm:$0xf]  ;;  %v6233_v5 = vor.u32 %v8938_v63, %v6232_v61  ;;  %2868 = vmatpush.bf16.msra.mxu0 %v5977_v4  ;;  %v6074_v63 = vld [vmem:[#allocation5 + $0x160] sm:$0xf0] }
  0x4d   :  { %v9002_v1 = vld [vmem:[#allocation5 + $0x49c] sm:$0xf0] }
  0x4e   :  { %v6744_v2 = vld [vmem:[#allocation5 + $0x680] sm:$0xf]  ;;  %v6489_v6 = vor.u32 %v9002_v1, %v6488_v0  ;;  %2881 = vmatpush.bf16.msra.mxu1 %v6233_v5 }
  0x4f   :  { %v9066_v3 = vld [vmem:[#allocation5 + $0x69c] sm:$0xf0] }
  0x50   :  { %v5944_v7 = vld [vmem:[#allocation5 + $0x40] sm:$0xf]  ;;  %v6745_v10 = vor.u32 %v9066_v3, %v6744_v2  ;;  %2894 = vmatpush.bf16.msra.mxu2 %v6489_v6  ;;  %v129_v2 = vld [vmem:[#allocation2 + $0x8] sm:$0xff]  ;;  %v128_v3 = vld [vmem:[#allocation2] sm:$0xff] }
  0x51   :  { %v8866_v8 = vld [vmem:[#allocation5 + $0x5c] sm:$0xf0] }
  0x52   :  { %v6200_v9 = vld [vmem:[#allocation5 + $0x240] sm:$0xf]  ;;  %v5945_v16 = vor.u32 %v8866_v8, %v5944_v7  ;;  %2907 = vmatpush.bf16.msra.mxu3 %v6745_v10  ;;  %v604_v8 = vunpack.c.l.b16 %v129_v2  ;;  %v605_v10 = vunpack.c.h.b16 %v129_v2 }
  0x53   :  { %v8930_v11 = vld [vmem:[#allocation5 + $0x25c] sm:$0xf0] }
  0x54   :  { %v6456_v12 = vld [vmem:[#allocation5 + $0x440] sm:$0xf]  ;;  %v6201_v19 = vor.u32 %v8930_v11, %v6200_v9  ;;  %2869 = vmatpush.bf16.msra.mxu0 %v5945_v16  ;;  %v602_v9 = vunpack.c.l.b16 %v128_v3  ;;  %v6077_v11 = vor.u32 %v8894_v62, %v6074_v63  ;;  %v8886_v16 = vld [vmem:[#allocation5 + $0x104] sm:$0xf] }
  0x55   :  { %v8994_v13 = vld [vmem:[#allocation5 + $0x45c] sm:$0xf0] }
  0x56   :  { %v6712_v14 = vld [vmem:[#allocation5 + $0x640] sm:$0xf]  ;;  %v6457_v20 = vor.u32 %v8994_v13, %v6456_v12  ;;  %2882 = vmatpush.bf16.msra.mxu1 %v6201_v19  ;;  %v9887_v19 = vpack.c.b16 %v602_v9, %v602_v9  ;;  %v6394_v9 = vld [vmem:[#allocation5 + $0x3e0] sm:$0xf0] }
  0x57   :  { %v9058_v15 = vld [vmem:[#allocation5 + $0x65c] sm:$0xf0] }
  0x58   :  { %v5912_v17 = vld [vmem:[#allocation5] sm:$0xf]  ;;  %v6713_v24 = vor.u32 %v9058_v15, %v6712_v14  ;;  %2895 = vmatpush.bf16.msra.mxu2 %v6457_v20  ;;  %v603_v15 = vunpack.c.h.b16 %v128_v3  ;;  %v9889_v20 = vpack.c.b16 %v605_v10, %v605_v10  ;;  %v131_v3 = vld [vmem:[#allocation2 + $0x18] sm:$0xf]  ;;  %v9038_v10 = vld [vmem:[#allocation5 + $0x5c4] sm:$0xf] }
  0x59   :  { %v8858_v18 = vld [vmem:[#allocation5 + $0x1c] sm:$0xf0] }
  0x5a   :  { %v6168_v21 = vld [vmem:[#allocation5 + $0x200] sm:$0xf]  ;;  %v5913_v31 = vor.u32 %v8858_v18, %v5912_v17  ;;  %2908 = vmatpush.bf16.msra.mxu3 %v6713_v24  ;;  %v6042_v17 = vld [vmem:[#allocation5 + $0x120] sm:$0xf0]  ;;  %v9885_v18 = vpack.c.b16 %v604_v8, %v604_v8 }
  0x5b   :  { %v8922_v22 = vld [vmem:[#allocation5 + $0x21c] sm:$0xf0]  ;;  %v8974_v8 = vld [vmem:[#allocation5 + $0x3c4] sm:$0xf] }
  0x5c   :  { %v6424_v23 = vld [vmem:[#allocation5 + $0x400] sm:$0xf]  ;;  %v6169_v35 = vor.u32 %v8922_v22, %v6168_v21  ;;  %2870 = vmatpush.bf16.msra.mxu0 %v5913_v31  ;;  %v9891_v22 = vpack.c.b16 %v603_v15, %v603_v15  ;;  %v608_v15 = vunpack.c.l.b16 %v131_v3 }
  0x5d   :  { %v8986_v25 = vld [vmem:[#allocation5 + $0x41c] sm:$0xf0] }
  0x5e   :  { %v6680_v26 = vld [vmem:[#allocation5 + $0x600] sm:$0xf]  ;;  %v6425_v36 = vor.u32 %v8986_v25, %v6424_v23  ;;  %2883 = vmatpush.bf16.msra.mxu1 %v6169_v35 }
  0x5f   :  { %v9050_v27 = vld [vmem:[#allocation5 + $0x61c] sm:$0xf0]  ;;  %2871 = vmatmul.bf16.vlgmr.msra.gmra.mxu0 %v9887_v19 }
  0x60   :  { %v7160_v28 = vld [vmem:[#allocation5 + $0x9c0] sm:$0xf]  ;;  %v6681_v39 = vor.u32 %v9050_v27, %v6680_v26  ;;  %2896 = vmatpush.bf16.msra.mxu2 %v6425_v36 }
  0x61   :  { %v9170_v29 = vld [vmem:[#allocation5 + $0x9dc] sm:$0xf0]  ;;  %2884 = vmatmul.bf16.vlgmr.msra.gmra.mxu1 %v9891_v22 }
  0x62   :  { %v7416_v30 = vld [vmem:[#allocation5 + $0xbc0] sm:$0xf]  ;;  %v7161_v40 = vor.u32 %v9170_v29, %v7160_v28  ;;  %2909 = vmatpush.bf16.msra.mxu3 %v6681_v39  ;;  %v6045_v28 = vor.u32 %v8886_v16, %v6042_v17 }
  0x63   :  { %v9234_v32 = vld [vmem:[#allocation5 + $0xbdc] sm:$0xf0]  ;;  %2897 = vmatmul.bf16.vlgmr.msra.gmra.mxu2 %v9885_v18 }
  0x64   :  { %v7672_v33 = vld [vmem:[#allocation5 + $0xdc0] sm:$0xf]  ;;  %v7417_v41 = vor.u32 %v9234_v32, %v7416_v30  ;;  %2915 = vmatpush.bf16.msrb.mxu0 %v7161_v40  ;;  %v8878_v32 = vld [vmem:[#allocation5 + $0xc4] sm:$0xf] }
  0x65   :  { %v9298_v34 = vld [vmem:[#allocation5 + $0xddc] sm:$0xf0]  ;;  %2910 = vmatmul.bf16.vlgmr.msra.gmra.mxu3 %v9889_v20 }
  0x66   :  { %v7673_v42 = vor.u32 %v9298_v34, %v7672_v33  ;;  %v7128_v43 = vld [vmem:[#allocation5 + $0x980] sm:$0xf]  ;;  %2928 = vmatpush.bf16.msrb.mxu1 %v7417_v41  ;;  %2954 = vmatpush.bf16.msrb.mxu3 %v6141_v46  ;;  %v6010_v33 = vld [vmem:[#allocation5 + $0xe0] sm:$0xf0] }
  0x67   :  { %v9162_v44 = vld [vmem:[#allocation5 + $0x99c] sm:$0xf0]  ;;  %v6013_v40 = vor.u32 %v8878_v32, %v6010_v33  ;;  %v9030_v32 = vld [vmem:[#allocation5 + $0x584] sm:$0xf] }
  0x68   :  { %v7384_v45 = vld [vmem:[#allocation5 + $0xb80] sm:$0xf]  ;;  %v7129_v52 = vor.u32 %v9162_v44, %v7128_v43  ;;  %2941 = vmatpush.bf16.msrb.mxu2 %v7673_v42  ;;  %v8870_v44 = vld [vmem:[#allocation5 + $0x84] sm:$0xf] }
  0x69   :  { %v9226_v47 = vld [vmem:[#allocation5 + $0xb9c] sm:$0xf0] }
  0x6a   :  { %v7640_v48 = vld [vmem:[#allocation5 + $0xd80] sm:$0xf]  ;;  %v7385_v54 = vor.u32 %v9226_v47, %v7384_v45  ;;  %2916 = vmatpush.bf16.msrb.mxu0 %v7129_v52  ;;  %2955 = vmatpush.bf16.msrb.mxu3 %v6109_v59  ;;  %v5978_v45 = vld [vmem:[#allocation5 + $0xa0] sm:$0xf0] }
  0x6b   :  { %v9290_v49 = vld [vmem:[#allocation5 + $0xd9c] sm:$0xf0]  ;;  %v5981_v52 = vor.u32 %v8870_v44, %v5978_v45  ;;  %v8958_v45 = vld [vmem:[#allocation5 + $0x344] sm:$0xf] }
  0x6c   :  { %v7096_v53 = vld [vmem:[#allocation5 + $0x940] sm:$0xf]  ;;  %v7641_v55 = vor.u32 %v9290_v49, %v7640_v48  ;;  %2929 = vmatpush.bf16.msrb.mxu1 %v7385_v54 }
  0x6d   :  { %v9154_v56 = vld [vmem:[#allocation5 + $0x95c] sm:$0xf0] }
  0x6e   :  { %v7352_v57 = vld [vmem:[#allocation5 + $0xb40] sm:$0xf]  ;;  %v7097_v0 = vor.u32 %v9154_v56, %v7096_v53  ;;  %2942 = vmatpush.bf16.msrb.mxu2 %v7641_v55  ;;  %2956 = vmatpush.bf16.msrb.mxu3 %v6077_v11  ;;  %v8862_v56 = vld [vmem:[#allocation5 + $0x44] sm:$0xf] }
  0x6f   :  { %v9218_v58 = vld [vmem:[#allocation5 + $0xb5c] sm:$0xf0] }
  0x70   :  { %v7608_v60 = vld [vmem:[#allocation5 + $0xd40] sm:$0xf]  ;;  %v7353_v1 = vor.u32 %v9218_v58, %v7352_v57  ;;  %2917 = vmatpush.bf16.msrb.mxu0 %v7097_v0  ;;  %v5946_v57 = vld [vmem:[#allocation5 + $0x60] sm:$0xf0] }
  0x71   :  { %v9282_v61 = vld [vmem:[#allocation5 + $0xd5c] sm:$0xf0] }
  0x72   :  { %v7609_v4 = vor.u32 %v9282_v61, %v7608_v60  ;;  %v7064_v5 = vld [vmem:[#allocation5 + $0x900] sm:$0xf]  ;;  %2930 = vmatpush.bf16.msrb.mxu1 %v7353_v1  ;;  %2957 = vmatpush.bf16.msrb.mxu3 %v6045_v28 }
  0x73   :  { %v9146_v6 = vld [vmem:[#allocation5 + $0x91c] sm:$0xf0] }
  0x74   :  { %v7320_v7 = vld [vmem:[#allocation5 + $0xb00] sm:$0xf]  ;;  %v7065_v21 = vor.u32 %v9146_v6, %v7064_v5  ;;  %2943 = vmatpush.bf16.msrb.mxu2 %v7609_v4  ;;  %v5949_v4 = vor.u32 %v8862_v56, %v5946_v57  ;;  %v8854_v5 = vld [vmem:[#allocation5 + $0x4] sm:$0xf] }
  0x75   :  { %v9210_v12 = vld [vmem:[#allocation5 + $0xb1c] sm:$0xf0]  ;;  %v5914_v6 = vld [vmem:[#allocation5 + $0x20] sm:$0xf0] }
  0x76   :  { %v7576_v13 = vld [vmem:[#allocation5 + $0xd00] sm:$0xf]  ;;  %v7321_v23 = vor.u32 %v9210_v12, %v7320_v7  ;;  %2918 = vmatpush.bf16.msrb.mxu0 %v7065_v21  ;;  %2958 = vmatpush.bf16.msrb.mxu3 %v6013_v40  ;;  %v130_v7 = vld [vmem:[#allocation2 + $0x10] sm:$0xff]  ;;  %v6650_v12 = vld [vmem:[#allocation5 + $0x5e0] sm:$0xf0] }
  0x77   :  { %v9274_v14 = vld [vmem:[#allocation5 + $0xd1c] sm:$0xf0]  ;;  %v9166_v21 = vld [vmem:[#allocation5 + $0x9c4] sm:$0xf]  ;;  %v6653_v28 = vor.u32 %v9038_v10, %v6650_v12 }
  0x78   :  { %v7577_v24 = vor.u32 %v9274_v14, %v7576_v13  ;;  %v7032_v25 = vld [vmem:[#allocation5 + $0x8c0] sm:$0xf]  ;;  %2931 = vmatpush.bf16.msrb.mxu1 %v7321_v23  ;;  %v9102_v13 = vld [vmem:[#allocation5 + $0x7c4] sm:$0xf] }
  0x79   :  { %v9138_v26 = vld [vmem:[#allocation5 + $0x8dc] sm:$0xf0]  ;;  %v6906_v14 = vld [vmem:[#allocation5 + $0x7e0] sm:$0xf0] }
  0x7a   :  { %v7288_v27 = vld [vmem:[#allocation5 + $0xac0] sm:$0xf]  ;;  %v7033_v34 = vor.u32 %v9138_v26, %v7032_v25  ;;  %2944 = vmatpush.bf16.msrb.mxu2 %v7577_v24  ;;  %2959 = vmatpush.bf16.msrb.mxu3 %v5981_v52  ;;  %v7162_v23 = vld [vmem:[#allocation5 + $0x9e0] sm:$0xf0]  ;;  %v606_v24 = vunpack.c.l.b16 %v130_v7  ;;  %v607_v25 = vunpack.c.h.b16 %v130_v7  ;;  %v5917_v26 = vor.u32 %v8854_v5, %v5914_v6 }
  0x7b   :  { %v9202_v29 = vld [vmem:[#allocation5 + $0xadc] sm:$0xf0]  ;;  %v7165_v33 = vor.u32 %v9166_v21, %v7162_v23  ;;  %v9150_v52 = vld [vmem:[#allocation5 + $0x944] sm:$0xf] }
  0x7c   :  { %v7544_v30 = vld [vmem:[#allocation5 + $0xcc0] sm:$0xf]  ;;  %v7289_v35 = vor.u32 %v9202_v29, %v7288_v27  ;;  %2919 = vmatpush.bf16.msrb.mxu0 %v7033_v34  ;;  %v6397_v27 = vor.u32 %v8974_v8, %v6394_v9  ;;  %v6909_v29 = vor.u32 %v9102_v13, %v6906_v14  ;;  %v6618_v34 = vld [vmem:[#allocation5 + $0x5a0] sm:$0xf0]  ;;  %v9899_v40 = vpack.c.b16 %v606_v24, %v606_v24 }
  0x7d   :  { %v9266_v31 = vld [vmem:[#allocation5 + $0xcdc] sm:$0xf0]  ;;  %v8950_v57 = vld [vmem:[#allocation5 + $0x304] sm:$0xf] }
  0x7e   :  { %v7545_v36 = vor.u32 %v9266_v31, %v7544_v30  ;;  %v7000_v37 = vld [vmem:[#allocation5 + $0x880] sm:$0xf]  ;;  %2932 = vmatpush.bf16.msrb.mxu1 %v7289_v35  ;;  %2960 = vmatpush.bf16.msrb.mxu3 %v5949_v4  ;;  %v8966_v30 = vld [vmem:[#allocation5 + $0x384] sm:$0xf] }
  0x7f   :  { %v9130_v38 = vld [vmem:[#allocation5 + $0x89c] sm:$0xf0]  ;;  %v6362_v31 = vld [vmem:[#allocation5 + $0x3a0] sm:$0xf0] }
  0x80   :  { %v7256_v39 = vld [vmem:[#allocation5 + $0xa80] sm:$0xf]  ;;  %v7001_v46 = vor.u32 %v9130_v38, %v7000_v37  ;;  %2945 = vmatpush.bf16.msrb.mxu2 %v7545_v36  ;;  %v9094_v35 = vld [vmem:[#allocation5 + $0x784] sm:$0xf]  ;;  %v9897_v37 = vpack.c.b16 %v608_v15, %v608_v15 }
  0x81   :  { %v9194_v41 = vld [vmem:[#allocation5 + $0xa9c] sm:$0xf0]  ;;  %v6874_v36 = vld [vmem:[#allocation5 + $0x7a0] sm:$0xf0] }
  0x82   :  { %v7512_v42 = vld [vmem:[#allocation5 + $0xc80] sm:$0xf]  ;;  %v7257_v47 = vor.u32 %v9194_v41, %v7256_v39  ;;  %2920 = vmatpush.bf16.msrb.mxu0 %v7001_v46  ;;  %v9158_v38 = vld [vmem:[#allocation5 + $0x984] sm:$0xf]  ;;  %v9901_v41 = vpack.c.b16 %v607_v25, %v607_v25  ;;  %2961 = vmatpush.bf16.msrb.mxu3 %v5917_v26  ;;  %v6877_v44 = vor.u32 %v9094_v35, %v6874_v36 }
  0x83   :  { %v9258_v43 = vld [vmem:[#allocation5 + $0xc9c] sm:$0xf0]  ;;  %v7130_v39 = vld [vmem:[#allocation5 + $0x9a0] sm:$0xf0] }
  0x84   :  { %v7513_v48 = vor.u32 %v9258_v43, %v7512_v42  ;;  %v6968_v49 = vld [vmem:[#allocation5 + $0x840] sm:$0xf]  ;;  %2933 = vmatpush.bf16.msrb.mxu1 %v7257_v47  ;;  %v6365_v42 = vor.u32 %v8966_v30, %v6362_v31  ;;  %v6621_v43 = vor.u32 %v9030_v32, %v6618_v34  ;;  %v6330_v46 = vld [vmem:[#allocation5 + $0x360] sm:$0xf0] }
  0x85   :  { %v9122_v50 = vld [vmem:[#allocation5 + $0x85c] sm:$0xf0]  ;;  %v9022_v47 = vld [vmem:[#allocation5 + $0x544] sm:$0xf]  ;;  %2962 = vmatmul.bf16.vlgmr.msrb.gmra.mxu3 %v9887_v19 }
  0x86   :  { %v7224_v51 = vld [vmem:[#allocation5 + $0xa40] sm:$0xf]  ;;  %v6969_v59 = vor.u32 %v9122_v50, %v6968_v49  ;;  %2946 = vmatpush.bf16.msrb.mxu2 %v7513_v48  ;;  %3006 = vmatpush.bf16.msra.mxu3 %v7165_v33  ;;  %v7133_v48 = vor.u32 %v9158_v38, %v7130_v39  ;;  %v6586_v49 = vld [vmem:[#allocation5 + $0x560] sm:$0xf0] }
  0x87   :  { %v9186_v53 = vld [vmem:[#allocation5 + $0xa5c] sm:$0xf0]  ;;  %v9086_v50 = vld [vmem:[#allocation5 + $0x744] sm:$0xf] }
  0x88   :  { %v7480_v54 = vld [vmem:[#allocation5 + $0xc40] sm:$0xf]  ;;  %v7225_v63 = vor.u32 %v9186_v53, %v7224_v51  ;;  %2921 = vmatpush.bf16.msrb.mxu0 %v6969_v59  ;;  %v6842_v51 = vld [vmem:[#allocation5 + $0x760] sm:$0xf0] }
  0x89   :  { %v9250_v55 = vld [vmem:[#allocation5 + $0xc5c] sm:$0xf0]  ;;  %v7098_v53 = vld [vmem:[#allocation5 + $0x960] sm:$0xf0]  ;;  %v6845_v56 = vor.u32 %v9086_v50, %v6842_v51 }
  0x8a   :  { %v6936_v58 = vld [vmem:[#allocation5 + $0x800] sm:$0xf]  ;;  %v7481_v0 = vor.u32 %v9250_v55, %v7480_v54  ;;  %2934 = vmatpush.bf16.msrb.mxu1 %v7225_v63  ;;  %v6333_v54 = vor.u32 %v8958_v45, %v6330_v46  ;;  %v6589_v55 = vor.u32 %v9022_v47, %v6586_v49  ;;  %v9014_v59 = vld [vmem:[#allocation5 + $0x504] sm:$0xf]  ;;  %3007 = vmatpush.bf16.msra.mxu3 %v7133_v48 }
  0x8b   :  { %v9114_v60 = vld [vmem:[#allocation5 + $0x81c] sm:$0xf0]  ;;  %v6810_v63 = vld [vmem:[#allocation5 + $0x720] sm:$0xf0] }
  0x8c   :  { %v7192_v61 = vld [vmem:[#allocation5 + $0xa00] sm:$0xf]  ;;  %v6937_v11 = vor.u32 %v9114_v60, %v6936_v58  ;;  %2947 = vmatpush.bf16.msrb.mxu2 %v7481_v0  ;;  %v6298_v58 = vld [vmem:[#allocation5 + $0x320] sm:$0xf0]  ;;  %v7101_v60 = vor.u32 %v9150_v52, %v7098_v53 }
  0x8d   :  { %v9178_v62 = vld [vmem:[#allocation5 + $0xa1c] sm:$0xf0]  ;;  %v9142_v0 = vld [vmem:[#allocation5 + $0x904] sm:$0xf] }
  0x8e   :  { %v7448_v1 = vld [vmem:[#allocation5 + $0xc00] sm:$0xf]  ;;  %v7193_v16 = vor.u32 %v9178_v62, %v7192_v61  ;;  %2922 = vmatpush.bf16.msrb.mxu0 %v6937_v11  ;;  %v6554_v61 = vld [vmem:[#allocation5 + $0x520] sm:$0xf0]  ;;  %3008 = vmatpush.bf16.msra.mxu3 %v7101_v60 }
  0x8f   :  { %v9242_v2 = vld [vmem:[#allocation5 + $0xc1c] sm:$0xf0]  ;;  %v9078_v62 = vld [vmem:[#allocation5 + $0x704] sm:$0xf]  ;;  %v6557_v3 = vor.u32 %v9014_v59, %v6554_v61 }
  0x90   :  { %v7449_v17 = vor.u32 %v9242_v2, %v7448_v1  ;;  %2935 = vmatpush.bf16.msrb.mxu1 %v7193_v16  ;;  %v7066_v1 = vld [vmem:[#allocation5 + $0x920] sm:$0xf0]  ;;  %v6301_v2 = vor.u32 %v8950_v57, %v6298_v58  ;;  %v6813_v4 = vor.u32 %v9078_v62, %v6810_v63  ;;  %v6144_v62 = vld [vmem:[#allocation5 + $0x1c8] sm:$0xf] }
  0x91   :  { %2923 = vmatmul.bf16.vlgmr.msrb.gmra.mxu0 %v9899_v40  ;;  %v8942_v5 = vld [vmem:[#allocation5 + $0x2c4] sm:$0xf]  ;;  %v7069_v8 = vor.u32 %v9142_v0, %v7066_v1  ;;  %v8915_v63 = vld [vmem:[#allocation5 + $0x1e4] sm:$0xf0] }
  0x92   :  { %2948 = vmatpush.bf16.msrb.mxu2 %v7449_v17  ;;  %2967 = vmatpush.bf16.msra.mxu0 %v6397_v27  ;;  %v6266_v6 = vld [vmem:[#allocation5 + $0x2e0] sm:$0xf0] }
  0x93   :  { %2936 = vmatmul.bf16.vlgmr.msrb.gmra.mxu1 %v9901_v41  ;;  %v9006_v7 = vld [vmem:[#allocation5 + $0x4c4] sm:$0xf]  ;;  %v6269_v14 = vor.u32 %v8942_v5, %v6266_v6  ;;  %3009 = vmatpush.bf16.msra.mxu3 %v7069_v8 }
  0x94   :  { %2980 = vmatpush.bf16.msra.mxu1 %v6653_v28  ;;  %v6522_v9 = vld [vmem:[#allocation5 + $0x4e0] sm:$0xf0] }
  0x95   :  { %2949 = vmatmul.bf16.vlgmr.msrb.gmra.mxu2 %v9897_v37  ;;  %v9070_v10 = vld [vmem:[#allocation5 + $0x6c4] sm:$0xf]  ;;  %v6525_v15 = vor.u32 %v9006_v7, %v6522_v9  ;;  %v6145_v7 = vor.u32 %v8915_v63, %v6144_v62 }
  0x96   :  { %2993 = vmatpush.bf16.msra.mxu2 %v6909_v29  ;;  %2968 = vmatpush.bf16.msra.mxu0 %v6365_v42  ;;  %v6778_v11 = vld [vmem:[#allocation5 + $0x6e0] sm:$0xf0] }
  0x97   :  { %v9134_v12 = vld [vmem:[#allocation5 + $0x8c4] sm:$0xf]  ;;  %v6781_v16 = vor.u32 %v9070_v10, %v6778_v11 }
  0x98   :  { %2981 = vmatpush.bf16.msra.mxu1 %v6621_v43  ;;  %v7034_v13 = vld [vmem:[#allocation5 + $0x8e0] sm:$0xf0] }
  0x99   :  { %v8934_v17 = vld [vmem:[#allocation5 + $0x284] sm:$0xf]  ;;  %v7037_v24 = vor.u32 %v9134_v12, %v7034_v13  ;;  %v6112_v13 = vld [vmem:[#allocation5 + $0x188] sm:$0xf] }
  0x9a   :  { %2994 = vmatpush.bf16.msra.mxu2 %v6877_v44  ;;  %2969 = vmatpush.bf16.msra.mxu0 %v6333_v54  ;;  %v6234_v21 = vld [vmem:[#allocation5 + $0x2a0] sm:$0xf0] }
  0x9b   :  { %v8998_v23 = vld [vmem:[#allocation5 + $0x484] sm:$0xf]  ;;  %v6237_v30 = vor.u32 %v8934_v17, %v6234_v21  ;;  %3010 = vmatpush.bf16.msra.mxu3 %v7037_v24 }
  0x9c   :  { %2982 = vmatpush.bf16.msra.mxu1 %v6589_v55  ;;  %v6490_v25 = vld [vmem:[#allocation5 + $0x4a0] sm:$0xf0] }
  0x9d   :  { %v9062_v26 = vld [vmem:[#allocation5 + $0x684] sm:$0xf]  ;;  %v6493_v31 = vor.u32 %v8998_v23, %v6490_v25 }
  0x9e   :  { %2995 = vmatpush.bf16.msra.mxu2 %v6845_v56  ;;  %2970 = vmatpush.bf16.msra.mxu0 %v6301_v2  ;;  %v6746_v27 = vld [vmem:[#allocation5 + $0x6a0] sm:$0xf0]  ;;  %v6400_v2 = vld [vmem:[#allocation5 + $0x3c8] sm:$0xf] }
  0x9f   :  { %v9126_v28 = vld [vmem:[#allocation5 + $0x884] sm:$0xf]  ;;  %v6749_v32 = vor.u32 %v9062_v26, %v6746_v27 }
  0xa0   :  { %2983 = vmatpush.bf16.msra.mxu1 %v6557_v3  ;;  %v7002_v29 = vld [vmem:[#allocation5 + $0x8a0] sm:$0xf0]  ;;  %v8979_v3 = vld [vmem:[#allocation5 + $0x3e4] sm:$0xf0] }
  0xa1   :  { %v8926_v33 = vld [vmem:[#allocation5 + $0x244] sm:$0xf]  ;;  %v7005_v36 = vor.u32 %v9126_v28, %v7002_v29  ;;  %v6401_v11 = vor.u32 %v8979_v3, %v6400_v2  ;;  %v6080_v29 = vld [vmem:[#allocation5 + $0x148] sm:$0xf] }
  0xa2   :  { %2996 = vmatpush.bf16.msra.mxu2 %v6813_v4  ;;  %2971 = vmatpush.bf16.msra.mxu0 %v6269_v14  ;;  %v6202_v34 = vld [vmem:[#allocation5 + $0x260] sm:$0xf0]  ;;  %v8907_v14 = vld [vmem:[#allocation5 + $0x1a4] sm:$0xf0] }
  0xa3   :  { %v8990_v35 = vld [vmem:[#allocation5 + $0x444] sm:$0xf]  ;;  %v6205_v45 = vor.u32 %v8926_v33, %v6202_v34  ;;  %3011 = vmatpush.bf16.msra.mxu3 %v7005_v36  ;;  %v6113_v23 = vor.u32 %v8907_v14, %v6112_v13 }
  0xa4   :  { %2984 = vmatpush.bf16.msra.mxu1 %v6525_v15  ;;  %v6458_v38 = vld [vmem:[#allocation5 + $0x460] sm:$0xf0]  ;;  %v6368_v15 = vld [vmem:[#allocation5 + $0x388] sm:$0xf] }
  0xa5   :  { %v9054_v39 = vld [vmem:[#allocation5 + $0x644] sm:$0xf]  ;;  %v6461_v48 = vor.u32 %v8990_v35, %v6458_v38 }
  0xa6   :  { %2997 = vmatpush.bf16.msra.mxu2 %v6781_v16  ;;  %v6714_v42 = vld [vmem:[#allocation5 + $0x660] sm:$0xf0]  ;;  %2972 = vmatpush.bf16.msra.mxu0 %v6237_v30  ;;  %v8971_v16 = vld [vmem:[#allocation5 + $0x3a4] sm:$0xf0] }
  0xa7   :  { %v9118_v43 = vld [vmem:[#allocation5 + $0x844] sm:$0xf]  ;;  %v6717_v49 = vor.u32 %v9054_v39, %v6714_v42  ;;  %v6369_v27 = vor.u32 %v8971_v16, %v6368_v15  ;;  %v8899_v30 = vld [vmem:[#allocation5 + $0x164] sm:$0xf0] }
  0xa8   :  { %v6970_v44 = vld [vmem:[#allocation5 + $0x860] sm:$0xf0]  ;;  %2985 = vmatpush.bf16.msra.mxu1 %v6493_v31  ;;  %v6336_v31 = vld [vmem:[#allocation5 + $0x348] sm:$0xf]  ;;  %v6081_v35 = vor.u32 %v8899_v30, %v6080_v29 }
  0xa9   :  { %v8918_v46 = vld [vmem:[#allocation5 + $0x204] sm:$0xf]  ;;  %v6973_v53 = vor.u32 %v9118_v43, %v6970_v44  ;;  %v6048_v44 = vld [vmem:[#allocation5 + $0x108] sm:$0xf] }
  0xaa   :  { %v6170_v47 = vld [vmem:[#allocation5 + $0x220] sm:$0xf0]  ;;  %2998 = vmatpush.bf16.msra.mxu2 %v6749_v32  ;;  %2973 = vmatpush.bf16.msra.mxu0 %v6205_v45  ;;  %v8963_v32 = vld [vmem:[#allocation5 + $0x364] sm:$0xf0] }
  0xab   :  { %v8982_v50 = vld [vmem:[#allocation5 + $0x404] sm:$0xf]  ;;  %v6173_v60 = vor.u32 %v8918_v46, %v6170_v47  ;;  %3012 = vmatpush.bf16.msra.mxu3 %v6973_v53  ;;  %v6337_v42 = vor.u32 %v8963_v32, %v6336_v31  ;;  %v8891_v45 = vld [vmem:[#allocation5 + $0x124] sm:$0xf0] }
  0xac   :  { %v6426_v51 = vld [vmem:[#allocation5 + $0x420] sm:$0xf0]  ;;  %2986 = vmatpush.bf16.msra.mxu1 %v6461_v48  ;;  %v6304_v46 = vld [vmem:[#allocation5 + $0x308] sm:$0xf] }
  0xad   :  { %v9046_v52 = vld [vmem:[#allocation5 + $0x604] sm:$0xf]  ;;  %v6429_v0 = vor.u32 %v8982_v50, %v6426_v51  ;;  %v8955_v47 = vld [vmem:[#allocation5 + $0x324] sm:$0xf0]  ;;  %v6049_v50 = vor.u32 %v8891_v45, %v6048_v44 }
  0xae   :  { %v6682_v54 = vld [vmem:[#allocation5 + $0x620] sm:$0xf0]  ;;  %2999 = vmatpush.bf16.msra.mxu2 %v6717_v49  ;;  %2974 = vmatpush.bf16.msra.mxu0 %v6173_v60  ;;  %v5952_v16 = vld [vmem:[#allocation5 + $0x48] sm:$0xf] }
  0xaf   :  { %v9110_v55 = vld [vmem:[#allocation5 + $0x804] sm:$0xf]  ;;  %v6685_v1 = vor.u32 %v9046_v52, %v6682_v54  ;;  %v6305_v54 = vor.u32 %v8955_v47, %v6304_v46  ;;  %v5920_v31 = vld [vmem:[#allocation5 + $0x8] sm:$0xf] }
  0xb0   :  { %v6938_v56 = vld [vmem:[#allocation5 + $0x820] sm:$0xf0]  ;;  %2987 = vmatpush.bf16.msra.mxu1 %v6429_v0  ;;  %v7168_v44 = vld [vmem:[#allocation5 + $0x9c8] sm:$0xf] }
  0xb1   :  { %v9230_v57 = vld [vmem:[#allocation5 + $0xbc4] sm:$0xf]  ;;  %v6941_v4 = vor.u32 %v9110_v55, %v6938_v56  ;;  %2975 = vmatmul.bf16.vlgmr.msra.gmra.mxu0 %v9891_v22  ;;  %v6016_v56 = vld [vmem:[#allocation5 + $0xc8] sm:$0xf] }
  0xb2   :  { %v7418_v58 = vld [vmem:[#allocation5 + $0xbe0] sm:$0xf0]  ;;  %3000 = vmatpush.bf16.msra.mxu2 %v6685_v1  ;;  %v9171_v45 = vld [vmem:[#allocation5 + $0x9e4] sm:$0xf0] }
  0xb3   :  { %v9294_v59 = vld [vmem:[#allocation5 + $0xdc4] sm:$0xf]  ;;  %v7421_v5 = vor.u32 %v9230_v57, %v7418_v58  ;;  %3013 = vmatpush.bf16.msra.mxu3 %v6941_v4  ;;  %2988 = vmatmul.bf16.vlgmr.msra.gmra.mxu1 %v9885_v18  ;;  %v8883_v57 = vld [vmem:[#allocation5 + $0xe4] sm:$0xf0] }
  0xb4   :  { %v7674_v61 = vld [vmem:[#allocation5 + $0xde0] sm:$0xf0]  ;;  %v6272_v58 = vld [vmem:[#allocation5 + $0x2c8] sm:$0xf]  ;;  %v6017_v62 = vor.u32 %v8883_v57, %v6016_v56 }
  0xb5   :  { %v7677_v6 = vor.u32 %v9294_v59, %v7674_v61  ;;  %v9222_v8 = vld [vmem:[#allocation5 + $0xb84] sm:$0xf]  ;;  %3019 = vmatpush.bf16.msrb.mxu0 %v7421_v5  ;;  %3001 = vmatmul.bf16.vlgmr.msra.gmra.mxu2 %v9889_v20  ;;  %v8947_v59 = vld [vmem:[#allocation5 + $0x2e4] sm:$0xf0] }
  0xb6   :  { %v7386_v9 = vld [vmem:[#allocation5 + $0xba0] sm:$0xf0]  ;;  %3045 = vmatpush.bf16.msrb.mxu2 %v6145_v7  ;;  %3014 = vmatmul.bf16.vlgmr.msra.gmra.mxu3 %v9899_v40  ;;  %v6273_v2 = vor.u32 %v8947_v59, %v6272_v58  ;;  %v5984_v4 = vld [vmem:[#allocation5 + $0x88] sm:$0xf] }
  0xb7   :  { %v9286_v10 = vld [vmem:[#allocation5 + $0xd84] sm:$0xf]  ;;  %v7389_v17 = vor.u32 %v9222_v8, %v7386_v9  ;;  %3032 = vmatpush.bf16.msrb.mxu1 %v7677_v6  ;;  %3058 = vmatpush.bf16.msrb.mxu3 %v6401_v11  ;;  %v8875_v5 = vld [vmem:[#allocation5 + $0xa4] sm:$0xf0] }
  0xb8   :  { %v7642_v12 = vld [vmem:[#allocation5 + $0xda0] sm:$0xf0]  ;;  %v6240_v6 = vld [vmem:[#allocation5 + $0x288] sm:$0xf] }
  0xb9   :  { %v7645_v21 = vor.u32 %v9286_v10, %v7642_v12  ;;  %v9214_v24 = vld [vmem:[#allocation5 + $0xb44] sm:$0xf]  ;;  %3020 = vmatpush.bf16.msrb.mxu0 %v7389_v17  ;;  %v8939_v7 = vld [vmem:[#allocation5 + $0x2a4] sm:$0xf0]  ;;  %v5985_v10 = vor.u32 %v8875_v5, %v5984_v4 }
  0xba   :  { %v7354_v25 = vld [vmem:[#allocation5 + $0xb60] sm:$0xf0]  ;;  %3046 = vmatpush.bf16.msrb.mxu2 %v6113_v23  ;;  %v6241_v14 = vor.u32 %v8939_v7, %v6240_v6  ;;  %v8867_v17 = vld [vmem:[#allocation5 + $0x64] sm:$0xf0] }
  0xbb   :  { %v9278_v26 = vld [vmem:[#allocation5 + $0xd44] sm:$0xf]  ;;  %v7357_v33 = vor.u32 %v9214_v24, %v7354_v25  ;;  %3033 = vmatpush.bf16.msrb.mxu1 %v7645_v21  ;;  %3059 = vmatpush.bf16.msrb.mxu3 %v6369_v27  ;;  %v6208_v21 = vld [vmem:[#allocation5 + $0x248] sm:$0xf] }
  0xbc   :  { %v7610_v28 = vld [vmem:[#allocation5 + $0xd60] sm:$0xf0]  ;;  %v8931_v23 = vld [vmem:[#allocation5 + $0x264] sm:$0xf0] }
  0xbd   :  { %v7613_v34 = vor.u32 %v9278_v26, %v7610_v28  ;;  %v9206_v36 = vld [vmem:[#allocation5 + $0xb04] sm:$0xf]  ;;  %3021 = vmatpush.bf16.msrb.mxu0 %v7357_v33  ;;  %v5953_v28 = vor.u32 %v8867_v17, %v5952_v16  ;;  %v6209_v32 = vor.u32 %v8931_v23, %v6208_v21  ;;  %v8859_v33 = vld [vmem:[#allocation5 + $0x24] sm:$0xf0] }
  0xbe   :  { %v7322_v38 = vld [vmem:[#allocation5 + $0xb20] sm:$0xf0]  ;;  %3047 = vmatpush.bf16.msrb.mxu2 %v6081_v35  ;;  %v8923_v35 = vld [vmem:[#allocation5 + $0x224] sm:$0xf0]  ;;  %v5921_v47 = vor.u32 %v8859_v33, %v5920_v31 }
  0xbf   :  { %v9270_v39 = vld [vmem:[#allocation5 + $0xd04] sm:$0xf]  ;;  %v7325_v48 = vor.u32 %v9206_v36, %v7322_v38  ;;  %3034 = vmatpush.bf16.msrb.mxu1 %v7613_v34  ;;  %3060 = vmatpush.bf16.msrb.mxu3 %v6337_v42  ;;  %v6176_v34 = vld [vmem:[#allocation5 + $0x208] sm:$0xf] }
  0xc0   :  { %v7578_v43 = vld [vmem:[#allocation5 + $0xd20] sm:$0xf0]  ;;  %v6656_v36 = vld [vmem:[#allocation5 + $0x5c8] sm:$0xf] }
  0xc1   :  { %v7581_v49 = vor.u32 %v9270_v39, %v7578_v43  ;;  %v9198_v51 = vld [vmem:[#allocation5 + $0xac4] sm:$0xf]  ;;  %3022 = vmatpush.bf16.msrb.mxu0 %v7325_v48  ;;  %v9043_v38 = vld [vmem:[#allocation5 + $0x5e4] sm:$0xf0] }
  0xc2   :  { %v7290_v52 = vld [vmem:[#allocation5 + $0xae0] sm:$0xf0]  ;;  %3048 = vmatpush.bf16.msrb.mxu2 %v6049_v50  ;;  %v6912_v39 = vld [vmem:[#allocation5 + $0x7c8] sm:$0xf]  ;;  %v6177_v50 = vor.u32 %v8923_v35, %v6176_v34 }
  0xc3   :  { %v9262_v53 = vld [vmem:[#allocation5 + $0xcc4] sm:$0xf]  ;;  %v7293_v60 = vor.u32 %v9198_v51, %v7290_v52  ;;  %3035 = vmatpush.bf16.msrb.mxu1 %v7581_v49  ;;  %3061 = vmatpush.bf16.msrb.mxu3 %v6305_v54  ;;  %v9107_v43 = vld [vmem:[#allocation5 + $0x7e4] sm:$0xf0]  ;;  %v6657_v51 = vor.u32 %v9043_v38, %v6656_v36 }
  0xc4   :  { %v7546_v55 = vld [vmem:[#allocation5 + $0xce0] sm:$0xf0]  ;;  %v7424_v48 = vld [vmem:[#allocation5 + $0xbc8] sm:$0xf]  ;;  %v6913_v52 = vor.u32 %v9107_v43, %v6912_v39 }
  0xc5   :  { %v7549_v61 = vor.u32 %v9262_v53, %v7546_v55  ;;  %v9190_v63 = vld [vmem:[#allocation5 + $0xa84] sm:$0xf]  ;;  %3023 = vmatpush.bf16.msrb.mxu0 %v7293_v60  ;;  %v9235_v49 = vld [vmem:[#allocation5 + $0xbe4] sm:$0xf0]  ;;  %v7169_v53 = vor.u32 %v9171_v45, %v7168_v44 }
  0xc6   :  { %v7258_v0 = vld [vmem:[#allocation5 + $0xaa0] sm:$0xf0]  ;;  %3049 = vmatpush.bf16.msrb.mxu2 %v6017_v62  ;;  %v6624_v54 = vld [vmem:[#allocation5 + $0x588] sm:$0xf]  ;;  %v7425_v57 = vor.u32 %v9235_v49, %v7424_v48 }
  0xc7   :  { %v9254_v1 = vld [vmem:[#allocation5 + $0xc84] sm:$0xf]  ;;  %v7261_v8 = vor.u32 %v9190_v63, %v7258_v0  ;;  %3036 = vmatpush.bf16.msrb.mxu1 %v7549_v61  ;;  %3062 = vmatpush.bf16.msrb.mxu3 %v6273_v2  ;;  %v9035_v55 = vld [vmem:[#allocation5 + $0x5a4] sm:$0xf0] }
  0xc8   :  { %v7514_v3 = vld [vmem:[#allocation5 + $0xca0] sm:$0xf0]  ;;  %v6880_v56 = vld [vmem:[#allocation5 + $0x788] sm:$0xf]  ;;  %v6625_v63 = vor.u32 %v9035_v55, %v6624_v54 }
  0xc9   :  { %v7517_v9 = vor.u32 %v9254_v1, %v7514_v3  ;;  %v9182_v11 = vld [vmem:[#allocation5 + $0xa44] sm:$0xf]  ;;  %3024 = vmatpush.bf16.msrb.mxu0 %v7261_v8  ;;  %v9099_v58 = vld [vmem:[#allocation5 + $0x7a4] sm:$0xf0] }
  0xca   :  { %v7226_v12 = vld [vmem:[#allocation5 + $0xa60] sm:$0xf0]  ;;  %3050 = vmatpush.bf16.msrb.mxu2 %v5985_v10  ;;  %v7136_v59 = vld [vmem:[#allocation5 + $0x988] sm:$0xf]  ;;  %v6881_v0 = vor.u32 %v9099_v58, %v6880_v56 }
  0xcb   :  { %v9246_v13 = vld [vmem:[#allocation5 + $0xc44] sm:$0xf]  ;;  %v7229_v24 = vor.u32 %v9182_v11, %v7226_v12  ;;  %3037 = vmatpush.bf16.msrb.mxu1 %v7517_v9  ;;  %3063 = vmatpush.bf16.msrb.mxu3 %v6241_v14  ;;  %v9163_v60 = vld [vmem:[#allocation5 + $0x9a4] sm:$0xf0] }
  0xcc   :  { %v7482_v15 = vld [vmem:[#allocation5 + $0xc60] sm:$0xf0]  ;;  %v7392_v61 = vld [vmem:[#allocation5 + $0xb88] sm:$0xf]  ;;  %v7137_v1 = vor.u32 %v9163_v60, %v7136_v59 }
  0xcd   :  { %v9174_v25 = vld [vmem:[#allocation5 + $0xa04] sm:$0xf]  ;;  %v7485_v27 = vor.u32 %v9246_v13, %v7482_v15  ;;  %3025 = vmatpush.bf16.msrb.mxu0 %v7229_v24  ;;  %v9227_v62 = vld [vmem:[#allocation5 + $0xba4] sm:$0xf0] }
  0xce   :  { %v7194_v26 = vld [vmem:[#allocation5 + $0xa20] sm:$0xf0]  ;;  %3051 = vmatpush.bf16.msrb.mxu2 %v5953_v28  ;;  %v6592_v2 = vld [vmem:[#allocation5 + $0x548] sm:$0xf]  ;;  %v7393_v5 = vor.u32 %v9227_v62, %v7392_v61 }
  0xcf   :  { %v9238_v29 = vld [vmem:[#allocation5 + $0xc04] sm:$0xf]  ;;  %v7197_v42 = vor.u32 %v9174_v25, %v7194_v26  ;;  %3038 = vmatpush.bf16.msrb.mxu1 %v7485_v27  ;;  %3064 = vmatpush.bf16.msrb.mxu3 %v6209_v32  ;;  %v9027_v3 = vld [vmem:[#allocation5 + $0x564] sm:$0xf0] }
  0xd0   :  { %v7450_v30 = vld [vmem:[#allocation5 + $0xc20] sm:$0xf0]  ;;  %v6848_v4 = vld [vmem:[#allocation5 + $0x748] sm:$0xf]  ;;  %v6593_v11 = vor.u32 %v9027_v3, %v6592_v2 }
  0xd1   :  { %v7453_v46 = vor.u32 %v9238_v29, %v7450_v30  ;;  %3026 = vmatpush.bf16.msrb.mxu0 %v7197_v42  ;;  %v9091_v6 = vld [vmem:[#allocation5 + $0x764] sm:$0xf0] }
  0xd2   :  { %3052 = vmatpush.bf16.msrb.mxu2 %v5921_v47  ;;  %v7104_v7 = vld [vmem:[#allocation5 + $0x948] sm:$0xf]  ;;  %v6849_v12 = vor.u32 %v9091_v6, %v6848_v4 }
  0xd3   :  { %3039 = vmatpush.bf16.msrb.mxu1 %v7453_v46  ;;  %3065 = vmatpush.bf16.msrb.mxu3 %v6177_v50  ;;  %v9155_v8 = vld [vmem:[#allocation5 + $0x964] sm:$0xf0] }
  0xd4   :  { %3027 = vmatmul.bf16.vlgmr.msrb.gmra.mxu0 %v9901_v41  ;;  %v7360_v9 = vld [vmem:[#allocation5 + $0xb48] sm:$0xf]  ;;  %v7105_v13 = vor.u32 %v9155_v8, %v7104_v7 }
  0xd5   :  { %3071 = vmatpush.bf16.msra.mxu0 %v6657_v51  ;;  %v9219_v10 = vld [vmem:[#allocation5 + $0xb64] sm:$0xf0]  ;;  %3053 = vmatmul.bf16.vlgmr.msrb.gmra.mxu2 %v9887_v19 }
  0xd6   :  { %3097 = vmatpush.bf16.msra.mxu2 %v7169_v53  ;;  %3040 = vmatmul.bf16.vlgmr.msrb.gmra.mxu1 %v9897_v37  ;;  %v6560_v14 = vld [vmem:[#allocation5 + $0x508] sm:$0xf]  ;;  %v7361_v17 = vor.u32 %v9219_v10, %v7360_v9 }
  0xd7   :  { %3084 = vmatpush.bf16.msra.mxu1 %v6913_v52  ;;  %3110 = vmatpush.bf16.msra.mxu3 %v7425_v57  ;;  %v9019_v15 = vld [vmem:[#allocation5 + $0x524] sm:$0xf0] }
  0xd8   :  { %3066 = vmatmul.bf16.vlgmr.msrb.gmra.mxu3 %v9891_v22  ;;  %v6816_v16 = vld [vmem:[#allocation5 + $0x708] sm:$0xf]  ;;  %v6561_v27 = vor.u32 %v9019_v15, %v6560_v14 }
  0xd9   :  { %3072 = vmatpush.bf16.msra.mxu0 %v6625_v63  ;;  %v9083_v21 = vld [vmem:[#allocation5 + $0x724] sm:$0xf0] }
  0xda   :  { %3098 = vmatpush.bf16.msra.mxu2 %v7137_v1  ;;  %v7072_v23 = vld [vmem:[#allocation5 + $0x908] sm:$0xf]  ;;  %v6817_v28 = vor.u32 %v9083_v21, %v6816_v16  ;;  %v8911_v16 = vld [vmem:[#allocation5 + $0x1cc] sm:$0xf] }
  0xdb   :  { %3085 = vmatpush.bf16.msra.mxu1 %v6881_v0  ;;  %3111 = vmatpush.bf16.msra.mxu3 %v7393_v5  ;;  %v9147_v24 = vld [vmem:[#allocation5 + $0x924] sm:$0xf0]  ;;  %v6146_v21 = vld [vmem:[#allocation5 + $0x1e8] sm:$0xf0] }
  0xdc   :  { %v7328_v25 = vld [vmem:[#allocation5 + $0xb08] sm:$0xf]  ;;  %v7073_v29 = vor.u32 %v9147_v24, %v7072_v23  ;;  %v8975_v23 = vld [vmem:[#allocation5 + $0x3cc] sm:$0xf] }
  0xdd   :  { %v9211_v26 = vld [vmem:[#allocation5 + $0xb24] sm:$0xf0]  ;;  %3073 = vmatpush.bf16.msra.mxu0 %v6593_v11  ;;  %v6402_v24 = vld [vmem:[#allocation5 + $0x3e8] sm:$0xf0] }
  0xde   :  { %3099 = vmatpush.bf16.msra.mxu2 %v7105_v13  ;;  %v6528_v30 = vld [vmem:[#allocation5 + $0x4c8] sm:$0xf]  ;;  %v7329_v33 = vor.u32 %v9211_v26, %v7328_v25 }
  0xdf   :  { %3086 = vmatpush.bf16.msra.mxu1 %v6849_v12  ;;  %v9011_v31 = vld [vmem:[#allocation5 + $0x4e4] sm:$0xf0]  ;;  %3112 = vmatpush.bf16.msra.mxu3 %v7361_v17 }
  0xe0   :  { %v6784_v32 = vld [vmem:[#allocation5 + $0x6c8] sm:$0xf]  ;;  %v6529_v42 = vor.u32 %v9011_v31, %v6528_v30  ;;  %v6149_v31 = vor.u32 %v8911_v16, %v6146_v21  ;;  %v9007_v16 = vld [vmem:[#allocation5 + $0x4cc] sm:$0xf] }
  0xe1   :  { %v9075_v34 = vld [vmem:[#allocation5 + $0x6e4] sm:$0xf0]  ;;  %3074 = vmatpush.bf16.msra.mxu0 %v6561_v27  ;;  %v9039_v27 = vld [vmem:[#allocation5 + $0x5cc] sm:$0xf] }
  0xe2   :  { %v7040_v35 = vld [vmem:[#allocation5 + $0x8c8] sm:$0xf]  ;;  %3100 = vmatpush.bf16.msra.mxu2 %v7073_v29  ;;  %v6785_v43 = vor.u32 %v9075_v34, %v6784_v32  ;;  %v6405_v32 = vor.u32 %v8975_v23, %v6402_v24 }
  0xe3   :  { %v9139_v36 = vld [vmem:[#allocation5 + $0x8e4] sm:$0xf0]  ;;  %3087 = vmatpush.bf16.msra.mxu1 %v6817_v28  ;;  %3113 = vmatpush.bf16.msra.mxu3 %v7329_v33  ;;  %v6658_v28 = vld [vmem:[#allocation5 + $0x5e8] sm:$0xf0] }
  0xe4   :  { %v7296_v38 = vld [vmem:[#allocation5 + $0xac8] sm:$0xf]  ;;  %v7041_v44 = vor.u32 %v9139_v36, %v7040_v35  ;;  %v8903_v35 = vld [vmem:[#allocation5 + $0x18c] sm:$0xf]  ;;  %v6661_v36 = vor.u32 %v9039_v27, %v6658_v28 }
  0xe5   :  { %v9203_v39 = vld [vmem:[#allocation5 + $0xae4] sm:$0xf0]  ;;  %3075 = vmatpush.bf16.msra.mxu0 %v6529_v42  ;;  %v6370_v42 = vld [vmem:[#allocation5 + $0x3a8] sm:$0xf0] }
  0xe6   :  { %v6496_v45 = vld [vmem:[#allocation5 + $0x488] sm:$0xf]  ;;  %v7297_v48 = vor.u32 %v9203_v39, %v7296_v38  ;;  %3101 = vmatpush.bf16.msra.mxu2 %v7041_v44  ;;  %v6114_v38 = vld [vmem:[#allocation5 + $0x1a8] sm:$0xf0] }
  0xe7   :  { %v9003_v46 = vld [vmem:[#allocation5 + $0x4a4] sm:$0xf0]  ;;  %3088 = vmatpush.bf16.msra.mxu1 %v6785_v43  ;;  %v8967_v39 = vld [vmem:[#allocation5 + $0x38c] sm:$0xf] }
  0xe8   :  { %v6752_v47 = vld [vmem:[#allocation5 + $0x688] sm:$0xf]  ;;  %v6497_v54 = vor.u32 %v9003_v46, %v6496_v45  ;;  %3114 = vmatpush.bf16.msra.mxu3 %v7297_v48  ;;  %v9031_v43 = vld [vmem:[#allocation5 + $0x58c] sm:$0xf]  ;;  %v6117_v46 = vor.u32 %v8903_v35, %v6114_v38 }
  0xe9   :  { %v9067_v49 = vld [vmem:[#allocation5 + $0x6a4] sm:$0xf0]  ;;  %v6626_v44 = vld [vmem:[#allocation5 + $0x5a8] sm:$0xf0] }
  0xea   :  { %v7008_v50 = vld [vmem:[#allocation5 + $0x888] sm:$0xf]  ;;  %v6753_v55 = vor.u32 %v9067_v49, %v6752_v47  ;;  %3076 = vmatpush.bf16.msra.mxu0 %v6497_v54  ;;  %v6373_v47 = vor.u32 %v8967_v39, %v6370_v42  ;;  %v6338_v54 = vld [vmem:[#allocation5 + $0x368] sm:$0xf0] }
  0xeb   :  { %v9131_v51 = vld [vmem:[#allocation5 + $0x8a4] sm:$0xf0]  ;;  %v8871_v27 = vld [vmem:[#allocation5 + $0x8c] sm:$0xf] }
  0xec   :  { %v7264_v52 = vld [vmem:[#allocation5 + $0xa88] sm:$0xf]  ;;  %v7009_v56 = vor.u32 %v9131_v51, %v7008_v50  ;;  %3089 = vmatpush.bf16.msra.mxu1 %v6753_v55  ;;  %v8895_v50 = vld [vmem:[#allocation5 + $0x14c] sm:$0xf]  ;;  %v6629_v51 = vor.u32 %v9031_v43, %v6626_v44 }
  0xed   :  { %v9195_v53 = vld [vmem:[#allocation5 + $0xaa4] sm:$0xf0]  ;;  %v9023_v55 = vld [vmem:[#allocation5 + $0x54c] sm:$0xf] }
  0xee   :  { %v6464_v57 = vld [vmem:[#allocation5 + $0x448] sm:$0xf]  ;;  %v7265_v60 = vor.u32 %v9195_v53, %v7264_v52  ;;  %3102 = vmatpush.bf16.msra.mxu2 %v7009_v56  ;;  %v6082_v52 = vld [vmem:[#allocation5 + $0x168] sm:$0xf0] }
  0xef   :  { %v8995_v58 = vld [vmem:[#allocation5 + $0x464] sm:$0xf0]  ;;  %v8959_v53 = vld [vmem:[#allocation5 + $0x34c] sm:$0xf] }
  0xf0   :  { %v6720_v59 = vld [vmem:[#allocation5 + $0x648] sm:$0xf]  ;;  %v6465_v2 = vor.u32 %v8995_v58, %v6464_v57  ;;  %3115 = vmatpush.bf16.msra.mxu3 %v7265_v60  ;;  %v6594_v56 = vld [vmem:[#allocation5 + $0x568] sm:$0xf0]  ;;  %v6085_v58 = vor.u32 %v8895_v50, %v6082_v52 }
  0xf1   :  { %v9059_v61 = vld [vmem:[#allocation5 + $0x664] sm:$0xf0]  ;;  %v8863_v44 = vld [vmem:[#allocation5 + $0x4c] sm:$0xf] }
  0xf2   :  { %v6976_v62 = vld [vmem:[#allocation5 + $0x848] sm:$0xf]  ;;  %v6721_v5 = vor.u32 %v9059_v61, %v6720_v59  ;;  %3077 = vmatpush.bf16.msra.mxu0 %v6465_v2  ;;  %v6341_v59 = vor.u32 %v8959_v53, %v6338_v54  ;;  %v6306_v2 = vld [vmem:[#allocation5 + $0x328] sm:$0xf0] }
  0xf3   :  { %v9123_v63 = vld [vmem:[#allocation5 + $0x864] sm:$0xf0]  ;;  %v6210_v50 = vld [vmem:[#allocation5 + $0x268] sm:$0xf0] }
  0xf4   :  { %v7232_v0 = vld [vmem:[#allocation5 + $0xa48] sm:$0xf]  ;;  %v6977_v6 = vor.u32 %v9123_v63, %v6976_v62  ;;  %3090 = vmatpush.bf16.msra.mxu1 %v6721_v5  ;;  %v8887_v62 = vld [vmem:[#allocation5 + $0x10c] sm:$0xf]  ;;  %v6597_v63 = vor.u32 %v9023_v55, %v6594_v56 }
  0xf5   :  { %v9187_v1 = vld [vmem:[#allocation5 + $0xa64] sm:$0xf0]  ;;  %v6466_v52 = vld [vmem:[#allocation5 + $0x468] sm:$0xf0] }
  0xf6   :  { %v6432_v3 = vld [vmem:[#allocation5 + $0x408] sm:$0xf]  ;;  %v7233_v10 = vor.u32 %v9187_v1, %v7232_v0  ;;  %3103 = vmatpush.bf16.msra.mxu2 %v6977_v6  ;;  %v6050_v0 = vld [vmem:[#allocation5 + $0x128] sm:$0xf0] }
  0xf7   :  { %v8987_v4 = vld [vmem:[#allocation5 + $0x424] sm:$0xf0]  ;;  %v8951_v1 = vld [vmem:[#allocation5 + $0x30c] sm:$0xf] }
  0xf8   :  { %v6688_v7 = vld [vmem:[#allocation5 + $0x608] sm:$0xf]  ;;  %v6433_v17 = vor.u32 %v8987_v4, %v6432_v3  ;;  %3116 = vmatpush.bf16.msra.mxu3 %v7233_v10  ;;  %v9015_v3 = vld [vmem:[#allocation5 + $0x50c] sm:$0xf] }
  0xf9   :  { %v9051_v8 = vld [vmem:[#allocation5 + $0x624] sm:$0xf0]  ;;  %v6562_v4 = vld [vmem:[#allocation5 + $0x528] sm:$0xf0] }
  0xfa   :  { %v6944_v9 = vld [vmem:[#allocation5 + $0x808] sm:$0xf]  ;;  %v6689_v25 = vor.u32 %v9051_v8, %v6688_v7  ;;  %3078 = vmatpush.bf16.msra.mxu0 %v6433_v17  ;;  %v6053_v7 = vor.u32 %v8887_v62, %v6050_v0  ;;  %v6309_v8 = vor.u32 %v8951_v1, %v6306_v2  ;;  %v8879_v10 = vld [vmem:[#allocation5 + $0xcc] sm:$0xf]  ;;  %v2898_v62 = vpop.f32.mrf.mxu2 }
  0xfb   :  { %v9115_v11 = vld [vmem:[#allocation5 + $0x824] sm:$0xf0]  ;;  %v6530_v17 = vld [vmem:[#allocation5 + $0x4e8] sm:$0xf0] }
  0xfc   :  { %v7200_v12 = vld [vmem:[#allocation5 + $0xa08] sm:$0xf]  ;;  %v6945_v26 = vor.u32 %v9115_v11, %v6944_v9  ;;  %3091 = vmatpush.bf16.msra.mxu1 %v6689_v25  ;;  %v6018_v11 = vld [vmem:[#allocation5 + $0xe8] sm:$0xf0] }
  0xfd   :  { %v9179_v13 = vld [vmem:[#allocation5 + $0xa24] sm:$0xf0]  ;;  %3079 = vmatmul.bf16.vlgmr.msra.gmra.mxu0 %v9885_v18  ;;  %v6021_v24 = vor.u32 %v8879_v10, %v6018_v11  ;;  %v6178_v0 = vld [vmem:[#allocation5 + $0x228] sm:$0xf0] }
  0xfe   :  { %v7680_v14 = vld [vmem:[#allocation5 + $0xdc8] sm:$0xf]  ;;  %v7201_v29 = vor.u32 %v9179_v13, %v7200_v12  ;;  %3104 = vmatpush.bf16.msra.mxu2 %v6945_v26  ;;  %v6565_v12 = vor.u32 %v9015_v3, %v6562_v4  ;;  %v8943_v13 = vld [vmem:[#allocation5 + $0x2cc] sm:$0xf]  ;;  %v2911_v4 = vpop.f32.mrf.mxu3 }
  0xff   :  { %v9299_v15 = vld [vmem:[#allocation5 + $0xde4] sm:$0xf0]  ;;  %3092 = vmatmul.bf16.vlgmr.msra.gmra.mxu1 %v9889_v20  ;;  %v8983_v1 = vld [vmem:[#allocation5 + $0x40c] sm:$0xf] }
 0x100   :  { %v7681_v30 = vor.u32 %v9299_v15, %v7680_v14  ;;  %v7648_v33 = vld [vmem:[#allocation5 + $0xd88] sm:$0xf]  ;;  %3117 = vmatpush.bf16.msra.mxu3 %v7201_v29  ;;  %3136 = vmatpush.bf16.msrb.mxu1 %v6149_v31  ;;  %v6274_v14 = vld [vmem:[#allocation5 + $0x2e8] sm:$0xf0]  ;;  %v9919_v15 = vld [vmem:[#allocation7] sm:$0xff]  ;;  %v6533_v29 = vor.u32 %v9007_v16, %v6530_v17 }
 0x101   :  { %v9291_v34 = vld [vmem:[#allocation5 + $0xda4] sm:$0xf0]  ;;  %3105 = vmatmul.bf16.vlgmr.msra.gmra.mxu2 %v9899_v40  ;;  %v6277_v25 = vor.u32 %v8943_v13, %v6274_v14  ;;  %v582_v28 = vperm.slane %v9919_v15, 0  ;;  %v8935_v31 = vld [vmem:[#allocation5 + $0x28c] sm:$0xf] }
 0x102   :  { %3123 = vmatpush.bf16.msrb.mxu0 %v7681_v30  ;;  %v7649_v45 = vor.u32 %v9291_v34, %v7648_v33  ;;  %3149 = vmatpush.bf16.msrb.mxu2 %v6405_v32  ;;  %v7616_v48 = vld [vmem:[#allocation5 + $0xd48] sm:$0xf]  ;;  %v5986_v30 = vld [vmem:[#allocation5 + $0xa8] sm:$0xf0] }
 0x103   :  { %v9283_v49 = vld [vmem:[#allocation5 + $0xd64] sm:$0xf0]  ;;  %3118 = vmatmul.bf16.vlgmr.msra.gmra.mxu3 %v9901_v41  ;;  %v6242_v32 = vld [vmem:[#allocation5 + $0x2a8] sm:$0xf0]  ;;  %v5989_v38 = vor.u32 %v8871_v27, %v5986_v30 }
 0x104   :  { %3162 = vmatpush.bf16.msrb.mxu3 %v6661_v36  ;;  %v7617_v57 = vor.u32 %v9283_v49, %v7616_v48  ;;  %3137 = vmatpush.bf16.msrb.mxu1 %v6117_v46  ;;  %v7584_v60 = vld [vmem:[#allocation5 + $0xd08] sm:$0xf]  ;;  %v8999_v33 = vld [vmem:[#allocation5 + $0x48c] sm:$0xf]  ;;  %v2872_v36 = vpop.f32.mrf.mxu0  ;;  %v6245_v39 = vor.u32 %v8935_v31, %v6242_v32  ;;  %v2885_v46 = vpop.f32.mrf.mxu1 }
 0x105   :  { %v9275_v61 = vld [vmem:[#allocation5 + $0xd24] sm:$0xf0]  ;;  %v6498_v34 = vld [vmem:[#allocation5 + $0x4a8] sm:$0xf0] }
 0x106   :  { %3124 = vmatpush.bf16.msrb.mxu0 %v7649_v45  ;;  %3150 = vmatpush.bf16.msrb.mxu2 %v6373_v47  ;;  %v7585_v5 = vor.u32 %v9275_v61, %v7584_v60  ;;  %v7552_v6 = vld [vmem:[#allocation5 + $0xcc8] sm:$0xf]  ;;  %v2873_v45 = vadd.f32 %v2872_v36, %v582_v28  ;;  %v6501_v47 = vor.u32 %v8999_v33, %v6498_v34  ;;  %v5954_v48 = vld [vmem:[#allocation5 + $0x68] sm:$0xf0] }
 0x107   :  { %v9267_v9 = vld [vmem:[#allocation5 + $0xce4] sm:$0xf0]  ;;  %v8927_v49 = vld [vmem:[#allocation5 + $0x24c] sm:$0xf] }
 0x108   :  { %3163 = vmatpush.bf16.msrb.mxu3 %v6629_v51  ;;  %3138 = vmatpush.bf16.msrb.mxu1 %v6085_v58  ;;  %v7553_v21 = vor.u32 %v9267_v9, %v7552_v6  ;;  %v7520_v23 = vld [vmem:[#allocation5 + $0xc88] sm:$0xf]  ;;  %v8991_v51 = vld [vmem:[#allocation5 + $0x44c] sm:$0xf]  ;;  %v2886_v53 = vadd.f32 %v2885_v46, %v2873_v45  ;;  %v6213_v58 = vor.u32 %v8927_v49, %v6210_v50 }
 0x109   :  { %v9259_v26 = vld [vmem:[#allocation5 + $0xca4] sm:$0xf0]  ;;  %v5922_v60 = vld [vmem:[#allocation5 + $0x28] sm:$0xf0] }
 0x10a   :  { %3125 = vmatpush.bf16.msrb.mxu0 %v7617_v57  ;;  %3151 = vmatpush.bf16.msrb.mxu2 %v6341_v59  ;;  %v7521_v35 = vor.u32 %v9259_v26, %v7520_v23  ;;  %v7488_v42 = vld [vmem:[#allocation5 + $0xc48] sm:$0xf]  ;;  %v5957_v57 = vor.u32 %v8863_v44, %v5954_v48  ;;  %v8855_v59 = vld [vmem:[#allocation5 + $0xc] sm:$0xf]  ;;  %v2899_v3 = vadd.f32 %v2898_v62, %v2886_v53 }
 0x10b   :  { %v9251_v43 = vld [vmem:[#allocation5 + $0xc64] sm:$0xf0]  ;;  %v8919_v61 = vld [vmem:[#allocation5 + $0x20c] sm:$0xf]  ;;  %v5925_v14 = vor.u32 %v8855_v59, %v5922_v60 }
 0x10c   :  { %3164 = vmatpush.bf16.msrb.mxu3 %v6597_v63  ;;  %3139 = vmatpush.bf16.msrb.mxu1 %v6053_v7  ;;  %v7489_v54 = vor.u32 %v9251_v43, %v7488_v42  ;;  %v7456_v55 = vld [vmem:[#allocation5 + $0xc08] sm:$0xf]  ;;  %v6469_v63 = vor.u32 %v8991_v51, %v6466_v52  ;;  %v6434_v2 = vld [vmem:[#allocation5 + $0x428] sm:$0xf0]  ;;  %v2874_v13 = vpop.f32.mrf.mxu0  ;;  %v6181_v16 = vor.u32 %v8919_v61, %v6178_v0  ;;  %v2887_v23 = vpop.f32.mrf.mxu1 }
 0x10d   :  { %v9243_v56 = vld [vmem:[#allocation5 + $0xc24] sm:$0xf0]  ;;  %v6914_v6 = vld [vmem:[#allocation5 + $0x7e8] sm:$0xf0]  ;;  %v2913_v42 = vpop.f32.mrf.mxu3 }
 0x10e   :  { %3126 = vmatpush.bf16.msrb.mxu0 %v7585_v5  ;;  %3152 = vmatpush.bf16.msrb.mxu2 %v6309_v8  ;;  %v9103_v5 = vld [vmem:[#allocation5 + $0x7cc] sm:$0xf]  ;;  %v7457_v8 = vor.u32 %v9243_v56, %v7456_v55 }
 0x10f   :  { %v9167_v7 = vld [vmem:[#allocation5 + $0x9cc] sm:$0xf] }
 0x110   :  { %3165 = vmatpush.bf16.msrb.mxu3 %v6565_v12  ;;  %3140 = vmatpush.bf16.msrb.mxu1 %v6021_v24  ;;  %v7170_v9 = vld [vmem:[#allocation5 + $0x9e8] sm:$0xf0]  ;;  %v9922_v12 = vadd.f32 %v2911_v4, %v2899_v3  ;;  %v6437_v24 = vor.u32 %v8983_v1, %v6434_v2 }
 0x111   :  { %v9231_v10 = vld [vmem:[#allocation5 + $0xbcc] sm:$0xf]  ;;  %v7173_v26 = vor.u32 %v9167_v7, %v7170_v9 }
 0x112   :  { %3127 = vmatpush.bf16.msrb.mxu0 %v7553_v21  ;;  %3153 = vmatpush.bf16.msrb.mxu2 %v6277_v25  ;;  %v7426_v11 = vld [vmem:[#allocation5 + $0xbe8] sm:$0xf0]  ;;  %v6917_v25 = vor.u32 %v9103_v5, %v6914_v6 }
 0x113   :  { %v9295_v17 = vld [vmem:[#allocation5 + $0xdcc] sm:$0xf]  ;;  %v7429_v27 = vor.u32 %v9231_v10, %v7426_v11 }
 0x114   :  { %3166 = vmatpush.bf16.msrb.mxu3 %v6533_v29  ;;  %3141 = vmatpush.bf16.msrb.mxu1 %v5989_v38  ;;  %v7682_v21 = vld [vmem:[#allocation5 + $0xde8] sm:$0xf0]  ;;  %v2900_v38 = vpop.f32.mrf.mxu2  ;;  %v2924_v3 = vpop.f32.mrf.mxu0 }
 0x115   :  { %v9095_v28 = vld [vmem:[#allocation5 + $0x78c] sm:$0xf]  ;;  %v7685_v31 = vor.u32 %v9295_v17, %v7682_v21  ;;  %v2937_v4 = vpop.f32.mrf.mxu1  ;;  %v2925_v10 = vadd.f32 %v2924_v3, %v9922_v12  ;;  %v9931_v38 = vpop.f32.mrf.mxu3 }
 0x116   :  { %3128 = vmatpush.bf16.msrb.mxu0 %v7521_v35  ;;  %3154 = vmatpush.bf16.msrb.mxu2 %v6245_v39  ;;  %v6882_v29 = vld [vmem:[#allocation5 + $0x7a8] sm:$0xf0] }
 0x117   :  { %v9159_v30 = vld [vmem:[#allocation5 + $0x98c] sm:$0xf]  ;;  %v6885_v39 = vor.u32 %v9095_v28, %v6882_v29  ;;  %v2938_v23 = vadd.f32 %v2937_v4, %v2925_v10  ;;  %v6152_v4 = vld [vmem:[#allocation5 + $0x1d0] sm:$0xf] }
 0x118   :  { %3167 = vmatpush.bf16.msrb.mxu3 %v6501_v47  ;;  %3142 = vmatpush.bf16.msrb.mxu1 %v5957_v57  ;;  %v7138_v32 = vld [vmem:[#allocation5 + $0x9a8] sm:$0xf0]  ;;  %v6664_v10 = vld [vmem:[#allocation5 + $0x5d0] sm:$0xf] }
 0x119   :  { %v9223_v33 = vld [vmem:[#allocation5 + $0xb8c] sm:$0xf]  ;;  %v7141_v43 = vor.u32 %v9159_v30, %v7138_v32 }
 0x11a   :  { %3129 = vmatpush.bf16.msrb.mxu0 %v7489_v54  ;;  %3155 = vmatpush.bf16.msrb.mxu2 %v6213_v58  ;;  %v7394_v34 = vld [vmem:[#allocation5 + $0xba8] sm:$0xf0] }
 0x11b   :  { %v9287_v35 = vld [vmem:[#allocation5 + $0xd8c] sm:$0xf]  ;;  %v7397_v44 = vor.u32 %v9223_v33, %v7394_v34 }
 0x11c   :  { %3168 = vmatpush.bf16.msrb.mxu3 %v6469_v63  ;;  %3143 = vmatpush.bf16.msrb.mxu1 %v5925_v14  ;;  %v7650_v36 = vld [vmem:[#allocation5 + $0xda8] sm:$0xf0]  ;;  %v2950_v30 = vpop.f32.mrf.mxu2  ;;  %v2926_v42 = vpop.f32.mrf.mxu0 }
 0x11d   :  { %v9087_v45 = vld [vmem:[#allocation5 + $0x74c] sm:$0xf]  ;;  %v7653_v48 = vor.u32 %v9287_v35, %v7650_v36  ;;  %v9929_v34 = vadd.f32 %v2950_v30, %v2938_v23  ;;  %v8972_v30 = vld [vmem:[#allocation5 + $0x3ac] sm:$0xf0] }
 0x11e   :  { %3130 = vmatpush.bf16.msrb.mxu0 %v7457_v8  ;;  %3156 = vmatpush.bf16.msrb.mxu2 %v6181_v16  ;;  %v6850_v46 = vld [vmem:[#allocation5 + $0x768] sm:$0xf0] }
 0x11f   :  { %v9151_v47 = vld [vmem:[#allocation5 + $0x94c] sm:$0xf]  ;;  %v6853_v54 = vor.u32 %v9087_v45, %v6850_v46  ;;  %3144 = vmatmul.bf16.vlgmr.msrb.gmra.mxu1 %v9887_v19 }
 0x120   :  { %3169 = vmatpush.bf16.msrb.mxu3 %v6437_v24  ;;  %3188 = vmatpush.bf16.msra.mxu1 %v7173_v26  ;;  %v7106_v49 = vld [vmem:[#allocation5 + $0x968] sm:$0xf0] }
 0x121   :  { %3131 = vmatmul.bf16.vlgmr.msrb.gmra.mxu0 %v9897_v37  ;;  %v9215_v50 = vld [vmem:[#allocation5 + $0xb4c] sm:$0xf]  ;;  %3157 = vmatmul.bf16.vlgmr.msrb.gmra.mxu2 %v9891_v22  ;;  %v7109_v55 = vor.u32 %v9151_v47, %v7106_v49 }
 0x122   :  { %3175 = vmatpush.bf16.msra.mxu0 %v6917_v25  ;;  %3201 = vmatpush.bf16.msra.mxu2 %v7429_v27  ;;  %v7362_v51 = vld [vmem:[#allocation5 + $0xb68] sm:$0xf0] }
 0x123   :  { %v9279_v52 = vld [vmem:[#allocation5 + $0xd4c] sm:$0xf]  ;;  %3170 = vmatmul.bf16.vlgmr.msrb.gmra.mxu3 %v9885_v18  ;;  %v7365_v56 = vor.u32 %v9215_v50, %v7362_v51 }
 0x124   :  { %3214 = vmatpush.bf16.msra.mxu3 %v7685_v31  ;;  %v7618_v53 = vld [vmem:[#allocation5 + $0xd68] sm:$0xf0]  ;;  %3189 = vmatpush.bf16.msra.mxu1 %v7141_v43  ;;  %v2939_v43 = vpop.f32.mrf.mxu1 }
 0x125   :  { %v9079_v57 = vld [vmem:[#allocation5 + $0x70c] sm:$0xf]  ;;  %v7621_v60 = vor.u32 %v9279_v52, %v7618_v53  ;;  %v8900_v43 = vld [vmem:[#allocation5 + $0x16c] sm:$0xf0] }
 0x126   :  { %3176 = vmatpush.bf16.msra.mxu0 %v6885_v39  ;;  %3202 = vmatpush.bf16.msra.mxu2 %v7397_v44  ;;  %v6818_v58 = vld [vmem:[#allocation5 + $0x728] sm:$0xf0] }
 0x127   :  { %v9143_v59 = vld [vmem:[#allocation5 + $0x90c] sm:$0xf]  ;;  %v6821_v2 = vor.u32 %v9079_v57, %v6818_v58 }
 0x128   :  { %3215 = vmatpush.bf16.msra.mxu3 %v7653_v48  ;;  %v7074_v61 = vld [vmem:[#allocation5 + $0x928] sm:$0xf0]  ;;  %3190 = vmatpush.bf16.msra.mxu1 %v7109_v55 }
 0x129   :  { %v9207_v62 = vld [vmem:[#allocation5 + $0xb0c] sm:$0xf]  ;;  %v7077_v5 = vor.u32 %v9143_v59, %v7074_v61 }
 0x12a   :  { %v7330_v63 = vld [vmem:[#allocation5 + $0xb28] sm:$0xf0]  ;;  %3177 = vmatpush.bf16.msra.mxu0 %v6853_v54  ;;  %3203 = vmatpush.bf16.msra.mxu2 %v7365_v56 }
 0x12b   :  { %v9271_v0 = vld [vmem:[#allocation5 + $0xd0c] sm:$0xf]  ;;  %v7333_v6 = vor.u32 %v9207_v62, %v7330_v63  ;;  %v2952_v63 = vpop.f32.mrf.mxu2 }
 0x12c   :  { %v7586_v1 = vld [vmem:[#allocation5 + $0xd28] sm:$0xf0]  ;;  %3216 = vmatpush.bf16.msra.mxu3 %v7621_v60  ;;  %3191 = vmatpush.bf16.msra.mxu1 %v7077_v5  ;;  %v8916_v5 = vld [vmem:[#allocation5 + $0x1ec] sm:$0xf0] }
 0x12d   :  { %v9071_v7 = vld [vmem:[#allocation5 + $0x6cc] sm:$0xf]  ;;  %v7589_v11 = vor.u32 %v9271_v0, %v7586_v1  ;;  %v6153_v23 = vor.u32 %v8916_v5, %v6152_v4  ;;  %v6824_v63 = vld [vmem:[#allocation5 + $0x710] sm:$0xf] }
 0x12e   :  { %v6786_v8 = vld [vmem:[#allocation5 + $0x6e8] sm:$0xf0]  ;;  %3178 = vmatpush.bf16.msra.mxu0 %v6821_v2  ;;  %3204 = vmatpush.bf16.msra.mxu2 %v7333_v6  ;;  %v6408_v6 = vld [vmem:[#allocation5 + $0x3d0] sm:$0xf] }
 0x12f   :  { %v9135_v9 = vld [vmem:[#allocation5 + $0x8cc] sm:$0xf]  ;;  %v6789_v24 = vor.u32 %v9071_v7, %v6786_v8  ;;  %v2965_v7 = vpop.f32.mrf.mxu3  ;;  %v6024_v5 = vld [vmem:[#allocation5 + $0xd0] sm:$0xf] }
 0x130   :  { %v7042_v13 = vld [vmem:[#allocation5 + $0x8e8] sm:$0xf0]  ;;  %3217 = vmatpush.bf16.msra.mxu3 %v7589_v11  ;;  %v9044_v11 = vld [vmem:[#allocation5 + $0x5ec] sm:$0xf0] }
 0x131   :  { %v9199_v14 = vld [vmem:[#allocation5 + $0xacc] sm:$0xf]  ;;  %v7045_v25 = vor.u32 %v9135_v9, %v7042_v13  ;;  %v8980_v9 = vld [vmem:[#allocation5 + $0x3ec] sm:$0xf0] }
 0x132   :  { %v7298_v16 = vld [vmem:[#allocation5 + $0xae8] sm:$0xf0]  ;;  %3179 = vmatpush.bf16.msra.mxu0 %v6789_v24  ;;  %v6409_v24 = vor.u32 %v8980_v9, %v6408_v6  ;;  %v8884_v6 = vld [vmem:[#allocation5 + $0xec] sm:$0xf0] }
 0x133   :  { %v9263_v17 = vld [vmem:[#allocation5 + $0xccc] sm:$0xf]  ;;  %v7301_v26 = vor.u32 %v9199_v14, %v7298_v16  ;;  %3192 = vmatpush.bf16.msra.mxu1 %v7045_v25  ;;  %v6920_v16 = vld [vmem:[#allocation5 + $0x7d0] sm:$0xf]  ;;  %v6665_v25 = vor.u32 %v9044_v11, %v6664_v10 }
 0x134   :  { %v7554_v21 = vld [vmem:[#allocation5 + $0xce8] sm:$0xf0]  ;;  %v8948_v10 = vld [vmem:[#allocation5 + $0x2ec] sm:$0xf0] }
 0x135   :  { %v9063_v27 = vld [vmem:[#allocation5 + $0x68c] sm:$0xf]  ;;  %v7557_v12 = vor.u32 %v9263_v17, %v7554_v21  ;;  %3205 = vmatpush.bf16.msra.mxu2 %v7301_v26  ;;  %v9108_v17 = vld [vmem:[#allocation5 + $0x7ec] sm:$0xf0] }
 0x136   :  { %v6754_v28 = vld [vmem:[#allocation5 + $0x6a8] sm:$0xf0]  ;;  %v6120_v26 = vld [vmem:[#allocation5 + $0x190] sm:$0xf] }
 0x137   :  { %v9127_v29 = vld [vmem:[#allocation5 + $0x88c] sm:$0xf]  ;;  %v6757_v39 = vor.u32 %v9063_v27, %v6754_v28  ;;  %3218 = vmatpush.bf16.msra.mxu3 %v7557_v12  ;;  %v8908_v27 = vld [vmem:[#allocation5 + $0x1ac] sm:$0xf0] }
 0x138   :  { %v7010_v31 = vld [vmem:[#allocation5 + $0x8a8] sm:$0xf0]  ;;  %v6376_v28 = vld [vmem:[#allocation5 + $0x390] sm:$0xf] }
 0x139   :  { %v9191_v32 = vld [vmem:[#allocation5 + $0xa8c] sm:$0xf]  ;;  %v7013_v44 = vor.u32 %v9127_v29, %v7010_v31  ;;  %3180 = vmatpush.bf16.msra.mxu0 %v6757_v39  ;;  %v6921_v29 = vor.u32 %v9108_v17, %v6920_v16  ;;  %v6632_v12 = vld [vmem:[#allocation5 + $0x590] sm:$0xf]  ;;  %v6377_v39 = vor.u32 %v8972_v30, %v6376_v28  ;;  %v3002_v28 = vpop.f32.mrf.mxu2 }
 0x13a   :  { %v7266_v33 = vld [vmem:[#allocation5 + $0xaa8] sm:$0xf0]  ;;  %v9036_v31 = vld [vmem:[#allocation5 + $0x5ac] sm:$0xf0] }
 0x13b   :  { %v9255_v35 = vld [vmem:[#allocation5 + $0xc8c] sm:$0xf]  ;;  %v7269_v45 = vor.u32 %v9191_v32, %v7266_v33  ;;  %3193 = vmatpush.bf16.msra.mxu1 %v7013_v44  ;;  %v6888_v32 = vld [vmem:[#allocation5 + $0x790] sm:$0xf]  ;;  %v6633_v42 = vor.u32 %v9036_v31, %v6632_v12 }
 0x13c   :  { %v7522_v36 = vld [vmem:[#allocation5 + $0xca8] sm:$0xf0]  ;;  %v9100_v33 = vld [vmem:[#allocation5 + $0x7ac] sm:$0xf0] }
 0x13d   :  { %v9055_v46 = vld [vmem:[#allocation5 + $0x64c] sm:$0xf]  ;;  %v7525_v49 = vor.u32 %v9255_v35, %v7522_v36  ;;  %3206 = vmatpush.bf16.msra.mxu2 %v7269_v45  ;;  %v6121_v35 = vor.u32 %v8908_v27, %v6120_v26  ;;  %v6088_v36 = vld [vmem:[#allocation5 + $0x150] sm:$0xf]  ;;  %v583_v45 = vperm.slane %v9919_v15, 1 }
 0x13e   :  { %v6722_v47 = vld [vmem:[#allocation5 + $0x668] sm:$0xf0]  ;;  %v6344_v44 = vld [vmem:[#allocation5 + $0x350] sm:$0xf] }
 0x13f   :  { %v9119_v48 = vld [vmem:[#allocation5 + $0x84c] sm:$0xf]  ;;  %v6725_v55 = vor.u32 %v9055_v46, %v6722_v47  ;;  %3219 = vmatpush.bf16.msra.mxu3 %v7525_v49  ;;  %v6889_v46 = vor.u32 %v9100_v33, %v6888_v32  ;;  %v8964_v47 = vld [vmem:[#allocation5 + $0x36c] sm:$0xf0]  ;;  %v3015_v33 = vpop.f32.mrf.mxu3 }
 0x140   :  { %v6978_v50 = vld [vmem:[#allocation5 + $0x868] sm:$0xf0]  ;;  %v9028_v49 = vld [vmem:[#allocation5 + $0x56c] sm:$0xf0] }
 0x141   :  { %v9183_v51 = vld [vmem:[#allocation5 + $0xa4c] sm:$0xf]  ;;  %v6981_v58 = vor.u32 %v9119_v48, %v6978_v50  ;;  %3181 = vmatpush.bf16.msra.mxu0 %v6725_v55  ;;  %v6600_v48 = vld [vmem:[#allocation5 + $0x550] sm:$0xf]  ;;  %v2964_v55 = vadd.f32 %v9931_v38, %v583_v45 }
 0x142   :  { %v7234_v52 = vld [vmem:[#allocation5 + $0xa68] sm:$0xf0]  ;;  %v6856_v50 = vld [vmem:[#allocation5 + $0x750] sm:$0xf] }
 0x143   :  { %v9247_v53 = vld [vmem:[#allocation5 + $0xc4c] sm:$0xf]  ;;  %v7237_v59 = vor.u32 %v9183_v51, %v7234_v52  ;;  %3194 = vmatpush.bf16.msra.mxu1 %v6981_v58  ;;  %v9092_v51 = vld [vmem:[#allocation5 + $0x76c] sm:$0xf0]  ;;  %v6089_v52 = vor.u32 %v8900_v43, %v6088_v36 }
 0x144   :  { %v7490_v54 = vld [vmem:[#allocation5 + $0xc68] sm:$0xf0]  ;;  %v6312_v58 = vld [vmem:[#allocation5 + $0x310] sm:$0xf] }
 0x145   :  { %v9047_v56 = vld [vmem:[#allocation5 + $0x60c] sm:$0xf]  ;;  %v7493_v0 = vor.u32 %v9247_v53, %v7490_v54  ;;  %3207 = vmatpush.bf16.msra.mxu2 %v7237_v59  ;;  %v6345_v53 = vor.u32 %v8964_v47, %v6344_v44  ;;  %v6601_v54 = vor.u32 %v9028_v49, %v6600_v48  ;;  %v6857_v59 = vor.u32 %v9092_v51, %v6856_v50  ;;  %v6280_v38 = vld [vmem:[#allocation5 + $0x2d0] sm:$0xf] }
 0x146   :  { %v6690_v57 = vld [vmem:[#allocation5 + $0x628] sm:$0xf0]  ;;  %v6536_v11 = vld [vmem:[#allocation5 + $0x4d0] sm:$0xf] }
 0x147   :  { %v9111_v60 = vld [vmem:[#allocation5 + $0x80c] sm:$0xf]  ;;  %v6693_v8 = vor.u32 %v9047_v56, %v6690_v57  ;;  %3220 = vmatpush.bf16.msra.mxu3 %v7493_v0  ;;  %v6056_v56 = vld [vmem:[#allocation5 + $0x110] sm:$0xf] }
 0x148   :  { %v6946_v61 = vld [vmem:[#allocation5 + $0x828] sm:$0xf0]  ;;  %v8892_v57 = vld [vmem:[#allocation5 + $0x12c] sm:$0xf0] }
 0x149   :  { %v9175_v62 = vld [vmem:[#allocation5 + $0xa0c] sm:$0xf]  ;;  %v6949_v13 = vor.u32 %v9111_v60, %v6946_v61  ;;  %3182 = vmatpush.bf16.msra.mxu0 %v6693_v8  ;;  %v8956_v60 = vld [vmem:[#allocation5 + $0x32c] sm:$0xf0]  ;;  %v2989_v8 = vpop.f32.mrf.mxu1 }
 0x14a   :  { %v7202_v1 = vld [vmem:[#allocation5 + $0xa28] sm:$0xf0]  ;;  %v6568_v61 = vld [vmem:[#allocation5 + $0x510] sm:$0xf] }
 0x14b   :  { %v9239_v2 = vld [vmem:[#allocation5 + $0xc0c] sm:$0xf]  ;;  %v7205_v14 = vor.u32 %v9175_v62, %v7202_v1  ;;  %3195 = vmatpush.bf16.msra.mxu1 %v6949_v13  ;;  %v9020_v62 = vld [vmem:[#allocation5 + $0x52c] sm:$0xf0]  ;;  %v6057_v1 = vor.u32 %v8892_v57, %v6056_v56 }
 0x14c   :  { %v7458_v3 = vld [vmem:[#allocation5 + $0xc28] sm:$0xf0]  ;;  %3183 = vmatmul.bf16.vlgmr.msra.gmra.mxu0 %v9889_v20  ;;  %v9084_v0 = vld [vmem:[#allocation5 + $0x72c] sm:$0xf0]  ;;  %v6569_v4 = vor.u32 %v9020_v62, %v6568_v61 }
 0x14d   :  { %v7461_v21 = vor.u32 %v9239_v2, %v7458_v3  ;;  %3208 = vmatpush.bf16.msra.mxu2 %v7205_v14  ;;  %3227 = vmatpush.bf16.msrb.mxu0 %v6153_v23  ;;  %v2976_v2 = vpop.f32.mrf.mxu0  ;;  %v6313_v3 = vor.u32 %v8956_v60, %v6312_v58  ;;  %v6825_v9 = vor.u32 %v9084_v0, %v6824_v63  ;;  %v9012_v13 = vld [vmem:[#allocation5 + $0x4ec] sm:$0xf0]  ;;  %v3004_v0 = vpop.f32.mrf.mxu2 }
 0x14e   :  { %3196 = vmatmul.bf16.vlgmr.msra.gmra.mxu1 %v9899_v40  ;;  %v2977_v7 = vadd.f32 %v2976_v2, %v2964_v55  ;;  %v6792_v14 = vld [vmem:[#allocation5 + $0x6d0] sm:$0xf]  ;;  %v6281_v23 = vor.u32 %v8948_v10, %v6280_v38  ;;  %v6058_v0 = vld [vmem:[#allocation5 + $0x130] sm:$0xf0] }
 0x14f   :  { %3221 = vmatpush.bf16.msra.mxu3 %v7461_v21  ;;  %3240 = vmatpush.bf16.msrb.mxu1 %v6409_v24  ;;  %v9076_v16 = vld [vmem:[#allocation5 + $0x6ec] sm:$0xf0]  ;;  %v6025_v21 = vor.u32 %v8884_v6, %v6024_v5  ;;  %v6537_v24 = vor.u32 %v9012_v13, %v6536_v11  ;;  %v3017_v5 = vpop.f32.mrf.mxu3 }
 0x150   :  { %3209 = vmatmul.bf16.vlgmr.msra.gmra.mxu2 %v9901_v41  ;;  %v2990_v17 = vadd.f32 %v2989_v8, %v2977_v7  ;;  %v8876_v26 = vld [vmem:[#allocation5 + $0xac] sm:$0xf0] }
 0x151   :  { %3253 = vmatpush.bf16.msrb.mxu2 %v6665_v25  ;;  %3228 = vmatpush.bf16.msrb.mxu0 %v6121_v35  ;;  %v5992_v25 = vld [vmem:[#allocation5 + $0x90] sm:$0xf]  ;;  %v2991_v49 = vpop.f32.mrf.mxu1 }
 0x152   :  { %3222 = vmatmul.bf16.vlgmr.msra.gmra.mxu3 %v9897_v37  ;;  %v6248_v27 = vld [vmem:[#allocation5 + $0x290] sm:$0xf]  ;;  %v3003_v32 = vadd.f32 %v3002_v28, %v2990_v17  ;;  %v6154_v17 = vld [vmem:[#allocation5 + $0x1f0] sm:$0xf0] }
 0x153   :  { %3266 = vmatpush.bf16.msrb.mxu3 %v6921_v29  ;;  %3241 = vmatpush.bf16.msrb.mxu1 %v6377_v39  ;;  %v6793_v29 = vor.u32 %v9076_v16, %v6792_v14  ;;  %v8940_v30 = vld [vmem:[#allocation5 + $0x2ac] sm:$0xf0]  ;;  %v5993_v39 = vor.u32 %v8876_v26, %v5992_v25  ;;  %v8912_v16 = vld [vmem:[#allocation5 + $0x1d4] sm:$0xf] }
 0x154   :  { %v6504_v12 = vld [vmem:[#allocation5 + $0x490] sm:$0xf]  ;;  %v6249_v44 = vor.u32 %v8940_v30, %v6248_v27 }
 0x155   :  { %3254 = vmatpush.bf16.msrb.mxu2 %v6633_v42  ;;  %3229 = vmatpush.bf16.msrb.mxu0 %v6089_v52  ;;  %v9004_v31 = vld [vmem:[#allocation5 + $0x4ac] sm:$0xf0]  ;;  %v9939_v42 = vadd.f32 %v3015_v33, %v3003_v32  ;;  %v2978_v43 = vpop.f32.mrf.mxu0  ;;  %v8904_v32 = vld [vmem:[#allocation5 + $0x194] sm:$0xf] }
 0x156   :  { %v6760_v35 = vld [vmem:[#allocation5 + $0x690] sm:$0xf]  ;;  %v6505_v45 = vor.u32 %v9004_v31, %v6504_v12  ;;  %v6122_v33 = vld [vmem:[#allocation5 + $0x1b0] sm:$0xf0] }
 0x157   :  { %3267 = vmatpush.bf16.msrb.mxu3 %v6889_v46  ;;  %3242 = vmatpush.bf16.msrb.mxu1 %v6345_v53  ;;  %v9068_v36 = vld [vmem:[#allocation5 + $0x6ac] sm:$0xf0] }
 0x158   :  { %v5960_v46 = vld [vmem:[#allocation5 + $0x50] sm:$0xf]  ;;  %v6761_v50 = vor.u32 %v9068_v36, %v6760_v35 }
 0x159   :  { %3255 = vmatpush.bf16.msrb.mxu2 %v6601_v54  ;;  %3230 = vmatpush.bf16.msrb.mxu0 %v6057_v1  ;;  %v8868_v47 = vld [vmem:[#allocation5 + $0x6c] sm:$0xf0] }
 0x15a   :  { %v6216_v48 = vld [vmem:[#allocation5 + $0x250] sm:$0xf]  ;;  %v5961_v56 = vor.u32 %v8868_v47, %v5960_v46  ;;  %v6125_v46 = vor.u32 %v8904_v32, %v6122_v33  ;;  %v5994_v32 = vld [vmem:[#allocation5 + $0xb0] sm:$0xf0] }
 0x15b   :  { %3268 = vmatpush.bf16.msrb.mxu3 %v6857_v59  ;;  %3243 = vmatpush.bf16.msrb.mxu1 %v6313_v3  ;;  %v8932_v51 = vld [vmem:[#allocation5 + $0x26c] sm:$0xf0] }
 0x15c   :  { %v6472_v52 = vld [vmem:[#allocation5 + $0x450] sm:$0xf]  ;;  %v6217_v59 = vor.u32 %v8932_v51, %v6216_v48  ;;  %v6090_v51 = vld [vmem:[#allocation5 + $0x170] sm:$0xf0] }
 0x15d   :  { %3256 = vmatpush.bf16.msrb.mxu2 %v6569_v4  ;;  %3231 = vmatpush.bf16.msrb.mxu0 %v6025_v21  ;;  %v8996_v53 = vld [vmem:[#allocation5 + $0x46c] sm:$0xf0] }
 0x15e   :  { %v6728_v54 = vld [vmem:[#allocation5 + $0x650] sm:$0xf]  ;;  %v6473_v60 = vor.u32 %v8996_v53, %v6472_v52 }
 0x15f   :  { %3269 = vmatpush.bf16.msrb.mxu3 %v6825_v9  ;;  %3244 = vmatpush.bf16.msrb.mxu1 %v6281_v23  ;;  %v9060_v55 = vld [vmem:[#allocation5 + $0x66c] sm:$0xf0] }
 0x160   :  { %v5928_v57 = vld [vmem:[#allocation5 + $0x10] sm:$0xf]  ;;  %v6729_v1 = vor.u32 %v9060_v55, %v6728_v54 }
 0x161   :  { %3257 = vmatpush.bf16.msrb.mxu2 %v6537_v24  ;;  %3232 = vmatpush.bf16.msrb.mxu0 %v5993_v39  ;;  %v8860_v58 = vld [vmem:[#allocation5 + $0x2c] sm:$0xf0] }
 0x162   :  { %v6184_v61 = vld [vmem:[#allocation5 + $0x210] sm:$0xf]  ;;  %v5929_v8 = vor.u32 %v8860_v58, %v5928_v57 }
 0x163   :  { %3270 = vmatpush.bf16.msrb.mxu3 %v6793_v29  ;;  %3245 = vmatpush.bf16.msrb.mxu1 %v6249_v44  ;;  %v8924_v62 = vld [vmem:[#allocation5 + $0x22c] sm:$0xf0]  ;;  %v6157_v29 = vor.u32 %v8912_v16, %v6154_v17  ;;  %v6026_v16 = vld [vmem:[#allocation5 + $0xf0] sm:$0xf0] }
 0x164   :  { %v6440_v63 = vld [vmem:[#allocation5 + $0x410] sm:$0xf]  ;;  %v6185_v13 = vor.u32 %v8924_v62, %v6184_v61  ;;  %v3028_v62 = vpop.f32.mrf.mxu0 }
 0x165   :  { %3258 = vmatpush.bf16.msrb.mxu2 %v6505_v45  ;;  %v8988_v2 = vld [vmem:[#allocation5 + $0x42c] sm:$0xf0]  ;;  %3233 = vmatpush.bf16.msrb.mxu0 %v5961_v56 }
 0x166   :  { %v6696_v3 = vld [vmem:[#allocation5 + $0x610] sm:$0xf]  ;;  %v6441_v14 = vor.u32 %v8988_v2, %v6440_v63  ;;  %v8888_v63 = vld [vmem:[#allocation5 + $0x114] sm:$0xf] }
 0x167   :  { %3271 = vmatpush.bf16.msrb.mxu3 %v6761_v50  ;;  %v9052_v4 = vld [vmem:[#allocation5 + $0x62c] sm:$0xf0]  ;;  %3246 = vmatpush.bf16.msrb.mxu1 %v6217_v59  ;;  %v8896_v50 = vld [vmem:[#allocation5 + $0x154] sm:$0xf] }
 0x168   :  { %v7176_v6 = vld [vmem:[#allocation5 + $0x9d0] sm:$0xf]  ;;  %v6697_v21 = vor.u32 %v9052_v4, %v6696_v3  ;;  %v6093_v58 = vor.u32 %v8896_v50, %v6090_v51  ;;  %v3041_v3 = vpop.f32.mrf.mxu1 }
 0x169   :  { %v9172_v38 = vld [vmem:[#allocation5 + $0x9ec] sm:$0xf0]  ;;  %3259 = vmatpush.bf16.msrb.mxu2 %v6473_v60  ;;  %3234 = vmatpush.bf16.msrb.mxu0 %v5929_v8  ;;  %v6061_v8 = vor.u32 %v8888_v63, %v6058_v0 }
 0x16a   :  { %v7432_v7 = vld [vmem:[#allocation5 + $0xbd0] sm:$0xf]  ;;  %v7177_v23 = vor.u32 %v9172_v38, %v7176_v6 }
 0x16b   :  { %v9236_v9 = vld [vmem:[#allocation5 + $0xbec] sm:$0xf0]  ;;  %3272 = vmatpush.bf16.msrb.mxu3 %v6729_v1  ;;  %3247 = vmatpush.bf16.msrb.mxu1 %v6185_v13  ;;  %v3029_v1 = vadd.f32 %v3028_v62, %v9939_v42  ;;  %v584_v42 = vperm.slane %v9919_v15, 2 }
 0x16c   :  { %v7688_v10 = vld [vmem:[#allocation5 + $0xdd0] sm:$0xf]  ;;  %v7433_v24 = vor.u32 %v9236_v9, %v7432_v7  ;;  %3235 = vmatmul.bf16.vlgmr.msrb.gmra.mxu0 %v9887_v19  ;;  %v3030_v15 = vpop.f32.mrf.mxu0 }
 0x16d   :  { %v9300_v11 = vld [vmem:[#allocation5 + $0xdec] sm:$0xf0]  ;;  %3260 = vmatpush.bf16.msrb.mxu2 %v6441_v14  ;;  %3279 = vmatpush.bf16.msra.mxu0 %v7177_v23  ;;  %v9946_v9 = vadd.f32 %v3041_v3, %v3029_v1  ;;  %v8880_v14 = vld [vmem:[#allocation5 + $0xd4] sm:$0xf] }
 0x16e   :  { %v7689_v25 = vor.u32 %v9300_v11, %v7688_v10  ;;  %v7144_v26 = vld [vmem:[#allocation5 + $0x990] sm:$0xf]  ;;  %3248 = vmatmul.bf16.vlgmr.msrb.gmra.mxu1 %v9891_v22  ;;  %v8856_v1 = vld [vmem:[#allocation5 + $0x14] sm:$0xf] }
 0x16f   :  { %v9164_v27 = vld [vmem:[#allocation5 + $0x9ac] sm:$0xf0]  ;;  %3273 = vmatpush.bf16.msrb.mxu3 %v6697_v21  ;;  %3292 = vmatpush.bf16.msra.mxu1 %v7433_v24 }
 0x170   :  { %v7400_v28 = vld [vmem:[#allocation5 + $0xb90] sm:$0xf]  ;;  %v7145_v35 = vor.u32 %v9164_v27, %v7144_v26  ;;  %3261 = vmatmul.bf16.vlgmr.msrb.gmra.mxu2 %v9885_v18  ;;  %v6029_v27 = vor.u32 %v8880_v14, %v6026_v16  ;;  %v9168_v16 = vld [vmem:[#allocation5 + $0x9d4] sm:$0xf] }
 0x171   :  { %v9228_v30 = vld [vmem:[#allocation5 + $0xbac] sm:$0xf0]  ;;  %3305 = vmatpush.bf16.msra.mxu2 %v7689_v25 }
 0x172   :  { %v7656_v12 = vld [vmem:[#allocation5 + $0xd90] sm:$0xf]  ;;  %v7401_v36 = vor.u32 %v9228_v30, %v7400_v28  ;;  %3274 = vmatmul.bf16.vlgmr.msrb.gmra.mxu3 %v9889_v20  ;;  %3280 = vmatpush.bf16.msra.mxu0 %v7145_v35  ;;  %v3067_v35 = vpop.f32.mrf.mxu3 }
 0x173   :  { %v9292_v31 = vld [vmem:[#allocation5 + $0xdac] sm:$0xf0]  ;;  %3318 = vmatpush.bf16.msra.mxu3 %v6157_v29 }
 0x174   :  { %v7657_v39 = vor.u32 %v9292_v31, %v7656_v12  ;;  %v7112_v43 = vld [vmem:[#allocation5 + $0x950] sm:$0xf]  ;;  %3293 = vmatpush.bf16.msra.mxu1 %v7401_v36  ;;  %v3054_v12 = vpop.f32.mrf.mxu2  ;;  %v8872_v31 = vld [vmem:[#allocation5 + $0x94] sm:$0xf] }
 0x175   :  { %v9156_v44 = vld [vmem:[#allocation5 + $0x96c] sm:$0xf0]  ;;  %v3055_v33 = vadd.f32 %v3054_v12, %v584_v42  ;;  %v7178_v42 = vld [vmem:[#allocation5 + $0x9f0] sm:$0xf0] }
 0x176   :  { %v7368_v45 = vld [vmem:[#allocation5 + $0xb50] sm:$0xf]  ;;  %v7113_v52 = vor.u32 %v9156_v44, %v7112_v43  ;;  %3306 = vmatpush.bf16.msra.mxu2 %v7657_v39  ;;  %v3043_v39 = vpop.f32.mrf.mxu1  ;;  %v6890_v12 = vld [vmem:[#allocation5 + $0x7b0] sm:$0xf0] }
 0x177   :  { %v9220_v47 = vld [vmem:[#allocation5 + $0xb6c] sm:$0xf0]  ;;  %3319 = vmatpush.bf16.msra.mxu3 %v6125_v46  ;;  %v6346_v39 = vld [vmem:[#allocation5 + $0x370] sm:$0xf0] }
 0x178   :  { %v7624_v48 = vld [vmem:[#allocation5 + $0xd50] sm:$0xf]  ;;  %v7369_v53 = vor.u32 %v9220_v47, %v7368_v45  ;;  %3281 = vmatpush.bf16.msra.mxu0 %v7113_v52 }
 0x179   :  { %v9284_v49 = vld [vmem:[#allocation5 + $0xd6c] sm:$0xf0] }
 0x17a   :  { %v7625_v54 = vor.u32 %v9284_v49, %v7624_v48  ;;  %v7080_v55 = vld [vmem:[#allocation5 + $0x910] sm:$0xf]  ;;  %3294 = vmatpush.bf16.msra.mxu1 %v7369_v53  ;;  %v9949_v48 = vadd.f32 %v3067_v35, %v3055_v33  ;;  %v5997_v49 = vor.u32 %v8872_v31, %v5994_v32  ;;  %v8864_v53 = vld [vmem:[#allocation5 + $0x54] sm:$0xf] }
 0x17b   :  { %v9148_v56 = vld [vmem:[#allocation5 + $0x92c] sm:$0xf0]  ;;  %3320 = vmatpush.bf16.msra.mxu3 %v6093_v58  ;;  %v9160_v31 = vld [vmem:[#allocation5 + $0x994] sm:$0xf] }
 0x17c   :  { %v7336_v57 = vld [vmem:[#allocation5 + $0xb10] sm:$0xf]  ;;  %v7081_v2 = vor.u32 %v9148_v56, %v7080_v55  ;;  %3307 = vmatpush.bf16.msra.mxu2 %v7625_v54  ;;  %v5962_v54 = vld [vmem:[#allocation5 + $0x70] sm:$0xf0]  ;;  %v3056_v3 = vpop.f32.mrf.mxu2 }
 0x17d   :  { %v9212_v59 = vld [vmem:[#allocation5 + $0xb2c] sm:$0xf0]  ;;  %v5965_v63 = vor.u32 %v8864_v53, %v5962_v54  ;;  %v7146_v32 = vld [vmem:[#allocation5 + $0x9b0] sm:$0xf0] }
 0x17e   :  { %v7592_v60 = vld [vmem:[#allocation5 + $0xd10] sm:$0xf]  ;;  %v7337_v4 = vor.u32 %v9212_v59, %v7336_v57  ;;  %3282 = vmatpush.bf16.msra.mxu0 %v7081_v2  ;;  %v5930_v2 = vld [vmem:[#allocation5 + $0x30] sm:$0xf0] }
 0x17f   :  { %v9276_v61 = vld [vmem:[#allocation5 + $0xd2c] sm:$0xf0]  ;;  %3321 = vmatpush.bf16.msra.mxu3 %v6061_v8  ;;  %v6666_v8 = vld [vmem:[#allocation5 + $0x5f0] sm:$0xf0] }
 0x180   :  { %v7593_v5 = vor.u32 %v9276_v61, %v7592_v60  ;;  %v7048_v6 = vld [vmem:[#allocation5 + $0x8d0] sm:$0xf]  ;;  %3295 = vmatpush.bf16.msra.mxu1 %v7337_v4  ;;  %v8976_v4 = vld [vmem:[#allocation5 + $0x3d4] sm:$0xf] }
 0x181   :  { %v9140_v38 = vld [vmem:[#allocation5 + $0x8ec] sm:$0xf0]  ;;  %v8952_v54 = vld [vmem:[#allocation5 + $0x314] sm:$0xf] }
 0x182   :  { %v7304_v7 = vld [vmem:[#allocation5 + $0xad0] sm:$0xf]  ;;  %v7049_v17 = vor.u32 %v9140_v38, %v7048_v6  ;;  %3308 = vmatpush.bf16.msra.mxu2 %v7593_v5  ;;  %v6410_v5 = vld [vmem:[#allocation5 + $0x3f0] sm:$0xf0]  ;;  %v3069_v38 = vpop.f32.mrf.mxu3 }
 0x183   :  { %v9204_v10 = vld [vmem:[#allocation5 + $0xaec] sm:$0xf0]  ;;  %3322 = vmatpush.bf16.msra.mxu3 %v6029_v27  ;;  %v9040_v6 = vld [vmem:[#allocation5 + $0x5d4] sm:$0xf]  ;;  %v3093_v38 = vpop.f32.mrf.mxu1 }
 0x184   :  { %v7560_v11 = vld [vmem:[#allocation5 + $0xcd0] sm:$0xf]  ;;  %v7305_v21 = vor.u32 %v9204_v10, %v7304_v7  ;;  %3283 = vmatpush.bf16.msra.mxu0 %v7049_v17  ;;  %v9104_v10 = vld [vmem:[#allocation5 + $0x7d4] sm:$0xf]  ;;  %v5933_v17 = vor.u32 %v8856_v1, %v5930_v2 }
 0x185   :  { %v9268_v13 = vld [vmem:[#allocation5 + $0xcec] sm:$0xf0]  ;;  %v9032_v27 = vld [vmem:[#allocation5 + $0x594] sm:$0xf] }
 0x186   :  { %v7561_v23 = vor.u32 %v9268_v13, %v7560_v11  ;;  %v7016_v24 = vld [vmem:[#allocation5 + $0x890] sm:$0xf]  ;;  %3296 = vmatpush.bf16.msra.mxu1 %v7305_v21  ;;  %v6922_v11 = vld [vmem:[#allocation5 + $0x7f0] sm:$0xf0]  ;;  %v6413_v21 = vor.u32 %v8976_v4, %v6410_v5 }
 0x187   :  { %v9132_v25 = vld [vmem:[#allocation5 + $0x8ac] sm:$0xf0]  ;;  %3323 = vmatpush.bf16.msra.mxu3 %v5997_v49  ;;  %v9152_v49 = vld [vmem:[#allocation5 + $0x954] sm:$0xf] }
 0x188   :  { %v7272_v26 = vld [vmem:[#allocation5 + $0xa90] sm:$0xf]  ;;  %v7017_v36 = vor.u32 %v9132_v25, %v7016_v24  ;;  %3309 = vmatpush.bf16.msra.mxu2 %v7561_v23  ;;  %v6669_v23 = vor.u32 %v9040_v6, %v6666_v8  ;;  %v6925_v24 = vor.u32 %v9104_v10, %v6922_v11  ;;  %v8968_v25 = vld [vmem:[#allocation5 + $0x394] sm:$0xf] }
 0x189   :  { %v9196_v28 = vld [vmem:[#allocation5 + $0xaac] sm:$0xf0]  ;;  %v8944_v3 = vld [vmem:[#allocation5 + $0x2d4] sm:$0xf] }
 0x18a   :  { %v7528_v29 = vld [vmem:[#allocation5 + $0xc90] sm:$0xf]  ;;  %v7273_v43 = vor.u32 %v9196_v28, %v7272_v26  ;;  %3284 = vmatpush.bf16.msra.mxu0 %v7017_v36  ;;  %v6378_v26 = vld [vmem:[#allocation5 + $0x3b0] sm:$0xf0]  ;;  %v7181_v28 = vor.u32 %v9168_v16, %v7178_v42 }
 0x18b   :  { %v9260_v30 = vld [vmem:[#allocation5 + $0xcac] sm:$0xf0]  ;;  %3324 = vmatpush.bf16.msra.mxu3 %v5965_v63  ;;  %v6381_v33 = vor.u32 %v8968_v25, %v6378_v26  ;;  %v8960_v36 = vld [vmem:[#allocation5 + $0x354] sm:$0xf]  ;;  %v3106_v26 = vpop.f32.mrf.mxu2 }
 0x18c   :  { %v7529_v44 = vor.u32 %v9260_v30, %v7528_v29  ;;  %v6984_v45 = vld [vmem:[#allocation5 + $0x850] sm:$0xf]  ;;  %3297 = vmatpush.bf16.msra.mxu1 %v7273_v43  ;;  %v6634_v29 = vld [vmem:[#allocation5 + $0x5b0] sm:$0xf0] }
 0x18d   :  { %v9124_v46 = vld [vmem:[#allocation5 + $0x86c] sm:$0xf0]  ;;  %v9096_v30 = vld [vmem:[#allocation5 + $0x794] sm:$0xf]  ;;  %v6637_v35 = vor.u32 %v9032_v27, %v6634_v29 }
 0x18e   :  { %v7240_v47 = vld [vmem:[#allocation5 + $0xa50] sm:$0xf]  ;;  %v6985_v55 = vor.u32 %v9124_v46, %v6984_v45  ;;  %3310 = vmatpush.bf16.msra.mxu2 %v7529_v44  ;;  %v6893_v15 = vor.u32 %v9096_v30, %v6890_v12  ;;  %v9024_v43 = vld [vmem:[#allocation5 + $0x554] sm:$0xf]  ;;  %v7149_v44 = vor.u32 %v9160_v31, %v7146_v32  ;;  %v3119_v12 = vpop.f32.mrf.mxu3 }
 0x18f   :  { %v9188_v50 = vld [vmem:[#allocation5 + $0xa6c] sm:$0xf0]  ;;  %3325 = vmatpush.bf16.msra.mxu3 %v5933_v17  ;;  %v6602_v45 = vld [vmem:[#allocation5 + $0x570] sm:$0xf0] }
 0x190   :  { %v7496_v51 = vld [vmem:[#allocation5 + $0xc50] sm:$0xf]  ;;  %v7241_v58 = vor.u32 %v9188_v50, %v7240_v47  ;;  %3285 = vmatpush.bf16.msra.mxu0 %v6985_v55  ;;  %v9088_v46 = vld [vmem:[#allocation5 + $0x754] sm:$0xf] }
 0x191   :  { %v9252_v52 = vld [vmem:[#allocation5 + $0xc6c] sm:$0xf0]  ;;  %v6858_v47 = vld [vmem:[#allocation5 + $0x770] sm:$0xf0] }
 0x192   :  { %v6952_v56 = vld [vmem:[#allocation5 + $0x810] sm:$0xf]  ;;  %v7497_v59 = vor.u32 %v9252_v52, %v7496_v51  ;;  %3298 = vmatpush.bf16.msra.mxu1 %v7241_v58  ;;  %v7114_v50 = vld [vmem:[#allocation5 + $0x970] sm:$0xf0]  ;;  %v6349_v51 = vor.u32 %v8960_v36, %v6346_v39  ;;  %3326 = vmatmul.bf16.vlgmr.msra.gmra.mxu3 %v9887_v19  ;;  %v6605_v52 = vor.u32 %v9024_v43, %v6602_v45 }
 0x193   :  { %v9116_v57 = vld [vmem:[#allocation5 + $0x82c] sm:$0xf0]  ;;  %3370 = vmatpush.bf16.msrb.mxu3 %v7181_v28  ;;  %v6861_v53 = vor.u32 %v9088_v46, %v6858_v47  ;;  %v6314_v55 = vld [vmem:[#allocation5 + $0x330] sm:$0xf0]  ;;  %v3095_v46 = vpop.f32.mrf.mxu1 }
 0x194   :  { %v7208_v60 = vld [vmem:[#allocation5 + $0xa10] sm:$0xf]  ;;  %v6953_v7 = vor.u32 %v9116_v57, %v6952_v56  ;;  %3311 = vmatpush.bf16.msra.mxu2 %v7497_v59  ;;  %v9016_v56 = vld [vmem:[#allocation5 + $0x514] sm:$0xf]  ;;  %v7117_v57 = vor.u32 %v9152_v49, %v7114_v50  ;;  %v6317_v63 = vor.u32 %v8952_v54, %v6314_v55  ;;  %v8901_v46 = vld [vmem:[#allocation5 + $0x174] sm:$0xf0] }
 0x195   :  { %v9180_v61 = vld [vmem:[#allocation5 + $0xa2c] sm:$0xf0]  ;;  %v6570_v58 = vld [vmem:[#allocation5 + $0x530] sm:$0xf0] }
 0x196   :  { %v7464_v62 = vld [vmem:[#allocation5 + $0xc10] sm:$0xf]  ;;  %v7209_v13 = vor.u32 %v9180_v61, %v7208_v60  ;;  %3286 = vmatpush.bf16.msra.mxu0 %v6953_v7  ;;  %v9080_v59 = vld [vmem:[#allocation5 + $0x714] sm:$0xf]  ;;  %v6573_v1 = vor.u32 %v9016_v56, %v6570_v58 }
 0x197   :  { %v9244_v0 = vld [vmem:[#allocation5 + $0xc2c] sm:$0xf0]  ;;  %3371 = vmatpush.bf16.msrb.mxu3 %v7149_v44  ;;  %v6826_v60 = vld [vmem:[#allocation5 + $0x730] sm:$0xf0] }
 0x198   :  { %v7465_v14 = vor.u32 %v9244_v0, %v7464_v62  ;;  %3299 = vmatpush.bf16.msra.mxu1 %v7209_v13  ;;  %v9144_v61 = vld [vmem:[#allocation5 + $0x914] sm:$0xf]  ;;  %v3080_v0 = vpop.f32.mrf.mxu0  ;;  %v6829_v2 = vor.u32 %v9080_v59, %v6826_v60 }
 0x199   :  { %3287 = vmatmul.bf16.vlgmr.msra.gmra.mxu0 %v9899_v40  ;;  %v7082_v62 = vld [vmem:[#allocation5 + $0x930] sm:$0xf0]  ;;  %v3081_v6 = vadd.f32 %v3080_v0, %v9949_v48 }
 0x19a   :  { %3312 = vmatpush.bf16.msra.mxu2 %v7465_v14  ;;  %3331 = vmatpush.bf16.msrb.mxu0 %v6413_v21  ;;  %v6282_v4 = vld [vmem:[#allocation5 + $0x2f0] sm:$0xf0]  ;;  %v7085_v7 = vor.u32 %v9144_v61, %v7082_v62  ;;  %v3108_v62 = vpop.f32.mrf.mxu2 }
 0x19b   :  { %3300 = vmatmul.bf16.vlgmr.msra.gmra.mxu1 %v9901_v41  ;;  %v9008_v5 = vld [vmem:[#allocation5 + $0x4d4] sm:$0xf]  ;;  %3372 = vmatpush.bf16.msrb.mxu3 %v7117_v57  ;;  %v3094_v16 = vadd.f32 %v3093_v38, %v3081_v6  ;;  %v6285_v42 = vor.u32 %v8944_v3, %v6282_v4  ;;  %v3121_v3 = vpop.f32.mrf.mxu3  ;;  %v8957_v62 = vld [vmem:[#allocation5 + $0x334] sm:$0xf0] }
 0x19c   :  { %3344 = vmatpush.bf16.msrb.mxu1 %v6669_v23  ;;  %v6538_v8 = vld [vmem:[#allocation5 + $0x4f0] sm:$0xf0] }
 0x19d   :  { %3313 = vmatmul.bf16.vlgmr.msra.gmra.mxu2 %v9897_v37  ;;  %v9072_v10 = vld [vmem:[#allocation5 + $0x6d4] sm:$0xf]  ;;  %v6541_v17 = vor.u32 %v9008_v5, %v6538_v8  ;;  %v3107_v30 = vadd.f32 %v3106_v26, %v3094_v16  ;;  %v6160_v8 = vld [vmem:[#allocation5 + $0x1d8] sm:$0xf] }
 0x19e   :  { %3357 = vmatpush.bf16.msrb.mxu2 %v6925_v24  ;;  %3332 = vmatpush.bf16.msrb.mxu0 %v6381_v33  ;;  %v6794_v11 = vld [vmem:[#allocation5 + $0x6f0] sm:$0xf0]  ;;  %v8981_v16 = vld [vmem:[#allocation5 + $0x3f4] sm:$0xf0] }
 0x19f   :  { %v9136_v13 = vld [vmem:[#allocation5 + $0x8d4] sm:$0xf]  ;;  %v6797_v21 = vor.u32 %v9072_v10, %v6794_v11  ;;  %3373 = vmatpush.bf16.msrb.mxu3 %v7085_v7  ;;  %v8917_v10 = vld [vmem:[#allocation5 + $0x1f4] sm:$0xf0] }
 0x1a0   :  { %3345 = vmatpush.bf16.msrb.mxu1 %v6637_v35  ;;  %v7050_v14 = vld [vmem:[#allocation5 + $0x8f0] sm:$0xf0]  ;;  %v9956_v35 = vadd.f32 %v3119_v12, %v3107_v30  ;;  %v6384_v30 = vld [vmem:[#allocation5 + $0x398] sm:$0xf] }
 0x1a1   :  { %v8936_v23 = vld [vmem:[#allocation5 + $0x294] sm:$0xf]  ;;  %v7053_v48 = vor.u32 %v9136_v13, %v7050_v14  ;;  %v6416_v14 = vld [vmem:[#allocation5 + $0x3d8] sm:$0xf] }
 0x1a2   :  { %3358 = vmatpush.bf16.msrb.mxu2 %v6893_v15  ;;  %3333 = vmatpush.bf16.msrb.mxu0 %v6349_v51  ;;  %v6250_v24 = vld [vmem:[#allocation5 + $0x2b0] sm:$0xf0]  ;;  %v3082_v15 = vpop.f32.mrf.mxu0  ;;  %v8973_v12 = vld [vmem:[#allocation5 + $0x3b4] sm:$0xf0] }
 0x1a3   :  { %v9000_v25 = vld [vmem:[#allocation5 + $0x494] sm:$0xf]  ;;  %v6253_v33 = vor.u32 %v8936_v23, %v6250_v24  ;;  %3374 = vmatpush.bf16.msrb.mxu3 %v7053_v48  ;;  %v6161_v23 = vor.u32 %v8917_v10, %v6160_v8  ;;  %v6417_v48 = vor.u32 %v8981_v16, %v6416_v14  ;;  %v6288_v14 = vld [vmem:[#allocation5 + $0x2d8] sm:$0xf] }
 0x1a4   :  { %3346 = vmatpush.bf16.msrb.mxu1 %v6605_v52  ;;  %v6506_v27 = vld [vmem:[#allocation5 + $0x4b0] sm:$0xf0]  ;;  %v8949_v16 = vld [vmem:[#allocation5 + $0x2f4] sm:$0xf0] }
 0x1a5   :  { %v9064_v28 = vld [vmem:[#allocation5 + $0x694] sm:$0xf]  ;;  %v6509_v36 = vor.u32 %v9000_v25, %v6506_v27 }
 0x1a6   :  { %3359 = vmatpush.bf16.msrb.mxu2 %v6861_v53  ;;  %3334 = vmatpush.bf16.msrb.mxu0 %v6317_v63  ;;  %v6762_v29 = vld [vmem:[#allocation5 + $0x6b0] sm:$0xf0] }
 0x1a7   :  { %v9128_v31 = vld [vmem:[#allocation5 + $0x894] sm:$0xf]  ;;  %v6765_v39 = vor.u32 %v9064_v28, %v6762_v29  ;;  %v6128_v28 = vld [vmem:[#allocation5 + $0x198] sm:$0xf] }
 0x1a8   :  { %3347 = vmatpush.bf16.msrb.mxu1 %v6573_v1  ;;  %v7018_v32 = vld [vmem:[#allocation5 + $0x8b0] sm:$0xf0]  ;;  %v8909_v29 = vld [vmem:[#allocation5 + $0x1b4] sm:$0xf0] }
 0x1a9   :  { %v8928_v43 = vld [vmem:[#allocation5 + $0x254] sm:$0xf]  ;;  %v7021_v47 = vor.u32 %v9128_v31, %v7018_v32 }
 0x1aa   :  { %3360 = vmatpush.bf16.msrb.mxu2 %v6829_v2  ;;  %3335 = vmatpush.bf16.msrb.mxu0 %v6285_v42  ;;  %v6218_v44 = vld [vmem:[#allocation5 + $0x270] sm:$0xf0] }
 0x1ab   :  { %v8992_v45 = vld [vmem:[#allocation5 + $0x454] sm:$0xf]  ;;  %v6221_v54 = vor.u32 %v8928_v43, %v6218_v44  ;;  %3375 = vmatpush.bf16.msrb.mxu3 %v7021_v47  ;;  %v6385_v43 = vor.u32 %v8973_v12, %v6384_v30  ;;  %v6352_v47 = vld [vmem:[#allocation5 + $0x358] sm:$0xf]  ;;  %v3171_v30 = vpop.f32.mrf.mxu3 }
 0x1ac   :  { %3348 = vmatpush.bf16.msrb.mxu1 %v6541_v17  ;;  %v6474_v49 = vld [vmem:[#allocation5 + $0x470] sm:$0xf0]  ;;  %v6256_v12 = vld [vmem:[#allocation5 + $0x298] sm:$0xf] }
 0x1ad   :  { %v9056_v50 = vld [vmem:[#allocation5 + $0x654] sm:$0xf]  ;;  %v6477_v57 = vor.u32 %v8992_v45, %v6474_v49  ;;  %v6096_v45 = vld [vmem:[#allocation5 + $0x158] sm:$0xf] }
 0x1ae   :  { %3361 = vmatpush.bf16.msrb.mxu2 %v6797_v21  ;;  %v6730_v51 = vld [vmem:[#allocation5 + $0x670] sm:$0xf0]  ;;  %3336 = vmatpush.bf16.msrb.mxu0 %v6253_v33  ;;  %v6129_v33 = vor.u32 %v8909_v29, %v6128_v28  ;;  %v8965_v49 = vld [vmem:[#allocation5 + $0x374] sm:$0xf0]  ;;  %v3158_v29 = vpop.f32.mrf.mxu2 }
 0x1af   :  { %v9120_v52 = vld [vmem:[#allocation5 + $0x854] sm:$0xf]  ;;  %v6733_v58 = vor.u32 %v9056_v50, %v6730_v51  ;;  %v8877_v28 = vld [vmem:[#allocation5 + $0xb4] sm:$0xf0] }
 0x1b0   :  { %v6986_v53 = vld [vmem:[#allocation5 + $0x870] sm:$0xf0]  ;;  %3349 = vmatpush.bf16.msrb.mxu1 %v6509_v36 }
 0x1b1   :  { %v8920_v55 = vld [vmem:[#allocation5 + $0x214] sm:$0xf]  ;;  %v6989_v63 = vor.u32 %v9120_v52, %v6986_v53  ;;  %v6097_v52 = vor.u32 %v8901_v46, %v6096_v45 }
 0x1b2   :  { %v6186_v56 = vld [vmem:[#allocation5 + $0x230] sm:$0xf0]  ;;  %3362 = vmatpush.bf16.msrb.mxu2 %v6765_v39  ;;  %3337 = vmatpush.bf16.msrb.mxu0 %v6221_v54 }
 0x1b3   :  { %v8984_v59 = vld [vmem:[#allocation5 + $0x414] sm:$0xf]  ;;  %v6189_v38 = vor.u32 %v8920_v55, %v6186_v56  ;;  %3376 = vmatpush.bf16.msrb.mxu3 %v6989_v63  ;;  %v6353_v56 = vor.u32 %v8965_v49, %v6352_v47  ;;  %v9962_v63 = vld [vmem:[#allocation7] sm:$0xff] }
 0x1b4   :  { %v6442_v60 = vld [vmem:[#allocation5 + $0x430] sm:$0xf0]  ;;  %3350 = vmatpush.bf16.msrb.mxu1 %v6477_v57 }
 0x1b5   :  { %v9048_v61 = vld [vmem:[#allocation5 + $0x614] sm:$0xf]  ;;  %v6445_v11 = vor.u32 %v8984_v59, %v6442_v60  ;;  %v8893_v59 = vld [vmem:[#allocation5 + $0x134] sm:$0xf0]  ;;  %v3132_v60 = vpop.f32.mrf.mxu0 }
 0x1b6   :  { %v6698_v0 = vld [vmem:[#allocation5 + $0x630] sm:$0xf0]  ;;  %3363 = vmatpush.bf16.msrb.mxu2 %v6733_v58  ;;  %3338 = vmatpush.bf16.msrb.mxu0 %v6189_v38  ;;  %v6064_v58 = vld [vmem:[#allocation5 + $0x118] sm:$0xf] }
 0x1b7   :  { %v9112_v1 = vld [vmem:[#allocation5 + $0x814] sm:$0xf]  ;;  %v6701_v13 = vor.u32 %v9048_v61, %v6698_v0  ;;  %v6320_v61 = vld [vmem:[#allocation5 + $0x318] sm:$0xf]  ;;  %v585_v0 = vperm.slane %v9962_v63, 3 }
 0x1b8   :  { %v6954_v2 = vld [vmem:[#allocation5 + $0x830] sm:$0xf0]  ;;  %3351 = vmatpush.bf16.msrb.mxu1 %v6445_v11  ;;  %v6321_v8 = vor.u32 %v8957_v62, %v6320_v61  ;;  %v6032_v11 = vld [vmem:[#allocation5 + $0xd8] sm:$0xf] }
 0x1b9   :  { %v9232_v4 = vld [vmem:[#allocation5 + $0xbd4] sm:$0xf]  ;;  %v6957_v42 = vor.u32 %v9112_v1, %v6954_v2  ;;  %3339 = vmatmul.bf16.vlgmr.msrb.gmra.mxu0 %v9891_v22  ;;  %v9966_v1 = vadd.f32 %v3132_v60, %v9956_v35  ;;  %v5936_v62 = vld [vmem:[#allocation5 + $0x18] sm:$0xf] }
 0x1ba   :  { %v7434_v5 = vld [vmem:[#allocation5 + $0xbf0] sm:$0xf0]  ;;  %3364 = vmatpush.bf16.msrb.mxu2 %v6701_v13  ;;  %v8885_v13 = vld [vmem:[#allocation5 + $0xf4] sm:$0xf0] }
 0x1bb   :  { %v9296_v6 = vld [vmem:[#allocation5 + $0xdd4] sm:$0xf]  ;;  %v7437_v17 = vor.u32 %v9232_v4, %v7434_v5  ;;  %3377 = vmatpush.bf16.msrb.mxu3 %v6957_v42  ;;  %3352 = vmatmul.bf16.vlgmr.msrb.gmra.mxu1 %v9885_v18  ;;  %v6065_v4 = vor.u32 %v8893_v59, %v6064_v58 }
 0x1bc   :  { %v7690_v7 = vld [vmem:[#allocation5 + $0xdf0] sm:$0xf0] }
 0x1bd   :  { %v7693_v21 = vor.u32 %v9296_v6, %v7690_v7  ;;  %v9224_v24 = vld [vmem:[#allocation5 + $0xb94] sm:$0xf]  ;;  %3383 = vmatpush.bf16.msra.mxu0 %v7437_v17  ;;  %3365 = vmatmul.bf16.vlgmr.msrb.gmra.mxu2 %v9889_v20  ;;  %v3145_v7 = vpop.f32.mrf.mxu1 }
 0x1be   :  { %v7402_v25 = vld [vmem:[#allocation5 + $0xbb0] sm:$0xf0]  ;;  %3409 = vmatpush.bf16.msra.mxu2 %v6161_v23  ;;  %3378 = vmatmul.bf16.vlgmr.msrb.gmra.mxu3 %v9899_v40  ;;  %v3146_v42 = vadd.f32 %v3145_v7, %v585_v0  ;;  %v9045_v7 = vld [vmem:[#allocation5 + $0x5f4] sm:$0xf0] }
 0x1bf   :  { %v9288_v26 = vld [vmem:[#allocation5 + $0xd94] sm:$0xf]  ;;  %v7405_v31 = vor.u32 %v9224_v24, %v7402_v25  ;;  %3396 = vmatpush.bf16.msra.mxu1 %v7693_v21  ;;  %3422 = vmatpush.bf16.msra.mxu3 %v6417_v48  ;;  %v6033_v21 = vor.u32 %v8885_v13, %v6032_v11  ;;  %v9109_v11 = vld [vmem:[#allocation5 + $0x7f4] sm:$0xf0] }
 0x1c0   :  { %v7658_v27 = vld [vmem:[#allocation5 + $0xdb0] sm:$0xf0]  ;;  %v7184_v13 = vld [vmem:[#allocation5 + $0x9d8] sm:$0xf] }
 0x1c1   :  { %v7661_v32 = vor.u32 %v9288_v26, %v7658_v27  ;;  %v9216_v15 = vld [vmem:[#allocation5 + $0xb54] sm:$0xf]  ;;  %3384 = vmatpush.bf16.msra.mxu0 %v7405_v31  ;;  %v6289_v26 = vor.u32 %v8949_v16, %v6288_v14  ;;  %v6000_v27 = vld [vmem:[#allocation5 + $0x98] sm:$0xf] }
 0x1c2   :  { %v7370_v36 = vld [vmem:[#allocation5 + $0xb70] sm:$0xf0]  ;;  %3410 = vmatpush.bf16.msra.mxu2 %v6129_v33  ;;  %v8941_v31 = vld [vmem:[#allocation5 + $0x2b4] sm:$0xf0]  ;;  %v3134_v33 = vpop.f32.mrf.mxu0 }
 0x1c3   :  { %v9280_v39 = vld [vmem:[#allocation5 + $0xd54] sm:$0xf]  ;;  %v7373_v50 = vor.u32 %v9216_v15, %v7370_v36  ;;  %3397 = vmatpush.bf16.msra.mxu1 %v7661_v32  ;;  %3423 = vmatpush.bf16.msra.mxu3 %v6385_v43  ;;  %v3159_v32 = vadd.f32 %v3158_v29, %v3146_v42  ;;  %v6257_v49 = vor.u32 %v8941_v31, %v6256_v12  ;;  %v9173_v14 = vld [vmem:[#allocation5 + $0x9f4] sm:$0xf0] }
 0x1c4   :  { %v7626_v44 = vld [vmem:[#allocation5 + $0xd70] sm:$0xf0]  ;;  %v9101_v29 = vld [vmem:[#allocation5 + $0x7b4] sm:$0xf0] }
 0x1c5   :  { %v7629_v51 = vor.u32 %v9280_v39, %v7626_v44  ;;  %v9208_v53 = vld [vmem:[#allocation5 + $0xb14] sm:$0xf]  ;;  %3385 = vmatpush.bf16.msra.mxu0 %v7373_v50  ;;  %v6001_v39 = vor.u32 %v8877_v28, %v6000_v27  ;;  %v9968_v46 = vadd.f32 %v3171_v30, %v3159_v32  ;;  %v3147_v47 = vpop.f32.mrf.mxu1  ;;  %v6896_v27 = vld [vmem:[#allocation5 + $0x798] sm:$0xf] }
 0x1c6   :  { %v7338_v54 = vld [vmem:[#allocation5 + $0xb30] sm:$0xf0]  ;;  %3411 = vmatpush.bf16.msra.mxu2 %v6097_v52  ;;  %v8869_v52 = vld [vmem:[#allocation5 + $0x74] sm:$0xf0] }
 0x1c7   :  { %v9272_v55 = vld [vmem:[#allocation5 + $0xd14] sm:$0xf]  ;;  %v7341_v2 = vor.u32 %v9208_v53, %v7338_v54  ;;  %3398 = vmatpush.bf16.msra.mxu1 %v7629_v51  ;;  %3424 = vmatpush.bf16.msra.mxu3 %v6353_v56  ;;  %v5968_v51 = vld [vmem:[#allocation5 + $0x58] sm:$0xf] }
 0x1c8   :  { %v7594_v57 = vld [vmem:[#allocation5 + $0xd30] sm:$0xf0]  ;;  %v6224_v53 = vld [vmem:[#allocation5 + $0x258] sm:$0xf]  ;;  %v5969_v59 = vor.u32 %v8869_v52, %v5968_v51 }
 0x1c9   :  { %v7597_v3 = vor.u32 %v9272_v55, %v7594_v57  ;;  %v9200_v5 = vld [vmem:[#allocation5 + $0xad4] sm:$0xf]  ;;  %3386 = vmatpush.bf16.msra.mxu0 %v7341_v2  ;;  %v8933_v54 = vld [vmem:[#allocation5 + $0x274] sm:$0xf0] }
 0x1ca   :  { %v7306_v6 = vld [vmem:[#allocation5 + $0xaf0] sm:$0xf0]  ;;  %3412 = vmatpush.bf16.msra.mxu2 %v6065_v4  ;;  %v6225_v0 = vor.u32 %v8933_v54, %v6224_v53  ;;  %v8861_v2 = vld [vmem:[#allocation5 + $0x34] sm:$0xf0] }
 0x1cb   :  { %v9264_v38 = vld [vmem:[#allocation5 + $0xcd4] sm:$0xf]  ;;  %v7309_v35 = vor.u32 %v9200_v5, %v7306_v6  ;;  %3399 = vmatpush.bf16.msra.mxu1 %v7597_v3  ;;  %3425 = vmatpush.bf16.msra.mxu3 %v6321_v8  ;;  %v6192_v3 = vld [vmem:[#allocation5 + $0x218] sm:$0xf]  ;;  %v3160_v5 = vpop.f32.mrf.mxu2  ;;  %v3173_v6 = vpop.f32.mrf.mxu3  ;;  %v5937_v42 = vor.u32 %v8861_v2, %v5936_v62 }
 0x1cc   :  { %v7562_v10 = vld [vmem:[#allocation5 + $0xcf0] sm:$0xf0]  ;;  %v8925_v4 = vld [vmem:[#allocation5 + $0x234] sm:$0xf0] }
 0x1cd   :  { %v7565_v17 = vor.u32 %v9264_v38, %v7562_v10  ;;  %v9192_v23 = vld [vmem:[#allocation5 + $0xa94] sm:$0xf]  ;;  %3387 = vmatpush.bf16.msra.mxu0 %v7309_v35  ;;  %v6672_v38 = vld [vmem:[#allocation5 + $0x5d8] sm:$0xf] }
 0x1ce   :  { %v7274_v24 = vld [vmem:[#allocation5 + $0xab0] sm:$0xf0]  ;;  %3413 = vmatpush.bf16.msra.mxu2 %v6033_v21  ;;  %v6928_v8 = vld [vmem:[#allocation5 + $0x7d8] sm:$0xf]  ;;  %v6193_v21 = vor.u32 %v8925_v4, %v6192_v3  ;;  %v3184_v4 = vpop.f32.mrf.mxu0 }
 0x1cf   :  { %v9256_v25 = vld [vmem:[#allocation5 + $0xc94] sm:$0xf]  ;;  %v7277_v15 = vor.u32 %v9192_v23, %v7274_v24  ;;  %3400 = vmatpush.bf16.msra.mxu1 %v7565_v17  ;;  %3426 = vmatpush.bf16.msra.mxu3 %v6289_v26  ;;  %v7440_v35 = vld [vmem:[#allocation5 + $0xbd8] sm:$0xf]  ;;  %v6673_v23 = vor.u32 %v9045_v7, %v6672_v38  ;;  %v6929_v24 = vor.u32 %v9109_v11, %v6928_v8  ;;  %v3197_v11 = vpop.f32.mrf.mxu1 }
 0x1d0   :  { %v7530_v48 = vld [vmem:[#allocation5 + $0xcb0] sm:$0xf0]  ;;  %v9237_v17 = vld [vmem:[#allocation5 + $0xbf4] sm:$0xf0] }
 0x1d1   :  { %v7533_v36 = vor.u32 %v9256_v25, %v7530_v48  ;;  %v9184_v43 = vld [vmem:[#allocation5 + $0xa54] sm:$0xf]  ;;  %3388 = vmatpush.bf16.msra.mxu0 %v7277_v15  ;;  %v7185_v25 = vor.u32 %v9173_v14, %v7184_v13  ;;  %v6640_v26 = vld [vmem:[#allocation5 + $0x598] sm:$0xf]  ;;  %v7441_v28 = vor.u32 %v9237_v17, %v7440_v35  ;;  %v6897_v15 = vor.u32 %v9101_v29, %v6896_v27 }
 0x1d2   :  { %v7242_v44 = vld [vmem:[#allocation5 + $0xa70] sm:$0xf0]  ;;  %3414 = vmatpush.bf16.msra.mxu2 %v6001_v39  ;;  %v9037_v48 = vld [vmem:[#allocation5 + $0x5b4] sm:$0xf0] }
 0x1d3   :  { %v9248_v45 = vld [vmem:[#allocation5 + $0xc54] sm:$0xf]  ;;  %v7245_v55 = vor.u32 %v9184_v43, %v7242_v44  ;;  %3401 = vmatpush.bf16.msra.mxu1 %v7533_v36  ;;  %3427 = vmatpush.bf16.msra.mxu3 %v6257_v49  ;;  %v7152_v30 = vld [vmem:[#allocation5 + $0x998] sm:$0xf]  ;;  %v6641_v33 = vor.u32 %v9037_v48, %v6640_v26 }
 0x1d4   :  { %v7498_v50 = vld [vmem:[#allocation5 + $0xc70] sm:$0xf0]  ;;  %v9165_v12 = vld [vmem:[#allocation5 + $0x9b4] sm:$0xf0] }
 0x1d5   :  { %v9176_v56 = vld [vmem:[#allocation5 + $0xa14] sm:$0xf]  ;;  %v7501_v58 = vor.u32 %v9248_v45, %v7498_v50  ;;  %3389 = vmatpush.bf16.msra.mxu0 %v7245_v55  ;;  %v7408_v31 = vld [vmem:[#allocation5 + $0xb98] sm:$0xf]  ;;  %v7153_v36 = vor.u32 %v9165_v12, %v7152_v30 }
 0x1d6   :  { %v7210_v57 = vld [vmem:[#allocation5 + $0xa30] sm:$0xf0]  ;;  %3415 = vmatpush.bf16.msra.mxu2 %v5969_v59  ;;  %v9229_v32 = vld [vmem:[#allocation5 + $0xbb4] sm:$0xf0] }
 0x1d7   :  { %v9240_v60 = vld [vmem:[#allocation5 + $0xc14] sm:$0xf]  ;;  %v7213_v10 = vor.u32 %v9176_v56, %v7210_v57  ;;  %3402 = vmatpush.bf16.msra.mxu1 %v7501_v58  ;;  %3428 = vmatpush.bf16.msra.mxu3 %v6225_v0  ;;  %v6608_v39 = vld [vmem:[#allocation5 + $0x558] sm:$0xf]  ;;  %v7409_v45 = vor.u32 %v9229_v32, %v7408_v31  ;;  %v3223_v32 = vpop.f32.mrf.mxu3 }
 0x1d8   :  { %v7466_v61 = vld [vmem:[#allocation5 + $0xc30] sm:$0xf0]  ;;  %v9029_v43 = vld [vmem:[#allocation5 + $0x574] sm:$0xf0] }
 0x1d9   :  { %v7469_v16 = vor.u32 %v9240_v60, %v7466_v61  ;;  %3390 = vmatpush.bf16.msra.mxu0 %v7213_v10  ;;  %v6864_v44 = vld [vmem:[#allocation5 + $0x758] sm:$0xf]  ;;  %v6609_v53 = vor.u32 %v9029_v43, %v6608_v39  ;;  %v3185_v10 = vadd.f32 %v3184_v4, %v9968_v46  ;;  %v3186_v43 = vpop.f32.mrf.mxu0 }
 0x1da   :  { %3416 = vmatpush.bf16.msra.mxu2 %v5937_v42  ;;  %v9093_v47 = vld [vmem:[#allocation5 + $0x774] sm:$0xf0] }
 0x1db   :  { %3403 = vmatpush.bf16.msra.mxu1 %v7469_v16  ;;  %3429 = vmatpush.bf16.msra.mxu3 %v6193_v21  ;;  %v7120_v49 = vld [vmem:[#allocation5 + $0x958] sm:$0xf]  ;;  %v6865_v54 = vor.u32 %v9093_v47, %v6864_v44  ;;  %v3198_v21 = vadd.f32 %v3197_v11, %v3185_v10 }
 0x1dc   :  { %3391 = vmatmul.bf16.vlgmr.msra.gmra.mxu0 %v9901_v41  ;;  %v9157_v50 = vld [vmem:[#allocation5 + $0x974] sm:$0xf0] }
 0x1dd   :  { %3435 = vmatpush.bf16.msrb.mxu0 %v6673_v23  ;;  %v7376_v51 = vld [vmem:[#allocation5 + $0xb58] sm:$0xf]  ;;  %3417 = vmatmul.bf16.vlgmr.msra.gmra.mxu2 %v9887_v19  ;;  %v7121_v55 = vor.u32 %v9157_v50, %v7120_v49 }
 0x1de   :  { %3461 = vmatpush.bf16.msrb.mxu2 %v7185_v25  ;;  %3404 = vmatmul.bf16.vlgmr.msra.gmra.mxu1 %v9897_v37  ;;  %v9221_v52 = vld [vmem:[#allocation5 + $0xb74] sm:$0xf0] }
 0x1df   :  { %3448 = vmatpush.bf16.msrb.mxu1 %v6929_v24  ;;  %3474 = vmatpush.bf16.msrb.mxu3 %v7441_v28  ;;  %v6576_v56 = vld [vmem:[#allocation5 + $0x518] sm:$0xf]  ;;  %v7377_v59 = vor.u32 %v9221_v52, %v7376_v51  ;;  %v3210_v28 = vpop.f32.mrf.mxu2  ;;  %v3199_v51 = vpop.f32.mrf.mxu1 }
 0x1e0   :  { %3430 = vmatmul.bf16.vlgmr.msra.gmra.mxu3 %v9891_v22  ;;  %v9021_v57 = vld [vmem:[#allocation5 + $0x534] sm:$0xf0]  ;;  %v3211_v31 = vadd.f32 %v3210_v28, %v3198_v21  ;;  %v6098_v51 = vld [vmem:[#allocation5 + $0x178] sm:$0xf0] }
 0x1e1   :  { %3436 = vmatpush.bf16.msrb.mxu0 %v6641_v33  ;;  %v6832_v58 = vld [vmem:[#allocation5 + $0x718] sm:$0xf]  ;;  %v6577_v3 = vor.u32 %v9021_v57, %v6576_v56 }
 0x1e2   :  { %3462 = vmatpush.bf16.msrb.mxu2 %v7153_v36  ;;  %v9085_v60 = vld [vmem:[#allocation5 + $0x734] sm:$0xf0]  ;;  %v9975_v39 = vadd.f32 %v3223_v32, %v3211_v31  ;;  %v8969_v31 = vld [vmem:[#allocation5 + $0x39c] sm:$0xf] }
 0x1e3   :  { %3449 = vmatpush.bf16.msrb.mxu1 %v6897_v15  ;;  %3475 = vmatpush.bf16.msrb.mxu3 %v7409_v45  ;;  %v7088_v61 = vld [vmem:[#allocation5 + $0x918] sm:$0xf]  ;;  %v6833_v5 = vor.u32 %v9085_v60, %v6832_v58  ;;  %v6386_v32 = vld [vmem:[#allocation5 + $0x3b8] sm:$0xf0] }
 0x1e4   :  { %v9149_v62 = vld [vmem:[#allocation5 + $0x934] sm:$0xf0] }
 0x1e5   :  { %v7344_v0 = vld [vmem:[#allocation5 + $0xb18] sm:$0xf]  ;;  %3437 = vmatpush.bf16.msrb.mxu0 %v6609_v53  ;;  %v7089_v6 = vor.u32 %v9149_v62, %v7088_v61 }
 0x1e6   :  { %v9213_v2 = vld [vmem:[#allocation5 + $0xb34] sm:$0xf0]  ;;  %3463 = vmatpush.bf16.msrb.mxu2 %v7121_v55 }
 0x1e7   :  { %3450 = vmatpush.bf16.msrb.mxu1 %v6865_v54  ;;  %v6544_v38 = vld [vmem:[#allocation5 + $0x4d8] sm:$0xf]  ;;  %3476 = vmatpush.bf16.msrb.mxu3 %v7377_v59  ;;  %v7345_v13 = vor.u32 %v9213_v2, %v7344_v0  ;;  %v3212_v4 = vpop.f32.mrf.mxu2 }
 0x1e8   :  { %v9013_v7 = vld [vmem:[#allocation5 + $0x4f4] sm:$0xf0]  ;;  %v6322_v4 = vld [vmem:[#allocation5 + $0x338] sm:$0xf0] }
 0x1e9   :  { %v6800_v8 = vld [vmem:[#allocation5 + $0x6d8] sm:$0xf]  ;;  %3438 = vmatpush.bf16.msrb.mxu0 %v6577_v3  ;;  %v6545_v23 = vor.u32 %v9013_v7, %v6544_v38 }
 0x1ea   :  { %v9077_v14 = vld [vmem:[#allocation5 + $0x6f4] sm:$0xf0]  ;;  %3464 = vmatpush.bf16.msrb.mxu2 %v7089_v6 }
 0x1eb   :  { %v7056_v16 = vld [vmem:[#allocation5 + $0x8d8] sm:$0xf]  ;;  %3451 = vmatpush.bf16.msrb.mxu1 %v6833_v5  ;;  %v6801_v24 = vor.u32 %v9077_v14, %v6800_v8  ;;  %3477 = vmatpush.bf16.msrb.mxu3 %v7345_v13  ;;  %v3225_v8 = vpop.f32.mrf.mxu3  ;;  %v8913_v13 = vld [vmem:[#allocation5 + $0x1dc] sm:$0xf] }
 0x1ec   :  { %v9141_v42 = vld [vmem:[#allocation5 + $0x8f4] sm:$0xf0] }
 0x1ed   :  { %v7312_v35 = vld [vmem:[#allocation5 + $0xad8] sm:$0xf]  ;;  %v7057_v25 = vor.u32 %v9141_v42, %v7056_v16  ;;  %3439 = vmatpush.bf16.msrb.mxu0 %v6545_v23  ;;  %v6162_v16 = vld [vmem:[#allocation5 + $0x1f8] sm:$0xf0] }
 0x1ee   :  { %v9205_v17 = vld [vmem:[#allocation5 + $0xaf4] sm:$0xf0]  ;;  %v8977_v42 = vld [vmem:[#allocation5 + $0x3dc] sm:$0xf] }
 0x1ef   :  { %v6512_v26 = vld [vmem:[#allocation5 + $0x498] sm:$0xf]  ;;  %v7313_v46 = vor.u32 %v9205_v17, %v7312_v35  ;;  %3452 = vmatpush.bf16.msrb.mxu1 %v6801_v24  ;;  %3465 = vmatpush.bf16.msrb.mxu2 %v7057_v25  ;;  %v6418_v35 = vld [vmem:[#allocation5 + $0x3f8] sm:$0xf0] }
 0x1f0   :  { %v9005_v48 = vld [vmem:[#allocation5 + $0x4b4] sm:$0xf0]  ;;  %v9041_v23 = vld [vmem:[#allocation5 + $0x5dc] sm:$0xf] }
 0x1f1   :  { %v6768_v27 = vld [vmem:[#allocation5 + $0x698] sm:$0xf]  ;;  %v6513_v36 = vor.u32 %v9005_v48, %v6512_v26  ;;  %3478 = vmatpush.bf16.msrb.mxu3 %v7313_v46  ;;  %v6674_v24 = vld [vmem:[#allocation5 + $0x5f8] sm:$0xf0]  ;;  %v6165_v48 = vor.u32 %v8913_v13, %v6162_v16 }
 0x1f2   :  { %v9069_v29 = vld [vmem:[#allocation5 + $0x6b4] sm:$0xf0] }
 0x1f3   :  { %v7024_v30 = vld [vmem:[#allocation5 + $0x898] sm:$0xf]  ;;  %v6769_v44 = vor.u32 %v9069_v29, %v6768_v27  ;;  %3440 = vmatpush.bf16.msrb.mxu0 %v6513_v36  ;;  %v6421_v27 = vor.u32 %v8977_v42, %v6418_v35  ;;  %v8905_v29 = vld [vmem:[#allocation5 + $0x19c] sm:$0xf]  ;;  %v3249_v42 = vpop.f32.mrf.mxu1 }
 0x1f4   :  { %v9133_v12 = vld [vmem:[#allocation5 + $0x8b4] sm:$0xf0]  ;;  %v6034_v35 = vld [vmem:[#allocation5 + $0xf8] sm:$0xf0] }
 0x1f5   :  { %v7280_v33 = vld [vmem:[#allocation5 + $0xa98] sm:$0xf]  ;;  %v7025_v45 = vor.u32 %v9133_v12, %v7024_v30  ;;  %3453 = vmatpush.bf16.msrb.mxu1 %v6769_v44  ;;  %v6677_v30 = vor.u32 %v9041_v23, %v6674_v24  ;;  %v6130_v12 = vld [vmem:[#allocation5 + $0x1b8] sm:$0xf0]  ;;  %v6389_v44 = vor.u32 %v8969_v31, %v6386_v32 }
 0x1f6   :  { %v9197_v15 = vld [vmem:[#allocation5 + $0xab4] sm:$0xf0]  ;;  %v6133_v43 = vor.u32 %v8905_v29, %v6130_v12  ;;  %v9009_v23 = vld [vmem:[#allocation5 + $0x4dc] sm:$0xf] }
 0x1f7   :  { %v6480_v47 = vld [vmem:[#allocation5 + $0x458] sm:$0xf]  ;;  %v7281_v52 = vor.u32 %v9197_v15, %v7280_v33  ;;  %3466 = vmatpush.bf16.msrb.mxu2 %v7025_v45  ;;  %v9033_v33 = vld [vmem:[#allocation5 + $0x59c] sm:$0xf] }
 0x1f8   :  { %v8997_v49 = vld [vmem:[#allocation5 + $0x474] sm:$0xf0]  ;;  %v6642_v15 = vld [vmem:[#allocation5 + $0x5b8] sm:$0xf0] }
 0x1f9   :  { %v6736_v50 = vld [vmem:[#allocation5 + $0x658] sm:$0xf]  ;;  %v6481_v58 = vor.u32 %v8997_v49, %v6480_v47  ;;  %3479 = vmatpush.bf16.msrb.mxu3 %v7281_v52  ;;  %v8897_v49 = vld [vmem:[#allocation5 + $0x15c] sm:$0xf] }
 0x1fa   :  { %v9061_v53 = vld [vmem:[#allocation5 + $0x674] sm:$0xf0]  ;;  %v8961_v52 = vld [vmem:[#allocation5 + $0x35c] sm:$0xf] }
 0x1fb   :  { %v6992_v54 = vld [vmem:[#allocation5 + $0x858] sm:$0xf]  ;;  %v6737_v61 = vor.u32 %v9061_v53, %v6736_v50  ;;  %3441 = vmatpush.bf16.msrb.mxu0 %v6481_v58  ;;  %v6645_v50 = vor.u32 %v9033_v33, %v6642_v15  ;;  %v6354_v53 = vld [vmem:[#allocation5 + $0x378] sm:$0xf0]  ;;  %v6101_v58 = vor.u32 %v8897_v49, %v6098_v51 }
 0x1fc   :  { %v9125_v55 = vld [vmem:[#allocation5 + $0x874] sm:$0xf0]  ;;  %v6546_v24 = vld [vmem:[#allocation5 + $0x4f8] sm:$0xf0] }
 0x1fd   :  { %v7248_v56 = vld [vmem:[#allocation5 + $0xa58] sm:$0xf]  ;;  %v6993_v62 = vor.u32 %v9125_v55, %v6992_v54  ;;  %3454 = vmatpush.bf16.msrb.mxu1 %v6737_v61  ;;  %v9025_v54 = vld [vmem:[#allocation5 + $0x55c] sm:$0xf]  ;;  %v6549_v12 = vor.u32 %v9009_v23, %v6546_v24 }
 0x1fe   :  { %v9189_v57 = vld [vmem:[#allocation5 + $0xa74] sm:$0xf0]  ;;  %v6610_v55 = vld [vmem:[#allocation5 + $0x578] sm:$0xf0] }
 0x1ff   :  { %v6448_v59 = vld [vmem:[#allocation5 + $0x418] sm:$0xf]  ;;  %v7249_v5 = vor.u32 %v9189_v57, %v7248_v56  ;;  %3467 = vmatpush.bf16.msrb.mxu2 %v6993_v62  ;;  %v8889_v61 = vld [vmem:[#allocation5 + $0x11c] sm:$0xf]  ;;  %v586_v62 = vperm.slane %v9962_v63, 4 }
 0x200   :  { %v8989_v60 = vld [vmem:[#allocation5 + $0x434] sm:$0xf0]  ;;  %v8873_v29 = vld [vmem:[#allocation5 + $0x9c] sm:$0xf] }
 0x201   :  { %v6704_v0 = vld [vmem:[#allocation5 + $0x618] sm:$0xf]  ;;  %v6449_v14 = vor.u32 %v8989_v60, %v6448_v59  ;;  %3480 = vmatpush.bf16.msrb.mxu3 %v7249_v5  ;;  %v6357_v59 = vor.u32 %v8961_v52, %v6354_v53  ;;  %v9017_v5 = vld [vmem:[#allocation5 + $0x51c] sm:$0xf] }
 0x202   :  { %v9053_v2 = vld [vmem:[#allocation5 + $0x634] sm:$0xf0]  ;;  %v6002_v31 = vld [vmem:[#allocation5 + $0xb8] sm:$0xf0] }
 0x203   :  { %v6960_v3 = vld [vmem:[#allocation5 + $0x818] sm:$0xf]  ;;  %v6705_v17 = vor.u32 %v9053_v2, %v6704_v0  ;;  %3442 = vmatpush.bf16.msrb.mxu0 %v6449_v14  ;;  %v6613_v0 = vor.u32 %v9025_v54, %v6610_v55  ;;  %v6066_v2 = vld [vmem:[#allocation5 + $0x138] sm:$0xf0]  ;;  %v3251_v55 = vpop.f32.mrf.mxu1 }
 0x204   :  { %v9117_v6 = vld [vmem:[#allocation5 + $0x834] sm:$0xf0]  ;;  %v6069_v8 = vor.u32 %v8889_v61, %v6066_v2  ;;  %v8881_v14 = vld [vmem:[#allocation5 + $0xdc] sm:$0xf] }
 0x205   :  { %v7216_v38 = vld [vmem:[#allocation5 + $0xa18] sm:$0xf]  ;;  %v6961_v21 = vor.u32 %v9117_v6, %v6960_v3  ;;  %3455 = vmatpush.bf16.msrb.mxu1 %v6705_v17  ;;  %v8953_v3 = vld [vmem:[#allocation5 + $0x31c] sm:$0xf] }
 0x206   :  { %v9181_v7 = vld [vmem:[#allocation5 + $0xa34] sm:$0xf0]  ;;  %3443 = vmatmul.bf16.vlgmr.msrb.gmra.mxu0 %v9885_v18  ;;  %v6578_v6 = vld [vmem:[#allocation5 + $0x538] sm:$0xf0] }
 0x207   :  { %v7696_v10 = vld [vmem:[#allocation5 + $0xdd8] sm:$0xf]  ;;  %v7217_v25 = vor.u32 %v9181_v7, %v7216_v38  ;;  %3468 = vmatpush.bf16.msrb.mxu2 %v6961_v21  ;;  %v3236_v7 = vpop.f32.mrf.mxu0  ;;  %v6581_v63 = vor.u32 %v9017_v5, %v6578_v6  ;;  %v8945_v17 = vld [vmem:[#allocation5 + $0x2dc] sm:$0xf] }
 0x208   :  { %v9301_v11 = vld [vmem:[#allocation5 + $0xdf4] sm:$0xf0]  ;;  %3456 = vmatmul.bf16.vlgmr.msrb.gmra.mxu1 %v9889_v20  ;;  %v3237_v16 = vadd.f32 %v3236_v7, %v586_v62  ;;  %v6290_v21 = vld [vmem:[#allocation5 + $0x2f8] sm:$0xf0] }
 0x209   :  { %v7697_v26 = vor.u32 %v9301_v11, %v7696_v10  ;;  %v7664_v28 = vld [vmem:[#allocation5 + $0xd98] sm:$0xf]  ;;  %3481 = vmatpush.bf16.msrb.mxu3 %v7217_v25  ;;  %3500 = vmatpush.bf16.msra.mxu1 %v6165_v48  ;;  %v6325_v10 = vor.u32 %v8953_v3, %v6322_v4  ;;  %v6037_v48 = vor.u32 %v8881_v14, %v6034_v35  ;;  %v8937_v32 = vld [vmem:[#allocation5 + $0x29c] sm:$0xf] }
 0x20a   :  { %v9293_v46 = vld [vmem:[#allocation5 + $0xdb4] sm:$0xf0]  ;;  %3469 = vmatmul.bf16.vlgmr.msrb.gmra.mxu2 %v9899_v40  ;;  %v3250_v25 = vadd.f32 %v3249_v42, %v3237_v16  ;;  %v6258_v33 = vld [vmem:[#allocation5 + $0x2b8] sm:$0xf0] }
 0x20b   :  { %3487 = vmatpush.bf16.msra.mxu0 %v7697_v26  ;;  %v7665_v36 = vor.u32 %v9293_v46, %v7664_v28  ;;  %3513 = vmatpush.bf16.msra.mxu2 %v6421_v27  ;;  %v7632_v45 = vld [vmem:[#allocation5 + $0xd58] sm:$0xf]  ;;  %v6293_v27 = vor.u32 %v8945_v17, %v6290_v21  ;;  %v6261_v51 = vor.u32 %v8937_v32, %v6258_v33  ;;  %v8865_v54 = vld [vmem:[#allocation5 + $0x5c] sm:$0xf] }
 0x20c   :  { %v9285_v47 = vld [vmem:[#allocation5 + $0xd74] sm:$0xf0]  ;;  %3482 = vmatmul.bf16.vlgmr.msrb.gmra.mxu3 %v9901_v41  ;;  %v6482_v61 = vld [vmem:[#allocation5 + $0x478] sm:$0xf0] }
 0x20d   :  { %3526 = vmatpush.bf16.msra.mxu3 %v6677_v30  ;;  %v7633_v56 = vor.u32 %v9285_v47, %v7632_v45  ;;  %v7600_v57 = vld [vmem:[#allocation5 + $0xd18] sm:$0xf]  ;;  %3501 = vmatpush.bf16.msra.mxu1 %v6133_v43  ;;  %v3262_v30 = vpop.f32.mrf.mxu2  ;;  %v9001_v43 = vld [vmem:[#allocation5 + $0x49c] sm:$0xf] }
 0x20e   :  { %v9277_v60 = vld [vmem:[#allocation5 + $0xd34] sm:$0xf0]  ;;  %v3263_v15 = vadd.f32 %v3262_v30, %v3250_v25  ;;  %v8857_v5 = vld [vmem:[#allocation5 + $0x1c] sm:$0xf] }
 0x20f   :  { %3488 = vmatpush.bf16.msra.mxu0 %v7665_v36  ;;  %3514 = vmatpush.bf16.msra.mxu2 %v6389_v44  ;;  %v7601_v38 = vor.u32 %v9277_v60, %v7600_v57  ;;  %v7568_v11 = vld [vmem:[#allocation5 + $0xcd8] sm:$0xf]  ;;  %v3275_v36 = vpop.f32.mrf.mxu3  ;;  %v6514_v44 = vld [vmem:[#allocation5 + $0x4b8] sm:$0xf0]  ;;  %v3238_v49 = vpop.f32.mrf.mxu0 }
 0x210   :  { %v9269_v13 = vld [vmem:[#allocation5 + $0xcf4] sm:$0xf0]  ;;  %v9982_v47 = vadd.f32 %v3275_v36, %v3263_v15  ;;  %v5970_v57 = vld [vmem:[#allocation5 + $0x78] sm:$0xf0] }
 0x211   :  { %3527 = vmatpush.bf16.msra.mxu3 %v6645_v50  ;;  %3502 = vmatpush.bf16.msra.mxu1 %v6101_v58  ;;  %v7569_v26 = vor.u32 %v9269_v13, %v7568_v11  ;;  %v7536_v28 = vld [vmem:[#allocation5 + $0xc98] sm:$0xf]  ;;  %v6005_v50 = vor.u32 %v8873_v29, %v6002_v31  ;;  %v8929_v58 = vld [vmem:[#allocation5 + $0x25c] sm:$0xf]  ;;  %v5973_v3 = vor.u32 %v8865_v54, %v5970_v57 }
 0x212   :  { %v9261_v46 = vld [vmem:[#allocation5 + $0xcb4] sm:$0xf0]  ;;  %v8993_v60 = vld [vmem:[#allocation5 + $0x45c] sm:$0xf] }
 0x213   :  { %3489 = vmatpush.bf16.msra.mxu0 %v7633_v56  ;;  %3515 = vmatpush.bf16.msra.mxu2 %v6357_v59  ;;  %v7537_v45 = vor.u32 %v9261_v46, %v7536_v28  ;;  %v7504_v52 = vld [vmem:[#allocation5 + $0xc58] sm:$0xf]  ;;  %v6517_v56 = vor.u32 %v9001_v43, %v6514_v44  ;;  %v6226_v59 = vld [vmem:[#allocation5 + $0x278] sm:$0xf0] }
 0x214   :  { %v9253_v53 = vld [vmem:[#allocation5 + $0xc74] sm:$0xf0]  ;;  %v6229_v4 = vor.u32 %v8929_v58, %v6226_v59  ;;  %v5938_v6 = vld [vmem:[#allocation5 + $0x38] sm:$0xf0] }
 0x215   :  { %3528 = vmatpush.bf16.msra.mxu3 %v6613_v0  ;;  %3503 = vmatpush.bf16.msra.mxu1 %v6069_v8  ;;  %v7505_v62 = vor.u32 %v9253_v53, %v7504_v52  ;;  %v7472_v0 = vld [vmem:[#allocation5 + $0xc18] sm:$0xf]  ;;  %v3264_v7 = vpop.f32.mrf.mxu2  ;;  %v6485_v8 = vor.u32 %v8993_v60, %v6482_v61  ;;  %v8985_v11 = vld [vmem:[#allocation5 + $0x41c] sm:$0xf]  ;;  %v5941_v24 = vor.u32 %v8857_v5, %v5938_v6 }
 0x216   :  { %v9245_v2 = vld [vmem:[#allocation5 + $0xc34] sm:$0xf0]  ;;  %v6450_v13 = vld [vmem:[#allocation5 + $0x438] sm:$0xf0] }
 0x217   :  { %3490 = vmatpush.bf16.msra.mxu0 %v7601_v38  ;;  %3516 = vmatpush.bf16.msra.mxu2 %v6325_v10  ;;  %v8921_v38 = vld [vmem:[#allocation5 + $0x21c] sm:$0xf]  ;;  %v3277_v14 = vpop.f32.mrf.mxu3  ;;  %v7473_v35 = vor.u32 %v9245_v2, %v7472_v0 }
 0x218   :  { %v6194_v10 = vld [vmem:[#allocation5 + $0x238] sm:$0xf0] }
 0x219   :  { %3529 = vmatpush.bf16.msra.mxu3 %v6581_v63  ;;  %3504 = vmatpush.bf16.msra.mxu1 %v6037_v48  ;;  %v9105_v16 = vld [vmem:[#allocation5 + $0x7dc] sm:$0xf]  ;;  %v6197_v25 = vor.u32 %v8921_v38, %v6194_v10  ;;  %v3301_v10 = vpop.f32.mrf.mxu1 }
 0x21a   :  { %v6930_v42 = vld [vmem:[#allocation5 + $0x7f8] sm:$0xf0] }
 0x21b   :  { %3491 = vmatpush.bf16.msra.mxu0 %v7569_v26  ;;  %3517 = vmatpush.bf16.msra.mxu2 %v6293_v27  ;;  %v9169_v63 = vld [vmem:[#allocation5 + $0x9dc] sm:$0xf]  ;;  %v6453_v27 = vor.u32 %v8985_v11, %v6450_v13  ;;  %v6933_v28 = vor.u32 %v9105_v16, %v6930_v42 }
 0x21c   :  { %v7186_v17 = vld [vmem:[#allocation5 + $0x9f8] sm:$0xf0] }
 0x21d   :  { %3530 = vmatpush.bf16.msra.mxu3 %v6549_v12  ;;  %3505 = vmatpush.bf16.msra.mxu1 %v6005_v50  ;;  %v9233_v21 = vld [vmem:[#allocation5 + $0xbdc] sm:$0xf]  ;;  %v7189_v46 = vor.u32 %v9169_v63, %v7186_v17 }
 0x21e   :  { %v7442_v23 = vld [vmem:[#allocation5 + $0xbf8] sm:$0xf0] }
 0x21f   :  { %3492 = vmatpush.bf16.msra.mxu0 %v7537_v45  ;;  %3518 = vmatpush.bf16.msra.mxu2 %v6261_v51  ;;  %v9297_v26 = vld [vmem:[#allocation5 + $0xddc] sm:$0xf]  ;;  %v7445_v29 = vor.u32 %v9233_v21, %v7442_v23 }
 0x220   :  { %v7698_v48 = vld [vmem:[#allocation5 + $0xdf8] sm:$0xf0] }
 0x221   :  { %3531 = vmatpush.bf16.msra.mxu3 %v6517_v56  ;;  %3506 = vmatpush.bf16.msra.mxu1 %v5973_v3  ;;  %v9097_v30 = vld [vmem:[#allocation5 + $0x79c] sm:$0xf]  ;;  %v7701_v32 = vor.u32 %v9297_v26, %v7698_v48 }
 0x222   :  { %v6898_v12 = vld [vmem:[#allocation5 + $0x7b8] sm:$0xf0] }
 0x223   :  { %3493 = vmatpush.bf16.msra.mxu0 %v7505_v62  ;;  %3519 = vmatpush.bf16.msra.mxu2 %v6229_v4  ;;  %v9161_v31 = vld [vmem:[#allocation5 + $0x99c] sm:$0xf]  ;;  %v6901_v45 = vor.u32 %v9097_v30, %v6898_v12  ;;  %v3314_v30 = vpop.f32.mrf.mxu2 }
 0x224   :  { %v7154_v33 = vld [vmem:[#allocation5 + $0x9b8] sm:$0xf0] }
 0x225   :  { %3532 = vmatpush.bf16.msra.mxu3 %v6485_v8  ;;  %v9225_v15 = vld [vmem:[#allocation5 + $0xb9c] sm:$0xf]  ;;  %3507 = vmatpush.bf16.msra.mxu1 %v5941_v24  ;;  %v7157_v49 = vor.u32 %v9161_v31, %v7154_v33  ;;  %v3288_v8 = vpop.f32.mrf.mxu0 }
 0x226   :  { %v7410_v36 = vld [vmem:[#allocation5 + $0xbb8] sm:$0xf0]  ;;  %v3289_v42 = vadd.f32 %v3288_v8, %v9982_v47 }
 0x227   :  { %3494 = vmatpush.bf16.msra.mxu0 %v7473_v35  ;;  %3520 = vmatpush.bf16.msra.mxu2 %v6197_v25  ;;  %v9289_v43 = vld [vmem:[#allocation5 + $0xd9c] sm:$0xf]  ;;  %v7413_v50 = vor.u32 %v9225_v15, %v7410_v36 }
 0x228   :  { %v7666_v44 = vld [vmem:[#allocation5 + $0xdb8] sm:$0xf0]  ;;  %3508 = vmatmul.bf16.vlgmr.msra.gmra.mxu1 %v9887_v19  ;;  %v3302_v25 = vadd.f32 %v3301_v10, %v3289_v42  ;;  %v7816_v10 = vld [vmem:[#allocation8 + $0xe0] sm:$0xf] }
 0x229   :  { %3533 = vmatpush.bf16.msra.mxu3 %v6453_v27  ;;  %3552 = vmatpush.bf16.msrb.mxu1 %v7189_v46  ;;  %v9089_v51 = vld [vmem:[#allocation5 + $0x75c] sm:$0xf]  ;;  %v7669_v54 = vor.u32 %v9289_v43, %v7666_v44  ;;  %v9991_v43 = vpop.f32.mrf.mxu3  ;;  %v8072_v42 = vld [vmem:[#allocation8 + $0x2e0] sm:$0xf] }
 0x22a   :  { %v6866_v52 = vld [vmem:[#allocation5 + $0x778] sm:$0xf0]  ;;  %3495 = vmatmul.bf16.vlgmr.msra.gmra.mxu0 %v9897_v37  ;;  %3521 = vmatmul.bf16.vlgmr.msra.gmra.mxu2 %v9891_v22  ;;  %v9989_v33 = vadd.f32 %v3314_v30, %v3302_v25  ;;  %v9360_v30 = vld [vmem:[#allocation8 + $0x1cc] sm:$0xf0] }
 0x22b   :  { %3539 = vmatpush.bf16.msrb.mxu0 %v6933_v28  ;;  %3565 = vmatpush.bf16.msrb.mxu2 %v7445_v29  ;;  %v9153_v53 = vld [vmem:[#allocation5 + $0x95c] sm:$0xf]  ;;  %v6869_v60 = vor.u32 %v9089_v51, %v6866_v52 }
 0x22c   :  { %v7122_v55 = vld [vmem:[#allocation5 + $0x978] sm:$0xf0]  ;;  %3534 = vmatmul.bf16.vlgmr.msra.gmra.mxu3 %v9885_v18 }
 0x22d   :  { %3578 = vmatpush.bf16.msrb.mxu3 %v7701_v32  ;;  %v9217_v56 = vld [vmem:[#allocation5 + $0xb5c] sm:$0xf]  ;;  %3553 = vmatpush.bf16.msrb.mxu1 %v7157_v49  ;;  %v7125_v61 = vor.u32 %v9153_v53, %v7122_v55  ;;  %v3303_v49 = vpop.f32.mrf.mxu1 }
 0x22e   :  { %v7378_v57 = vld [vmem:[#allocation5 + $0xb78] sm:$0xf0]  ;;  %v9324_v49 = vld [vmem:[#allocation8 + $0xac] sm:$0xf0] }
 0x22f   :  { %v9281_v58 = vld [vmem:[#allocation5 + $0xd5c] sm:$0xf]  ;;  %3540 = vmatpush.bf16.msrb.mxu0 %v6901_v45  ;;  %3566 = vmatpush.bf16.msrb.mxu2 %v7413_v50  ;;  %v7381_v62 = vor.u32 %v9217_v56, %v7378_v57  ;;  %v3290_v45 = vpop.f32.mrf.mxu0 }
 0x230   :  { %v7634_v59 = vld [vmem:[#allocation5 + $0xd78] sm:$0xf0]  ;;  %v7784_v45 = vld [vmem:[#allocation8 + $0xa0] sm:$0xf] }
 0x231   :  { %v9081_v0 = vld [vmem:[#allocation5 + $0x71c] sm:$0xf]  ;;  %3579 = vmatpush.bf16.msrb.mxu3 %v7669_v54  ;;  %v7637_v4 = vor.u32 %v9281_v58, %v7634_v59  ;;  %3554 = vmatpush.bf16.msrb.mxu1 %v7125_v61 }
 0x232   :  { %v6834_v2 = vld [vmem:[#allocation5 + $0x738] sm:$0xf0] }
 0x233   :  { %v9145_v3 = vld [vmem:[#allocation5 + $0x91c] sm:$0xf]  ;;  %3541 = vmatpush.bf16.msrb.mxu0 %v6869_v60  ;;  %v6837_v18 = vor.u32 %v9081_v0, %v6834_v2  ;;  %3567 = vmatpush.bf16.msrb.mxu2 %v7381_v62 }
 0x234   :  { %v7090_v5 = vld [vmem:[#allocation5 + $0x938] sm:$0xf0] }
 0x235   :  { %v9209_v6 = vld [vmem:[#allocation5 + $0xb1c] sm:$0xf]  ;;  %v7093_v19 = vor.u32 %v9145_v3, %v7090_v5  ;;  %3580 = vmatpush.bf16.msrb.mxu3 %v7637_v4 }
 0x236   :  { %v7346_v22 = vld [vmem:[#allocation5 + $0xb38] sm:$0xf0] }
 0x237   :  { %v9273_v38 = vld [vmem:[#allocation5 + $0xd1c] sm:$0xf]  ;;  %v7349_v11 = vor.u32 %v9209_v6, %v7346_v22  ;;  %3542 = vmatpush.bf16.msrb.mxu0 %v6837_v18  ;;  %3555 = vmatpush.bf16.msrb.mxu1 %v7093_v19  ;;  %v3316_v22 = vpop.f32.mrf.mxu2  ;;  %v9332_v19 = vld [vmem:[#allocation8 + $0xec] sm:$0xf0] }
 0x238   :  { %v7602_v7 = vld [vmem:[#allocation5 + $0xd38] sm:$0xf0]  ;;  %v7817_v25 = vor.u32 %v9332_v19, %v7816_v10  ;;  %v7752_v22 = vld [vmem:[#allocation8 + $0x60] sm:$0xf]  ;;  %v9348_v10 = vld [vmem:[#allocation8 + $0x16c] sm:$0xf0] }
 0x239   :  { %v9073_v13 = vld [vmem:[#allocation5 + $0x6dc] sm:$0xf]  ;;  %v7605_v63 = vor.u32 %v9273_v38, %v7602_v7  ;;  %3568 = vmatpush.bf16.msrb.mxu2 %v7349_v11  ;;  %v7944_v11 = vld [vmem:[#allocation8 + $0x1e0] sm:$0xf] }
 0x23a   :  { %v6802_v14 = vld [vmem:[#allocation5 + $0x6f8] sm:$0xf0]  ;;  %v8008_v19 = vld [vmem:[#allocation8 + $0x260] sm:$0xf] }
 0x23b   :  { %v9137_v16 = vld [vmem:[#allocation5 + $0x8dc] sm:$0xf]  ;;  %v6805_v26 = vor.u32 %v9073_v13, %v6802_v14  ;;  %3581 = vmatpush.bf16.msrb.mxu3 %v7605_v63  ;;  %v3329_v13 = vpop.f32.mrf.mxu3  ;;  %v9396_v63 = vld [vmem:[#allocation8 + $0x2ec] sm:$0xf0] }
 0x23c   :  { %v7058_v35 = vld [vmem:[#allocation5 + $0x8f8] sm:$0xf0]  ;;  %v8136_v13 = vld [vmem:[#allocation8 + $0x360] sm:$0xf] }
 0x23d   :  { %v9201_v17 = vld [vmem:[#allocation5 + $0xadc] sm:$0xf]  ;;  %v7061_v48 = vor.u32 %v9137_v16, %v7058_v35  ;;  %3543 = vmatpush.bf16.msrb.mxu0 %v6805_v26  ;;  %v9364_v16 = vld [vmem:[#allocation8 + $0x1ec] sm:$0xf0] }
 0x23e   :  { %v7314_v21 = vld [vmem:[#allocation5 + $0xaf8] sm:$0xf0]  ;;  %v7945_v26 = vor.u32 %v9364_v16, %v7944_v11  ;;  %v9380_v11 = vld [vmem:[#allocation8 + $0x26c] sm:$0xf0] }
 0x23f   :  { %v9265_v23 = vld [vmem:[#allocation5 + $0xcdc] sm:$0xf]  ;;  %v7317_v27 = vor.u32 %v9201_v17, %v7314_v21  ;;  %3556 = vmatpush.bf16.msrb.mxu1 %v7061_v48  ;;  %v8200_v21 = vld [vmem:[#allocation8 + $0x3e0] sm:$0xf]  ;;  %v8073_v48 = vor.u32 %v9396_v63, %v8072_v42  ;;  %v8009_v63 = vor.u32 %v9380_v11, %v8008_v19  ;;  %v10008_v19 = vld [vmem:[#allocation7] sm:$0xff] }
 0x240   :  { %v7570_v24 = vld [vmem:[#allocation5 + $0xcf8] sm:$0xf0]  ;;  %v587_v11 = vperm.slane %v10008_v19, 5 }
 0x241   :  { %v9065_v28 = vld [vmem:[#allocation5 + $0x69c] sm:$0xf]  ;;  %v7573_v47 = vor.u32 %v9265_v23, %v7570_v24  ;;  %3569 = vmatpush.bf16.msrb.mxu2 %v7317_v27  ;;  %v9428_v23 = vld [vmem:[#allocation8 + $0x3ec] sm:$0xf0]  ;;  %v7800_v27 = vld [vmem:[#allocation8 + $0xc0] sm:$0xf] }
 0x242   :  { %v6770_v46 = vld [vmem:[#allocation5 + $0x6b8] sm:$0xf0] }
 0x243   :  { %v9129_v29 = vld [vmem:[#allocation5 + $0x89c] sm:$0xf]  ;;  %v6773_v44 = vor.u32 %v9065_v28, %v6770_v46  ;;  %3582 = vmatpush.bf16.msrb.mxu3 %v7573_v47  ;;  %v9328_v28 = vld [vmem:[#allocation8 + $0xcc] sm:$0xf0]  ;;  %v7928_v46 = vld [vmem:[#allocation8 + $0x1c0] sm:$0xf] }
 0x244   :  { %v7026_v12 = vld [vmem:[#allocation5 + $0x8b8] sm:$0xf0]  ;;  %v8056_v47 = vld [vmem:[#allocation8 + $0x2c0] sm:$0xf] }
 0x245   :  { %v9193_v31 = vld [vmem:[#allocation5 + $0xa9c] sm:$0xf]  ;;  %v7029_v50 = vor.u32 %v9129_v29, %v7026_v12  ;;  %3544 = vmatpush.bf16.msrb.mxu0 %v6773_v44  ;;  %v8201_v29 = vor.u32 %v9428_v23, %v8200_v21  ;;  %v9392_v12 = vld [vmem:[#allocation8 + $0x2cc] sm:$0xf0]  ;;  %v7864_v21 = vld [vmem:[#allocation8 + $0x140] sm:$0xf]  ;;  %v10001_v23 = vpop.f32.mrf.mxu2 }
 0x246   :  { %v7282_v32 = vld [vmem:[#allocation5 + $0xab8] sm:$0xf0]  ;;  %v8057_v44 = vor.u32 %v9392_v12, %v8056_v47 }
 0x247   :  { %v9257_v15 = vld [vmem:[#allocation5 + $0xc9c] sm:$0xf]  ;;  %v7285_v51 = vor.u32 %v9193_v31, %v7282_v32  ;;  %3557 = vmatpush.bf16.msrb.mxu1 %v7029_v50  ;;  %v8184_v31 = vld [vmem:[#allocation8 + $0x3c0] sm:$0xf]  ;;  %v9424_v32 = vld [vmem:[#allocation8 + $0x3cc] sm:$0xf0] }
 0x248   :  { %v7538_v36 = vld [vmem:[#allocation5 + $0xcb8] sm:$0xf0]  ;;  %v7912_v50 = vld [vmem:[#allocation8 + $0x1a0] sm:$0xf] }
 0x249   :  { %v9057_v52 = vld [vmem:[#allocation5 + $0x65c] sm:$0xf]  ;;  %v7541_v55 = vor.u32 %v9257_v15, %v7538_v36  ;;  %3570 = vmatpush.bf16.msrb.mxu2 %v7285_v51  ;;  %v7801_v15 = vor.u32 %v9328_v28, %v7800_v27  ;;  %v7929_v36 = vor.u32 %v9360_v30, %v7928_v46  ;;  %v8185_v51 = vor.u32 %v9424_v32, %v8184_v31  ;;  %v10003_v27 = vpop.f32.mrf.mxu3  ;;  %v8120_v28 = vld [vmem:[#allocation8 + $0x340] sm:$0xf]  ;;  %v9408_v46 = vld [vmem:[#allocation8 + $0x34c] sm:$0xf0] }
 0x24a   :  { %v6738_v53 = vld [vmem:[#allocation5 + $0x678] sm:$0xf0]  ;;  %v7720_v31 = vld [vmem:[#allocation8 + $0x20] sm:$0xf]  ;;  %v9308_v32 = vld [vmem:[#allocation8 + $0x2c] sm:$0xf0] }
 0x24b   :  { %v9121_v54 = vld [vmem:[#allocation5 + $0x85c] sm:$0xf]  ;;  %v6741_v61 = vor.u32 %v9057_v52, %v6738_v53  ;;  %3583 = vmatpush.bf16.msrb.mxu3 %v7541_v55  ;;  %v9356_v52 = vld [vmem:[#allocation8 + $0x1ac] sm:$0xf0]  ;;  %v8040_v53 = vld [vmem:[#allocation8 + $0x2a0] sm:$0xf] }
 0x24c   :  { %v6994_v56 = vld [vmem:[#allocation5 + $0x878] sm:$0xf0]  ;;  %v8168_v55 = vld [vmem:[#allocation8 + $0x3a0] sm:$0xf] }
 0x24d   :  { %v9185_v57 = vld [vmem:[#allocation5 + $0xa5c] sm:$0xf]  ;;  %v6997_v2 = vor.u32 %v9121_v54, %v6994_v56  ;;  %3545 = vmatpush.bf16.msrb.mxu0 %v6741_v61  ;;  %v9388_v54 = vld [vmem:[#allocation8 + $0x2ac] sm:$0xf0]  ;;  %v7896_v61 = vld [vmem:[#allocation8 + $0x180] sm:$0xf] }
 0x24e   :  { %v7250_v58 = vld [vmem:[#allocation5 + $0xa78] sm:$0xf0]  ;;  %v9420_v56 = vld [vmem:[#allocation8 + $0x3ac] sm:$0xf0] }
 0x24f   :  { %v9249_v59 = vld [vmem:[#allocation5 + $0xc5c] sm:$0xf]  ;;  %v7253_v3 = vor.u32 %v9185_v57, %v7250_v58  ;;  %3558 = vmatpush.bf16.msrb.mxu1 %v6997_v2  ;;  %v7785_v57 = vor.u32 %v9324_v49, %v7784_v45  ;;  %v7913_v58 = vor.u32 %v9356_v52, %v7912_v50  ;;  %v8024_v2 = vld [vmem:[#allocation8 + $0x280] sm:$0xf]  ;;  %v9340_v45 = vld [vmem:[#allocation8 + $0x12c] sm:$0xf0] }
 0x250   :  { %v7506_v60 = vld [vmem:[#allocation5 + $0xc78] sm:$0xf0]  ;;  %v7976_v49 = vld [vmem:[#allocation8 + $0x220] sm:$0xf]  ;;  %v9372_v50 = vld [vmem:[#allocation8 + $0x22c] sm:$0xf0] }
 0x251   :  { %v9049_v62 = vld [vmem:[#allocation5 + $0x61c] sm:$0xf]  ;;  %v7509_v38 = vor.u32 %v9249_v59, %v7506_v60  ;;  %3571 = vmatpush.bf16.msrb.mxu2 %v7253_v3  ;;  %v8041_v59 = vor.u32 %v9388_v54, %v8040_v53  ;;  %v7768_v60 = vld [vmem:[#allocation8 + $0x80] sm:$0xf]  ;;  %v9404_v52 = vld [vmem:[#allocation8 + $0x32c] sm:$0xf0]  ;;  %v7721_v53 = vor.u32 %v9308_v32, %v7720_v31 }
 0x252   :  { %v6706_v0 = vld [vmem:[#allocation5 + $0x638] sm:$0xf0]  ;;  %v8152_v3 = vld [vmem:[#allocation8 + $0x380] sm:$0xf]  ;;  %v9484_v32 = vld [vmem:[#allocation8 + $0x5ac] sm:$0xf0] }
 0x253   :  { %v9113_v4 = vld [vmem:[#allocation5 + $0x81c] sm:$0xf]  ;;  %v6709_v14 = vor.u32 %v9049_v62, %v6706_v0  ;;  %3584 = vmatpush.bf16.msrb.mxu3 %v7509_v38  ;;  %v8169_v62 = vor.u32 %v9420_v56, %v8168_v55  ;;  %v9352_v0 = vld [vmem:[#allocation8 + $0x18c] sm:$0xf0]  ;;  %v7704_v54 = vld [vmem:[#allocation8] sm:$0xf]  ;;  %v7977_v56 = vor.u32 %v9372_v50, %v7976_v49 }
 0x254   :  { %v6962_v5 = vld [vmem:[#allocation5 + $0x838] sm:$0xf0]  ;;  %v9316_v38 = vld [vmem:[#allocation8 + $0x6c] sm:$0xf0]  ;;  %v8424_v31 = vld [vmem:[#allocation8 + $0x5a0] sm:$0xf] }
 0x255   :  { %v9177_v6 = vld [vmem:[#allocation5 + $0xa1c] sm:$0xf]  ;;  %v6965_v35 = vor.u32 %v9113_v4, %v6962_v5  ;;  %3546 = vmatpush.bf16.msrb.mxu0 %v6709_v14  ;;  %v9997_v5 = vpop.f32.mrf.mxu0  ;;  %v9412_v14 = vld [vmem:[#allocation8 + $0x36c] sm:$0xf0]  ;;  %v7753_v16 = vor.u32 %v9316_v38, %v7752_v22  ;;  %v3591_v22 = vmax.f32 %v9929_v34, 0.0  ;;  %v3592_v38 = vmax.f32 %v9946_v9, 0.0 }
 0x256   :  { %v7218_v7 = vld [vmem:[#allocation5 + $0xa38] sm:$0xf0]  ;;  %v9456_v9 = vld [vmem:[#allocation8 + $0x4cc] sm:$0xf0]  ;;  %v8425_v49 = vor.u32 %v9484_v32, %v8424_v31  ;;  %v8280_v50 = vld [vmem:[#allocation8 + $0x480] sm:$0xf] }
 0x257   :  { %v9241_v18 = vld [vmem:[#allocation5 + $0xc1c] sm:$0xf]  ;;  %v7221_v17 = vor.u32 %v9177_v6, %v7218_v7  ;;  %3559 = vmatpush.bf16.msrb.mxu1 %v6965_v35  ;;  %v7880_v7 = vld [vmem:[#allocation8 + $0x160] sm:$0xf]  ;;  %v9556_v31 = vld [vmem:[#allocation8 + $0x7ec] sm:$0xf0] }
 0x258   :  { %v7474_v8 = vld [vmem:[#allocation5 + $0xc38] sm:$0xf0]  ;;  %3547 = vmatmul.bf16.vlgmr.msrb.gmra.mxu0 %v9889_v20  ;;  %v9320_v20 = vld [vmem:[#allocation8 + $0x8c] sm:$0xf0]  ;;  %v7881_v42 = vor.u32 %v9348_v10, %v7880_v7  ;;  %v7736_v35 = vld [vmem:[#allocation8 + $0x40] sm:$0xf] }
 0x259   :  { %v7477_v24 = vor.u32 %v9241_v18, %v7474_v8  ;;  %3572 = vmatpush.bf16.msrb.mxu2 %v7221_v17  ;;  %5153 = vmatpush.bf16.msra.mxu0 %v7817_v25  ;;  %v7769_v4 = vor.u32 %v9320_v20, %v7768_v60  ;;  %v9999_v18 = vpop.f32.mrf.mxu1  ;;  %v9312_v17 = vld [vmem:[#allocation8 + $0x4c] sm:$0xf0]  ;;  %v3368_v60 = vpop.f32.mrf.mxu2  ;;  %v3593_v10 = vmax.f32 %v9966_v1, 0.0  ;;  %v10014_v1 = vpack.c.bf16 %v3592_v38, %v3592_v38 }
 0x25a   :  { %3560 = vmatmul.bf16.vlgmr.msrb.gmra.mxu1 %v9899_v40  ;;  %v9384_v40 = vld [vmem:[#allocation8 + $0x28c] sm:$0xf0] }
 0x25b   :  { %3585 = vmatpush.bf16.msrb.mxu3 %v7477_v24  ;;  %5166 = vmatpush.bf16.msra.mxu1 %v7945_v26  ;;  %v8025_v6 = vor.u32 %v9384_v40, %v8024_v2  ;;  %v8137_v24 = vor.u32 %v9412_v14, %v8136_v13  ;;  %v9344_v25 = vld [vmem:[#allocation8 + $0x14c] sm:$0xf0]  ;;  %v7992_v26 = vld [vmem:[#allocation8 + $0x240] sm:$0xf]  ;;  %v3381_v2 = vpop.f32.mrf.mxu3 }
 0x25c   :  { %3573 = vmatmul.bf16.vlgmr.msrb.gmra.mxu2 %v9901_v41  ;;  %v9416_v41 = vld [vmem:[#allocation8 + $0x38c] sm:$0xf0]  ;;  %v7865_v47 = vor.u32 %v9344_v25, %v7864_v21 }
 0x25d   :  { %5179 = vmatpush.bf16.msra.mxu2 %v8073_v48  ;;  %5154 = vmatpush.bf16.msra.mxu0 %v7801_v15  ;;  %v8153_v8 = vor.u32 %v9416_v41, %v8152_v3  ;;  %v9376_v48 = vld [vmem:[#allocation8 + $0x24c] sm:$0xf0]  ;;  %v3342_v30 = vpop.f32.mrf.mxu0  ;;  %v7848_v15 = vld [vmem:[#allocation8 + $0x120] sm:$0xf] }
 0x25e   :  { %3586 = vmatmul.bf16.vlgmr.msrb.gmra.mxu3 %v9897_v37  ;;  %v7897_v37 = vor.u32 %v9352_v0, %v7896_v61  ;;  %v7993_v12 = vor.u32 %v9376_v48, %v7992_v26  ;;  %v7849_v55 = vor.u32 %v9340_v45, %v7848_v15  ;;  %v7960_v61 = vld [vmem:[#allocation8 + $0x200] sm:$0xf]  ;;  %v9400_v40 = vld [vmem:[#allocation8 + $0x30c] sm:$0xf0]  ;;  %v10016_v26 = vpack.c.bf16 %v3593_v10, %v3593_v10 }
 0x25f   :  { %5192 = vmatpush.bf16.msra.mxu3 %v8201_v29  ;;  %5167 = vmatpush.bf16.msra.mxu1 %v7929_v36  ;;  %v7737_v29 = vor.u32 %v9312_v17, %v7736_v35  ;;  %v8088_v0 = vld [vmem:[#allocation8 + $0x300] sm:$0xf]  ;;  %v9460_v41 = vld [vmem:[#allocation8 + $0x4ec] sm:$0xf0]  ;;  %v3328_v48 = vadd.f32 %v9991_v43, %v587_v11 }
 0x260   :  { %v8328_v3 = vld [vmem:[#allocation8 + $0x4e0] sm:$0xf]  ;;  %v8089_v13 = vor.u32 %v9400_v40, %v8088_v0  ;;  %v9488_v21 = vld [vmem:[#allocation8 + $0x5cc] sm:$0xf0] }
 0x261   :  { %5180 = vmatpush.bf16.msra.mxu2 %v8057_v44  ;;  %5155 = vmatpush.bf16.msra.mxu0 %v7785_v57  ;;  %v3355_v36 = vpop.f32.mrf.mxu1  ;;  %v8121_v44 = vor.u32 %v9408_v46, %v8120_v28  ;;  %v9304_v57 = vld [vmem:[#allocation8 + $0xc] sm:$0xf0]  ;;  %v8329_v14 = vor.u32 %v9460_v41, %v8328_v3  ;;  %v8312_v35 = vld [vmem:[#allocation8 + $0x4c0] sm:$0xf]  ;;  %v3341_v15 = vadd.f32 %v9997_v5, %v3328_v48 }
 0x262   :  { %v8440_v17 = vld [vmem:[#allocation8 + $0x5c0] sm:$0xf]  ;;  %v9520_v46 = vld [vmem:[#allocation8 + $0x6cc] sm:$0xf0] }
 0x263   :  { %5193 = vmatpush.bf16.msra.mxu3 %v8185_v51  ;;  %5168 = vmatpush.bf16.msra.mxu1 %v7913_v58  ;;  %v8104_v51 = vld [vmem:[#allocation8 + $0x320] sm:$0xf]  ;;  %v8441_v30 = vor.u32 %v9488_v21, %v8440_v17  ;;  %v9516_v45 = vld [vmem:[#allocation8 + $0x6ac] sm:$0xf0]  ;;  %v10030_v10 = vpop.f32.mrf.mxu3 }
 0x264   :  { %v7832_v58 = vld [vmem:[#allocation8 + $0x100] sm:$0xf]  ;;  %v8105_v20 = vor.u32 %v9404_v52, %v8104_v51  ;;  %v9448_v51 = vld [vmem:[#allocation8 + $0x48c] sm:$0xf0] }
 0x265   :  { %5181 = vmatpush.bf16.msra.mxu2 %v8041_v59  ;;  %5156 = vmatpush.bf16.msra.mxu0 %v7769_v4  ;;  %v9336_v59 = vld [vmem:[#allocation8 + $0x10c] sm:$0xf0]  ;;  %v7705_v4 = vor.u32 %v9304_v57, %v7704_v54  ;;  %v8568_v28 = vld [vmem:[#allocation8 + $0x6c0] sm:$0xf]  ;;  %v3392_v54 = vpop.f32.mrf.mxu0  ;;  %v8281_v57 = vor.u32 %v9448_v51, %v8280_v50  ;;  %v9362_v50 = vld [vmem:[#allocation8 + $0x1e4] sm:$0xf] }
 0x266   :  { %v7833_v7 = vor.u32 %v9336_v59, %v7832_v58  ;;  %v8569_v43 = vor.u32 %v9520_v46, %v8568_v28  ;;  %v8408_v52 = vld [vmem:[#allocation8 + $0x580] sm:$0xf]  ;;  %v9512_v5 = vld [vmem:[#allocation8 + $0x68c] sm:$0xf0]  ;;  %v7946_v51 = vld [vmem:[#allocation8 + $0x1f0] sm:$0xf0] }
 0x267   :  { %5194 = vmatpush.bf16.msra.mxu3 %v8169_v62  ;;  %5169 = vmatpush.bf16.msra.mxu1 %v7897_v37  ;;  %v9368_v62 = vld [vmem:[#allocation8 + $0x20c] sm:$0xf0]  ;;  %v8456_v37 = vld [vmem:[#allocation8 + $0x5e0] sm:$0xf] }
 0x268   :  { %v8536_v59 = vld [vmem:[#allocation8 + $0x680] sm:$0xf]  ;;  %v9476_v0 = vld [vmem:[#allocation8 + $0x56c] sm:$0xf0] }
 0x269   :  { %5182 = vmatpush.bf16.msra.mxu2 %v8025_v6  ;;  %5157 = vmatpush.bf16.msra.mxu0 %v7753_v16  ;;  %v9492_v6 = vld [vmem:[#allocation8 + $0x5ec] sm:$0xf0]  ;;  %v8584_v16 = vld [vmem:[#allocation8 + $0x6e0] sm:$0xf]  ;;  %v3405_v58 = vpop.f32.mrf.mxu1  ;;  %v8537_v2 = vor.u32 %v9512_v5, %v8536_v59  ;;  %v8074_v5 = vld [vmem:[#allocation8 + $0x2f0] sm:$0xf0] }
 0x26a   :  { %v8457_v34 = vor.u32 %v9492_v6, %v8456_v37  ;;  %v8520_v41 = vld [vmem:[#allocation8 + $0x660] sm:$0xf]  ;;  %v9440_v6 = vld [vmem:[#allocation8 + $0x44c] sm:$0xf0] }
 0x26b   :  { %5195 = vmatpush.bf16.msra.mxu3 %v8153_v8  ;;  %5170 = vmatpush.bf16.msra.mxu1 %v7881_v42  ;;  %v7961_v8 = vor.u32 %v9368_v62, %v7960_v61  ;;  %v9524_v42 = vld [vmem:[#allocation8 + $0x6ec] sm:$0xf0]  ;;  %v8392_v62 = vld [vmem:[#allocation8 + $0x560] sm:$0xf] }
 0x26c   :  { %v8585_v25 = vor.u32 %v9524_v42, %v8584_v16  ;;  %v9444_v61 = vld [vmem:[#allocation8 + $0x46c] sm:$0xf0]  ;;  %v8248_v37 = vld [vmem:[#allocation8 + $0x440] sm:$0xf] }
 0x26d   :  { %5183 = vmatpush.bf16.msra.mxu2 %v8009_v63  ;;  %5158 = vmatpush.bf16.msra.mxu0 %v7737_v29  ;;  %v3594_v63 = vmax.f32 %v9975_v39, 0.0  ;;  %v8313_v39 = vor.u32 %v9456_v9, %v8312_v35  ;;  %v9472_v38 = vld [vmem:[#allocation8 + $0x54c] sm:$0xf0]  ;;  %v3394_v11 = vpop.f32.mrf.mxu0  ;;  %v8360_v17 = vld [vmem:[#allocation8 + $0x520] sm:$0xf] }
 0x26e   :  { %v9504_v16 = vld [vmem:[#allocation8 + $0x64c] sm:$0xf0]  ;;  %v8488_v46 = vld [vmem:[#allocation8 + $0x620] sm:$0xf] }
 0x26f   :  { %5196 = vmatpush.bf16.msra.mxu3 %v8137_v24  ;;  %5171 = vmatpush.bf16.msra.mxu1 %v7865_v47  ;;  %v10012_v24 = vpack.c.bf16 %v3591_v22, %v3591_v22  ;;  %v10019_v29 = vpack.c.bf16 %v3594_v63, %v3594_v63  ;;  %v8296_v47 = vld [vmem:[#allocation8 + $0x4a0] sm:$0xf]  ;;  %v9436_v35 = vld [vmem:[#allocation8 + $0x42c] sm:$0xf0] }
 0x270   :  { %v8376_v22 = vld [vmem:[#allocation8 + $0x540] sm:$0xf]  ;;  %v9468_v21 = vld [vmem:[#allocation8 + $0x52c] sm:$0xf0] }
 0x271   :  { %5184 = vmatpush.bf16.msra.mxu2 %v7993_v12  ;;  %5159 = vmatpush.bf16.msra.mxu0 %v7721_v53  ;;  %v9452_v12 = vld [vmem:[#allocation8 + $0x4ac] sm:$0xf0]  ;;  %v3407_v42 = vpop.f32.mrf.mxu1  ;;  %v8377_v63 = vor.u32 %v9472_v38, %v8376_v22  ;;  %v8058_v22 = vld [vmem:[#allocation8 + $0x2d0] sm:$0xf0]  ;;  %v8680_v38 = vld [vmem:[#allocation8 + $0x7a0] sm:$0xf] }
 0x272   :  { %v8297_v36 = vor.u32 %v9452_v12, %v8296_v47  ;;  %v9480_v53 = vld [vmem:[#allocation8 + $0x58c] sm:$0xf0]  ;;  %v8344_v47 = vld [vmem:[#allocation8 + $0x500] sm:$0xf]  ;;  %v9354_v42 = vld [vmem:[#allocation8 + $0x1a4] sm:$0xf] }
 0x273   :  { %5197 = vmatpush.bf16.msra.mxu3 %v8121_v44  ;;  %5172 = vmatpush.bf16.msra.mxu1 %v7849_v55  ;;  %v8552_v44 = vld [vmem:[#allocation8 + $0x6a0] sm:$0xf]  ;;  %v8409_v60 = vor.u32 %v9480_v53, %v8408_v52  ;;  %v9432_v28 = vld [vmem:[#allocation8 + $0x40c] sm:$0xf0]  ;;  %v3433_v53 = vpop.f32.mrf.mxu3 }
 0x274   :  { %v8553_v55 = vor.u32 %v9516_v45, %v8552_v44  ;;  %v8712_v12 = vld [vmem:[#allocation8 + $0x7e0] sm:$0xf] }
 0x275   :  { %5185 = vmatpush.bf16.msra.mxu2 %v7977_v56  ;;  %5160 = vmatpush.bf16.msra.mxu0 %v7705_v4  ;;  %v3354_v56 = vadd.f32 %v9999_v18, %v3341_v15  ;;  %v9508_v4 = vld [vmem:[#allocation8 + $0x66c] sm:$0xf0]  ;;  %v8393_v18 = vor.u32 %v9476_v0, %v8392_v62  ;;  %v9330_v15 = vld [vmem:[#allocation8 + $0xe4] sm:$0xf]  ;;  %v8713_v45 = vor.u32 %v9556_v31, %v8712_v12  ;;  %v7802_v0 = vld [vmem:[#allocation8 + $0xd0] sm:$0xf0] }
 0x276   :  { %v7949_v62 = vor.u32 %v9362_v50, %v7946_v51  ;;  %v9382_v12 = vld [vmem:[#allocation8 + $0x284] sm:$0xf] }
 0x277   :  { %5198 = vmatpush.bf16.msra.mxu3 %v8105_v20  ;;  %5173 = vmatpush.bf16.msra.mxu1 %v7833_v7  ;;  %v8264_v20 = vld [vmem:[#allocation8 + $0x460] sm:$0xf]  ;;  %v3367_v40 = vadd.f32 %v10001_v23, %v3354_v56  ;;  %v10028_v7 = vpop.f32.mrf.mxu2  ;;  %v8249_v23 = vor.u32 %v9440_v6, %v8248_v37  ;;  %v9496_v56 = vld [vmem:[#allocation8 + $0x60c] sm:$0xf0]  ;;  %v9346_v51 = vld [vmem:[#allocation8 + $0x164] sm:$0xf] }
 0x278   :  { %5161 = vmatmul.bf16.vlgmr.msra.gmra.mxu0 %v10012_v24  ;;  %v8265_v3 = vor.u32 %v9444_v61, %v8264_v20  ;;  %v9552_v20 = vld [vmem:[#allocation8 + $0x7cc] sm:$0xf0] }
 0x279   :  { %5186 = vmatpush.bf16.msra.mxu2 %v7961_v8  ;;  %5205 = vmatpush.bf16.msrb.mxu0 %v8329_v14  ;;  %v8521_v8 = vor.u32 %v9508_v4, %v8520_v41  ;;  %v8504_v14 = vld [vmem:[#allocation8 + $0x640] sm:$0xf] }
 0x27a   :  { %5174 = vmatmul.bf16.vlgmr.msra.gmra.mxu1 %v10014_v1  ;;  %v8505_v48 = vor.u32 %v9504_v16, %v8504_v14  ;;  %v7786_v14 = vld [vmem:[#allocation8 + $0xb0] sm:$0xf0] }
 0x27b   :  { %5199 = vmatpush.bf16.msra.mxu3 %v8089_v13  ;;  %5218 = vmatpush.bf16.msrb.mxu1 %v8457_v34  ;;  %v3380_v13 = vadd.f32 %v10003_v27, %v3367_v40  ;;  %v8232_v34 = vld [vmem:[#allocation8 + $0x420] sm:$0xf]  ;;  %v9500_v27 = vld [vmem:[#allocation8 + $0x62c] sm:$0xf0]  ;;  %v9358_v40 = vld [vmem:[#allocation8 + $0x1c4] sm:$0xf] }
 0x27c   :  { %5187 = vmatmul.bf16.vlgmr.msra.gmra.mxu2 %v10016_v26  ;;  %v8489_v52 = vor.u32 %v9500_v27, %v8488_v46  ;;  %v9350_v27 = vld [vmem:[#allocation8 + $0x184] sm:$0xf] }
 0x27d   :  { %5231 = vmatpush.bf16.msrb.mxu2 %v8585_v25  ;;  %5206 = vmatpush.bf16.msrb.mxu0 %v8313_v39  ;;  %v3393_v9 = vadd.f32 %v3392_v54, %v3380_v13  ;;  %v8216_v25 = vld [vmem:[#allocation8 + $0x400] sm:$0xf]  ;;  %v8233_v39 = vor.u32 %v9436_v35, %v8232_v34  ;;  %v9386_v35 = vld [vmem:[#allocation8 + $0x2a4] sm:$0xf] }
 0x27e   :  { %5200 = vmatmul.bf16.vlgmr.msra.gmra.mxu3 %v10019_v29  ;;  %v8217_v54 = vor.u32 %v9432_v28, %v8216_v25  ;;  %v9544_v25 = vld [vmem:[#allocation8 + $0x78c] sm:$0xf0]  ;;  %v7770_v28 = vld [vmem:[#allocation8 + $0x90] sm:$0xf0] }
 0x27f   :  { %5219 = vmatpush.bf16.msrb.mxu1 %v8441_v30  ;;  %v8361_v30 = vor.u32 %v9468_v21, %v8360_v17  ;;  %v3406_v32 = vadd.f32 %v3405_v58, %v3393_v9  ;;  %v3420_v44 = vpop.f32.mrf.mxu2  ;;  %5244 = vmatpush.bf16.msrb.mxu3 %v8713_v45  ;;  %v8042_v17 = vld [vmem:[#allocation8 + $0x2b0] sm:$0xf0]  ;;  %v8664_v21 = vld [vmem:[#allocation8 + $0x780] sm:$0xf] }
 0x280   :  { %v8665_v46 = vor.u32 %v9544_v25, %v8664_v21  ;;  %v9314_v44 = vld [vmem:[#allocation8 + $0x64] sm:$0xf]  ;;  %v7754_v45 = vld [vmem:[#allocation8 + $0x70] sm:$0xf0] }
 0x281   :  { %5232 = vmatpush.bf16.msrb.mxu2 %v8569_v43  ;;  %5207 = vmatpush.bf16.msrb.mxu0 %v8297_v36  ;;  %v9464_v43 = vld [vmem:[#allocation8 + $0x50c] sm:$0xf0]  ;;  %v7818_v36 = vld [vmem:[#allocation8 + $0xf0] sm:$0xf0]  ;;  %v3596_v61 = vmax.f32 %v3406_v32, 0.0 }
 0x282   :  { %v8345_v58 = vor.u32 %v9464_v43, %v8344_v47  ;;  %v7821_v59 = vor.u32 %v9330_v15, %v7818_v36  ;;  %v8045_v47 = vor.u32 %v9386_v35, %v8042_v17  ;;  %v8026_v32 = vld [vmem:[#allocation8 + $0x290] sm:$0xf0]  ;;  %v8648_v43 = vld [vmem:[#allocation8 + $0x760] sm:$0xf]  ;;  %v9540_v15 = vld [vmem:[#allocation8 + $0x76c] sm:$0xf0] }
 0x283   :  { %5220 = vmatpush.bf16.msrb.mxu1 %v8425_v49  ;;  %v3595_v49 = vmax.f32 %v9989_v33, 0.0  ;;  %v9326_v33 = vld [vmem:[#allocation8 + $0xc4] sm:$0xf]  ;;  %v10036_v11 = vpack.c.bf16 %v3596_v61, %v3596_v61  ;;  %v8649_v50 = vor.u32 %v9540_v15, %v8648_v43  ;;  %v7738_v61 = vld [vmem:[#allocation8 + $0x50] sm:$0xf0] }
 0x284   :  { %v7805_v6 = vor.u32 %v9326_v33, %v7802_v0  ;;  %v9342_v33 = vld [vmem:[#allocation8 + $0x144] sm:$0xf]  ;;  %v7866_v0 = vld [vmem:[#allocation8 + $0x150] sm:$0xf0] }
 0x285   :  { %5233 = vmatpush.bf16.msrb.mxu2 %v8553_v55  ;;  %5208 = vmatpush.bf16.msrb.mxu0 %v8281_v57  ;;  %v8472_v55 = vld [vmem:[#allocation8 + $0x600] sm:$0xf]  ;;  %v9394_v57 = vld [vmem:[#allocation8 + $0x2e4] sm:$0xf]  ;;  %v10034_v37 = vpack.c.bf16 %v3595_v49, %v3595_v49  ;;  %v10040_v49 = vpop.f32.mrf.mxu0  ;;  %v10042_v53 = vpop.f32.mrf.mxu1  ;;  %v8330_v43 = vld [vmem:[#allocation8 + $0x4f0] sm:$0xf0] }
 0x286   :  { %v8473_v41 = vor.u32 %v9496_v56, %v8472_v55  ;;  %v8077_v4 = vor.u32 %v9394_v57, %v8074_v5  ;;  %v9378_v55 = vld [vmem:[#allocation8 + $0x264] sm:$0xf]  ;;  %v7757_v56 = vor.u32 %v9314_v44, %v7754_v45  ;;  %v8010_v57 = vld [vmem:[#allocation8 + $0x270] sm:$0xf0]  ;;  %v588_v5 = vperm.slane %v10008_v19, 6 }
 0x287   :  { %5221 = vmatpush.bf16.msrb.mxu1 %v8409_v60  ;;  %v8696_v60 = vld [vmem:[#allocation8 + $0x7c0] sm:$0xf]  ;;  %v9302_v35 = vld [vmem:[#allocation8 + $0x4] sm:$0xf]  ;;  %v8458_v45 = vld [vmem:[#allocation8 + $0x5f0] sm:$0xf0] }
 0x288   :  { %v9370_v21 = vld [vmem:[#allocation8 + $0x224] sm:$0xf] }
 0x289   :  { %5234 = vmatpush.bf16.msrb.mxu2 %v8537_v2  ;;  %5209 = vmatpush.bf16.msrb.mxu0 %v8265_v3  ;;  %v8697_v2 = vor.u32 %v9552_v20, %v8696_v60  ;;  %v7930_v3 = vld [vmem:[#allocation8 + $0x1d0] sm:$0xf0]  ;;  %v9310_v20 = vld [vmem:[#allocation8 + $0x44] sm:$0xf] }
 0x28a   :  { %v7933_v13 = vor.u32 %v9358_v40, %v7930_v3  ;;  %v8013_v3 = vor.u32 %v9378_v55, %v8010_v57  ;;  %v9490_v44 = vld [vmem:[#allocation8 + $0x5e4] sm:$0xf] }
 0x28b   :  { %5222 = vmatpush.bf16.msrb.mxu1 %v8393_v18  ;;  %v9390_v18 = vld [vmem:[#allocation8 + $0x2c4] sm:$0xf]  ;;  %5245 = vmatpush.bf16.msrb.mxu3 %v8697_v2 }
 0x28c   :  { %v8061_v34 = vor.u32 %v9390_v18, %v8058_v22  ;;  %v7994_v18 = vld [vmem:[#allocation8 + $0x250] sm:$0xf0]  ;;  %v9532_v22 = vld [vmem:[#allocation8 + $0x72c] sm:$0xf0] }
 0x28d   :  { %5235 = vmatpush.bf16.msrb.mxu2 %v8521_v8  ;;  %5210 = vmatpush.bf16.msrb.mxu0 %v8249_v23  ;;  %v9548_v8 = vld [vmem:[#allocation8 + $0x7ac] sm:$0xf0]  ;;  %v9322_v23 = vld [vmem:[#allocation8 + $0xa4] sm:$0xf]  ;;  %v10045_v2 = vpop.f32.mrf.mxu2 }
 0x28e   :  { %v8681_v16 = vor.u32 %v9548_v8, %v8680_v38  ;;  %v7789_v9 = vor.u32 %v9322_v23, %v7786_v14  ;;  %v3419_v38 = vadd.f32 %v10028_v7, %v588_v5  ;;  %v7869_v8 = vor.u32 %v9342_v33, %v7866_v0  ;;  %v7722_v23 = vld [vmem:[#allocation8 + $0x30] sm:$0xf0]  ;;  %v3446_v14 = vpop.f32.mrf.mxu0  ;;  %v9528_v7 = vld [vmem:[#allocation8 + $0x70c] sm:$0xf0] }
 0x28f   :  { %5223 = vmatpush.bf16.msrb.mxu1 %v8377_v63  ;;  %v7914_v63 = vld [vmem:[#allocation8 + $0x1b0] sm:$0xf0]  ;;  %v10047_v40 = vpop.f32.mrf.mxu3  ;;  %v8461_v5 = vor.u32 %v9490_v44, %v8458_v45  ;;  %v9414_v14 = vld [vmem:[#allocation8 + $0x384] sm:$0xf] }
 0x290   :  { %5246 = vmatpush.bf16.msrb.mxu3 %v8681_v16  ;;  %v8442_v33 = vld [vmem:[#allocation8 + $0x5d0] sm:$0xf0] }
 0x291   :  { %5236 = vmatpush.bf16.msrb.mxu2 %v8505_v48  ;;  %5211 = vmatpush.bf16.msrb.mxu0 %v8233_v39  ;;  %v7917_v48 = vor.u32 %v9354_v42, %v7914_v63  ;;  %v9318_v39 = vld [vmem:[#allocation8 + $0x84] sm:$0xf]  ;;  %v7850_v63 = vld [vmem:[#allocation8 + $0x130] sm:$0xf0] }
 0x292   :  { %v7773_v31 = vor.u32 %v9318_v39, %v7770_v28  ;;  %v9338_v42 = vld [vmem:[#allocation8 + $0x124] sm:$0xf]  ;;  %v8600_v39 = vld [vmem:[#allocation8 + $0x700] sm:$0xf]  ;;  %v3432_v28 = vadd.f32 %v10030_v10, %v3419_v38  ;;  %v7962_v10 = vld [vmem:[#allocation8 + $0x210] sm:$0xf0] }
 0x293   :  { %5224 = vmatpush.bf16.msrb.mxu1 %v8361_v30  ;;  %v7898_v30 = vld [vmem:[#allocation8 + $0x190] sm:$0xf0] }
 0x294   :  { %5247 = vmatpush.bf16.msrb.mxu3 %v8665_v46  ;;  %v7901_v36 = vor.u32 %v9350_v27, %v7898_v30  ;;  %v7853_v46 = vor.u32 %v9338_v42, %v7850_v63  ;;  %v9334_v27 = vld [vmem:[#allocation8 + $0x104] sm:$0xf]  ;;  %v8601_v30 = vor.u32 %v9528_v7, %v8600_v39  ;;  %v3445_v55 = vadd.f32 %v10040_v49, %v3432_v28  ;;  %v8138_v39 = vld [vmem:[#allocation8 + $0x370] sm:$0xf0] }
 0x295   :  { %5237 = vmatpush.bf16.msrb.mxu2 %v8489_v52  ;;  %5212 = vmatpush.bf16.msrb.mxu0 %v8217_v54  ;;  %v7882_v52 = vld [vmem:[#allocation8 + $0x170] sm:$0xf0]  ;;  %v8029_v54 = vor.u32 %v9382_v12, %v8026_v32  ;;  %v9458_v32 = vld [vmem:[#allocation8 + $0x4e4] sm:$0xf]  ;;  %v3472_v15 = vpop.f32.mrf.mxu2 }
 0x296   :  { %v7885_v60 = vor.u32 %v9346_v51, %v7882_v52  ;;  %v8202_v12 = vld [vmem:[#allocation8 + $0x3f0] sm:$0xf0]  ;;  %v8333_v57 = vor.u32 %v9458_v32, %v8330_v43  ;;  %v9446_v63 = vld [vmem:[#allocation8 + $0x484] sm:$0xf] }
 0x297   :  { %5225 = vmatpush.bf16.msrb.mxu1 %v8345_v58  ;;  %v8632_v58 = vld [vmem:[#allocation8 + $0x740] sm:$0xf]  ;;  %v3485_v51 = vpop.f32.mrf.mxu3  ;;  %v9442_v28 = vld [vmem:[#allocation8 + $0x464] sm:$0xf]  ;;  %v8586_v32 = vld [vmem:[#allocation8 + $0x6f0] sm:$0xf0] }
 0x298   :  { %5213 = vmatmul.bf16.vlgmr.msrb.gmra.mxu0 %v10034_v37  ;;  %5248 = vmatpush.bf16.msrb.mxu3 %v8649_v50  ;;  %v8122_v44 = vld [vmem:[#allocation8 + $0x350] sm:$0xf0]  ;;  %v9438_v51 = vld [vmem:[#allocation8 + $0x444] sm:$0xf] }
 0x299   :  { %5257 = vmatpush.bf16.msra.mxu0 %v7821_v59  ;;  %5238 = vmatpush.bf16.msrb.mxu2 %v8473_v41  ;;  %v9536_v59 = vld [vmem:[#allocation8 + $0x74c] sm:$0xf0]  ;;  %v9374_v41 = vld [vmem:[#allocation8 + $0x244] sm:$0xf] }
 0x29a   :  { %5226 = vmatmul.bf16.vlgmr.msrb.gmra.mxu1 %v10036_v11  ;;  %v7997_v17 = vor.u32 %v9374_v41, %v7994_v18  ;;  %v9418_v41 = vld [vmem:[#allocation8 + $0x3a4] sm:$0xf] }
 0x29b   :  { %5270 = vmatpush.bf16.msra.mxu1 %v7949_v62  ;;  %v8633_v62 = vor.u32 %v9536_v59, %v8632_v58  ;;  %v9422_v58 = vld [vmem:[#allocation8 + $0x3c4] sm:$0xf]  ;;  %v8186_v59 = vld [vmem:[#allocation8 + $0x3d0] sm:$0xf0] }
 0x29d   :  { %5283 = vmatpush.bf16.msra.mxu2 %v8077_v4  ;;  %5258 = vmatpush.bf16.msra.mxu0 %v7805_v6  ;;  %v7741_v4 = vor.u32 %v9310_v20, %v7738_v61  ;;  %v8616_v6 = vld [vmem:[#allocation8 + $0x720] sm:$0xf]  ;;  %v8314_v20 = vld [vmem:[#allocation8 + $0x4d0] sm:$0xf0]  ;;  %v8189_v61 = vor.u32 %v9422_v58, %v8186_v59 }
 0x29e   :  { %5249 = vmatpush.bf16.msrb.mxu3 %v8633_v62  ;;  %v8617_v16 = vor.u32 %v9532_v22, %v8616_v6  ;;  %v9486_v62 = vld [vmem:[#allocation8 + $0x5c4] sm:$0xf]  ;;  %v8298_v22 = vld [vmem:[#allocation8 + $0x4b0] sm:$0xf0] }
 0x29f   :  { %5271 = vmatpush.bf16.msra.mxu1 %v7933_v13  ;;  %v9306_v13 = vld [vmem:[#allocation8 + $0x24] sm:$0xf]  ;;  %v8445_v18 = vor.u32 %v9486_v62, %v8442_v33 }
 0x2a0   :  { %v7725_v25 = vor.u32 %v9306_v13, %v7722_v23  ;;  %v9450_v6 = vld [vmem:[#allocation8 + $0x4a4] sm:$0xf]  ;;  %v8426_v13 = vld [vmem:[#allocation8 + $0x5b0] sm:$0xf0] }
 0x2a1   :  { %5284 = vmatpush.bf16.msra.mxu2 %v8061_v34  ;;  %5259 = vmatpush.bf16.msra.mxu0 %v7789_v9  ;;  %v3459_v34 = vpop.f32.mrf.mxu1  ;;  %v7706_v9 = vld [vmem:[#allocation8 + $0x10] sm:$0xf0]  ;;  %v8301_v23 = vor.u32 %v9450_v6, %v8298_v22 }
 0x2a2   :  { %5250 = vmatpush.bf16.msrb.mxu3 %v8617_v16  ;;  %v7709_v52 = vor.u32 %v9302_v35, %v7706_v9  ;;  %v8154_v16 = vld [vmem:[#allocation8 + $0x390] sm:$0xf0]  ;;  %v9478_v9 = vld [vmem:[#allocation8 + $0x584] sm:$0xf] }
 0x2a3   :  { %5272 = vmatpush.bf16.msra.mxu1 %v7917_v48  ;;  %v7978_v48 = vld [vmem:[#allocation8 + $0x230] sm:$0xf0]  ;;  %v8157_v35 = vor.u32 %v9414_v14, %v8154_v16 }
 0x2a4   :  { %v7981_v50 = vor.u32 %v9370_v21, %v7978_v48  ;;  %v8282_v34 = vld [vmem:[#allocation8 + $0x490] sm:$0xf0]  ;;  %v9410_v48 = vld [vmem:[#allocation8 + $0x364] sm:$0xf] }
 0x2a5   :  { %5285 = vmatpush.bf16.msra.mxu2 %v8045_v47  ;;  %5260 = vmatpush.bf16.msra.mxu0 %v7773_v31  ;;  %v9426_v47 = vld [vmem:[#allocation8 + $0x3e4] sm:$0xf]  ;;  %v7834_v31 = vld [vmem:[#allocation8 + $0x110] sm:$0xf0] }
 0x2a6   :  { %5251 = vmatpush.bf16.msrb.mxu3 %v8601_v30  ;;  %v8141_v30 = vor.u32 %v9410_v48, %v8138_v39  ;;  %v8554_v6 = vld [vmem:[#allocation8 + $0x6b0] sm:$0xf0]  ;;  %v9510_v48 = vld [vmem:[#allocation8 + $0x684] sm:$0xf] }
 0x2a7   :  { %5273 = vmatpush.bf16.msra.mxu1 %v7901_v36  ;;  %v8205_v36 = vor.u32 %v9426_v47, %v8202_v12  ;;  %v8394_v12 = vld [vmem:[#allocation8 + $0x570] sm:$0xf0] }
 0x2a8   :  { %v8538_v39 = vld [vmem:[#allocation8 + $0x690] sm:$0xf0] }
 0x2a9   :  { %5286 = vmatpush.bf16.msra.mxu2 %v8029_v54  ;;  %5261 = vmatpush.bf16.msra.mxu0 %v7757_v56  ;;  %v9366_v54 = vld [vmem:[#allocation8 + $0x204] sm:$0xf]  ;;  %v7837_v56 = vor.u32 %v9334_v27, %v7834_v31  ;;  %v10057_v43 = vpop.f32.mrf.mxu1 }
 0x2aa   :  { %5296 = vmatpush.bf16.msra.mxu3 %v8205_v36  ;;  %v7965_v0 = vor.u32 %v9366_v54, %v7962_v10  ;;  %v9474_v27 = vld [vmem:[#allocation8 + $0x564] sm:$0xf] }
 0x2ab   :  { %5274 = vmatpush.bf16.msra.mxu1 %v7885_v60  ;;  %v9454_v60 = vld [vmem:[#allocation8 + $0x4c4] sm:$0xf]  ;;  %v8397_v45 = vor.u32 %v9474_v27, %v8394_v12  ;;  %v8541_v12 = vor.u32 %v9510_v48, %v8538_v39  ;;  %v7872_v39 = vld [vmem:[#allocation8 + $0x148] sm:$0xf] }
 0x2ac   :  { %v8317_v49 = vor.u32 %v9454_v60, %v8314_v20  ;;  %v9522_v31 = vld [vmem:[#allocation8 + $0x6e4] sm:$0xf] }
 0x2ad   :  { %5287 = vmatpush.bf16.msra.mxu2 %v8013_v3  ;;  %5262 = vmatpush.bf16.msra.mxu0 %v7741_v4  ;;  %v3458_v3 = vadd.f32 %v10042_v53, %v3445_v55  ;;  %v8170_v4 = vld [vmem:[#allocation8 + $0x3b0] sm:$0xf0]  ;;  %v9406_v36 = vld [vmem:[#allocation8 + $0x344] sm:$0xf] }
 0x2ae   :  { %5297 = vmatpush.bf16.msra.mxu3 %v8189_v61  ;;  %v8173_v38 = vor.u32 %v9418_v41, %v8170_v4  ;;  %v9470_v54 = vld [vmem:[#allocation8 + $0x544] sm:$0xf]  ;;  %v8378_v55 = vld [vmem:[#allocation8 + $0x550] sm:$0xf0]  ;;  %v8125_v58 = vor.u32 %v9406_v36, %v8122_v44 }
 0x2af   :  { %5275 = vmatpush.bf16.msra.mxu1 %v7869_v8  ;;  %v9482_v8 = vld [vmem:[#allocation8 + $0x5a4] sm:$0xf]  ;;  %v3471_v53 = vadd.f32 %v10045_v2, %v3458_v3  ;;  %v3496_v2 = vpop.f32.mrf.mxu0  ;;  %v10064_v60 = vpop.f32.mrf.mxu3  ;;  %v8106_v61 = vld [vmem:[#allocation8 + $0x330] sm:$0xf0]  ;;  %v8381_v62 = vor.u32 %v9470_v54, %v8378_v55  ;;  %v7920_v54 = vld [vmem:[#allocation8 + $0x1a8] sm:$0xf] }
 0x2b0   :  { %v8429_v42 = vor.u32 %v9482_v8, %v8426_v13  ;;  %v9402_v20 = vld [vmem:[#allocation8 + $0x324] sm:$0xf]  ;;  %v8234_v3 = vld [vmem:[#allocation8 + $0x430] sm:$0xf0] }
 0x2b1   :  { %5288 = vmatpush.bf16.msra.mxu2 %v7997_v17  ;;  %5263 = vmatpush.bf16.msra.mxu0 %v7725_v25  ;;  %v8410_v17 = vld [vmem:[#allocation8 + $0x590] sm:$0xf0]  ;;  %v3484_v21 = vadd.f32 %v10047_v40, %v3471_v53  ;;  %v8285_v25 = vor.u32 %v9446_v63, %v8282_v34  ;;  %v8109_v22 = vor.u32 %v9402_v20, %v8106_v61  ;;  %v9430_v13 = vld [vmem:[#allocation8 + $0x404] sm:$0xf] }
 0x2b2   :  { %5298 = vmatpush.bf16.msra.mxu3 %v8173_v38  ;;  %v8413_v7 = vor.u32 %v9478_v9, %v8410_v17  ;;  %v8362_v4 = vld [vmem:[#allocation8 + $0x530] sm:$0xf0]  ;;  %v3511_v38 = vpop.f32.mrf.mxu1  ;;  %v9398_v53 = vld [vmem:[#allocation8 + $0x304] sm:$0xf]  ;;  %v9333_v9 = vld [vmem:[#allocation8 + $0xf4] sm:$0xf0] }
 0x2b3   :  { %5276 = vmatpush.bf16.msra.mxu1 %v7853_v46  ;;  %v8266_v46 = vld [vmem:[#allocation8 + $0x470] sm:$0xf0]  ;;  %v3497_v47 = vadd.f32 %v3496_v2, %v3484_v21  ;;  %v9462_v63 = vld [vmem:[#allocation8 + $0x504] sm:$0xf]  ;;  %v7952_v17 = vld [vmem:[#allocation8 + $0x1e8] sm:$0xf] }
 0x2b4   :  { %v8269_v40 = vor.u32 %v9442_v28, %v8266_v46  ;;  %v8346_v34 = vld [vmem:[#allocation8 + $0x510] sm:$0xf0]  ;;  %v589_v46 = vperm.slane %v10008_v19, 7  ;;  %v9506_v36 = vld [vmem:[#allocation8 + $0x664] sm:$0xf] }
 0x2b5   :  { %5289 = vmatpush.bf16.msra.mxu2 %v7981_v50  ;;  %5264 = vmatpush.bf16.msra.mxu0 %v7709_v52  ;;  %v3597_v15 = vmax.f32 %v3497_v47, 0.0  ;;  %v8589_v50 = vor.u32 %v9522_v31, %v8586_v32  ;;  %v8250_v52 = vld [vmem:[#allocation8 + $0x450] sm:$0xf0]  ;;  %v8349_v27 = vor.u32 %v9462_v63, %v8346_v34  ;;  %v7808_v31 = vld [vmem:[#allocation8 + $0xc8] sm:$0xf] }
 0x2b6   :  { %5299 = vmatpush.bf16.msra.mxu3 %v8157_v35  ;;  %v8253_v59 = vor.u32 %v9438_v51, %v8250_v52  ;;  %v7824_v35 = vld [vmem:[#allocation8 + $0xe8] sm:$0xf]  ;;  %v9329_v32 = vld [vmem:[#allocation8 + $0xd4] sm:$0xf0]  ;;  %v8522_v44 = vld [vmem:[#allocation8 + $0x670] sm:$0xf0]  ;;  %v3510_v55 = vadd.f32 %v10057_v43, %v589_v46 }
 0x2b7   :  { %5277 = vmatpush.bf16.msra.mxu1 %v7837_v56  ;;  %v10059_v10 = vpack.c.bf16 %v3597_v15, %v3597_v15  ;;  %v9518_v56 = vld [vmem:[#allocation8 + $0x6c4] sm:$0xf]  ;;  %v3498_v41 = vpop.f32.mrf.mxu0  ;;  %v3537_v28 = vpop.f32.mrf.mxu3  ;;  %v7936_v15 = vld [vmem:[#allocation8 + $0x1c8] sm:$0xf]  ;;  %v9325_v52 = vld [vmem:[#allocation8 + $0xb4] sm:$0xf0] }
 0x2b8   :  { %5265 = vmatmul.bf16.vlgmr.msra.gmra.mxu0 %v10012_v24  ;;  %v7792_v51 = vld [vmem:[#allocation8 + $0xa8] sm:$0xf]  ;;  %v8490_v41 = vld [vmem:[#allocation8 + $0x630] sm:$0xf0]  ;;  %v9317_v38 = vld [vmem:[#allocation8 + $0x74] sm:$0xf0] }
 0x2b9   :  { %5309 = vmatpush.bf16.msrb.mxu0 %v8333_v57  ;;  %5290 = vmatpush.bf16.msra.mxu2 %v7965_v0  ;;  %v8570_v57 = vld [vmem:[#allocation8 + $0x6d0] sm:$0xf0]  ;;  %v9434_v0 = vld [vmem:[#allocation8 + $0x424] sm:$0xf]  ;;  %v9397_v63 = vld [vmem:[#allocation8 + $0x2f4] sm:$0xf0] }
 0x2ba   :  { %5278 = vmatmul.bf16.vlgmr.msra.gmra.mxu1 %v10014_v1  ;;  %5300 = vmatpush.bf16.msra.mxu3 %v8141_v30  ;;  %v8573_v33 = vor.u32 %v9518_v56, %v8570_v57  ;;  %v8237_v8 = vor.u32 %v9434_v0, %v8234_v3  ;;  %v7825_v30 = vor.u32 %v9333_v9, %v7824_v35  ;;  %v9357_v56 = vld [vmem:[#allocation8 + $0x1b4] sm:$0xf0]  ;;  %v9502_v57 = vld [vmem:[#allocation8 + $0x644] sm:$0xf]  ;;  %v7904_v0 = vld [vmem:[#allocation8 + $0x188] sm:$0xf] }
 0x2bb   :  { %5322 = vmatpush.bf16.msrb.mxu1 %v8461_v5  ;;  %5239 = vmatmul.bf16.vlgmr.msrb.gmra.mxu2 %v10059_v10  ;;  %v10062_v5 = vpop.f32.mrf.mxu2  ;;  %v7921_v20 = vor.u32 %v9357_v56, %v7920_v54  ;;  %v9353_v3 = vld [vmem:[#allocation8 + $0x194] sm:$0xf0]  ;;  %v7712_v56 = vld [vmem:[#allocation8 + $0x8] sm:$0xf] }
 0x2bc   :  { %v3523_v43 = vadd.f32 %v10062_v5, %v3510_v55  ;;  %v8080_v5 = vld [vmem:[#allocation8 + $0x2e8] sm:$0xf]  ;;  %v8714_v55 = vld [vmem:[#allocation8 + $0x7f0] sm:$0xf0] }
 0x2bd   :  { %5310 = vmatpush.bf16.msrb.mxu0 %v8317_v49  ;;  %5335 = vmatpush.bf16.msrb.mxu2 %v8589_v50  ;;  %v9466_v49 = vld [vmem:[#allocation8 + $0x524] sm:$0xf]  ;;  %v8525_v50 = vor.u32 %v9506_v36, %v8522_v44  ;;  %v8081_v48 = vor.u32 %v9397_v63, %v8080_v5  ;;  %v7856_v36 = vld [vmem:[#allocation8 + $0x128] sm:$0xf]  ;;  %v9341_v44 = vld [vmem:[#allocation8 + $0x134] sm:$0xf0] }
 0x2be   :  { %5301 = vmatpush.bf16.msra.mxu3 %v8125_v58  ;;  %v8365_v14 = vor.u32 %v9466_v49, %v8362_v4  ;;  %v8506_v58 = vld [vmem:[#allocation8 + $0x650] sm:$0xf0]  ;;  %v9498_v49 = vld [vmem:[#allocation8 + $0x624] sm:$0xf]  ;;  %v9457_v5 = vld [vmem:[#allocation8 + $0x4d4] sm:$0xf0] }
 0x2bf   :  { %5323 = vmatpush.bf16.msrb.mxu1 %v8445_v18  ;;  %v9514_v18 = vld [vmem:[#allocation8 + $0x6a4] sm:$0xf]  ;;  %v8509_v61 = vor.u32 %v9502_v57, %v8506_v58  ;;  %v9305_v57 = vld [vmem:[#allocation8 + $0x14] sm:$0xf0]  ;;  %v7857_v58 = vor.u32 %v9341_v44, %v7856_v36  ;;  %v8448_v63 = vld [vmem:[#allocation8 + $0x5c8] sm:$0xf] }
 0x2c0   :  { %v8557_v16 = vor.u32 %v9514_v18, %v8554_v6  ;;  %v7905_v18 = vor.u32 %v9353_v3, %v7904_v0  ;;  %v8493_v6 = vor.u32 %v9498_v49, %v8490_v41  ;;  %v9461_v0 = vld [vmem:[#allocation8 + $0x4f4] sm:$0xf0]  ;;  %v8032_v41 = vld [vmem:[#allocation8 + $0x288] sm:$0xf] }
 0x2c1   :  { %5311 = vmatpush.bf16.msrb.mxu0 %v8301_v23  ;;  %v8090_v23 = vld [vmem:[#allocation8 + $0x310] sm:$0xf0]  ;;  %5336 = vmatpush.bf16.msrb.mxu2 %v8573_v33  ;;  %v9321_v33 = vld [vmem:[#allocation8 + $0x94] sm:$0xf0] }
 0x2c2   :  { %5302 = vmatpush.bf16.msra.mxu3 %v8109_v22  ;;  %v8093_v21 = vor.u32 %v9398_v53, %v8090_v23  ;;  %v7760_v22 = vld [vmem:[#allocation8 + $0x68] sm:$0xf]  ;;  %v9349_v23 = vld [vmem:[#allocation8 + $0x174] sm:$0xf0] }
 0x2c3   :  { %5324 = vmatpush.bf16.msrb.mxu1 %v8429_v42  ;;  %v8218_v42 = vld [vmem:[#allocation8 + $0x410] sm:$0xf0]  ;;  %v7761_v35 = vor.u32 %v9317_v38, %v7760_v22  ;;  %v9493_v49 = vld [vmem:[#allocation8 + $0x5f4] sm:$0xf0]  ;;  %v9550_v22 = vld [vmem:[#allocation8 + $0x7c4] sm:$0xf] }
 0x2c4   :  { %v8221_v2 = vor.u32 %v9430_v13, %v8218_v42  ;;  %v3536_v13 = vadd.f32 %v10064_v60, %v3523_v43  ;;  %v8064_v60 = vld [vmem:[#allocation8 + $0x2c8] sm:$0xf]  ;;  %v8698_v38 = vld [vmem:[#allocation8 + $0x7d0] sm:$0xf0] }
 0x2c5   :  { %5312 = vmatpush.bf16.msrb.mxu0 %v8285_v25  ;;  %v9365_v25 = vld [vmem:[#allocation8 + $0x1f4] sm:$0xf0]  ;;  %5337 = vmatpush.bf16.msrb.mxu2 %v8557_v16  ;;  %v8474_v16 = vld [vmem:[#allocation8 + $0x610] sm:$0xf0]  ;;  %v8464_v43 = vld [vmem:[#allocation8 + $0x5e8] sm:$0xf] }
 0x2c6   :  { %v7953_v47 = vor.u32 %v9365_v25, %v7952_v17  ;;  %5303 = vmatpush.bf16.msra.mxu3 %v8093_v21  ;;  %v7744_v21 = vld [vmem:[#allocation8 + $0x48] sm:$0xf]  ;;  %v9313_v25 = vld [vmem:[#allocation8 + $0x54] sm:$0xf0] }
 0x2c7   :  { %5325 = vmatpush.bf16.msrb.mxu1 %v8413_v7  ;;  %v3524_v7 = vpop.f32.mrf.mxu2  ;;  %v7745_v46 = vor.u32 %v9313_v25, %v7744_v21  ;;  %v9546_v21 = vld [vmem:[#allocation8 + $0x7a4] sm:$0xf]  ;;  %v8682_v25 = vld [vmem:[#allocation8 + $0x7b0] sm:$0xf0] }
 0x2c8   :  { %v9393_v7 = vld [vmem:[#allocation8 + $0x2d4] sm:$0xf0] }
 0x2c9   :  { %5313 = vmatpush.bf16.msrb.mxu0 %v8269_v40  ;;  %v9361_v40 = vld [vmem:[#allocation8 + $0x1d4] sm:$0xf0]  ;;  %5338 = vmatpush.bf16.msrb.mxu2 %v8541_v12 }
 0x2ca   :  { %v7937_v19 = vor.u32 %v9361_v40, %v7936_v15  ;;  %v9309_v12 = vld [vmem:[#allocation8 + $0x34] sm:$0xf0]  ;;  %v8065_v40 = vor.u32 %v9393_v7, %v8064_v60 }
 0x2cb   :  { %5326 = vmatpush.bf16.msrb.mxu1 %v8397_v45  ;;  %v7809_v45 = vor.u32 %v9329_v32, %v7808_v31  ;;  %5291 = vmatmul.bf16.vlgmr.msra.gmra.mxu2 %v10016_v26  ;;  %v9453_v7 = vld [vmem:[#allocation8 + $0x4b4] sm:$0xf0] }
 0x2cd   :  { %5314 = vmatpush.bf16.msrb.mxu0 %v8253_v59  ;;  %v7793_v59 = vor.u32 %v9325_v52, %v7792_v51  ;;  %5339 = vmatpush.bf16.msrb.mxu2 %v8525_v50  ;;  %v8048_v50 = vld [vmem:[#allocation8 + $0x2a8] sm:$0xf]  ;;  %v9389_v51 = vld [vmem:[#allocation8 + $0x2b4] sm:$0xf0] }
 0x2cf   :  { %5327 = vmatpush.bf16.msrb.mxu1 %v8381_v62  ;;  %v7776_v62 = vld [vmem:[#allocation8 + $0x88] sm:$0xf] }
 0x2d0   :  { %v7777_v4 = vor.u32 %v9321_v33, %v7776_v62  ;;  %v8049_v33 = vor.u32 %v9389_v51, %v8048_v50  ;;  %v8416_v51 = vld [vmem:[#allocation8 + $0x588] sm:$0xf] }
 0x2d1   :  { %5315 = vmatpush.bf16.msrb.mxu0 %v8237_v8  ;;  %5340 = vmatpush.bf16.msrb.mxu2 %v8509_v61  ;;  %v7888_v8 = vld [vmem:[#allocation8 + $0x168] sm:$0xf] }
 0x2d2   :  { %v7889_v9 = vor.u32 %v9349_v23, %v7888_v8  ;;  %v8336_v61 = vld [vmem:[#allocation8 + $0x4e8] sm:$0xf] }
 0x2d3   :  { %5328 = vmatpush.bf16.msrb.mxu1 %v8365_v14  ;;  %v9494_v14 = vld [vmem:[#allocation8 + $0x604] sm:$0xf] }
 0x2d4   :  { %v8477_v17 = vor.u32 %v9494_v14, %v8474_v16  ;;  %v8465_v14 = vor.u32 %v9493_v49, %v8464_v43  ;;  %v8400_v43 = vld [vmem:[#allocation8 + $0x568] sm:$0xf]  ;;  %v9534_v49 = vld [vmem:[#allocation8 + $0x744] sm:$0xf] }
 0x2d5   :  { %5316 = vmatpush.bf16.msrb.mxu0 %v8221_v2  ;;  %v3548_v53 = vpop.f32.mrf.mxu0  ;;  %5341 = vmatpush.bf16.msrb.mxu2 %v8493_v6  ;;  %v9345_v2 = vld [vmem:[#allocation8 + $0x154] sm:$0xf0]  ;;  %v7713_v6 = vor.u32 %v9305_v57, %v7712_v56  ;;  %v7984_v56 = vld [vmem:[#allocation8 + $0x228] sm:$0xf] }
 0x2d6   :  { %v3549_v34 = vadd.f32 %v3548_v53, %v3536_v13  ;;  %v8337_v53 = vor.u32 %v9461_v0, %v8336_v61  ;;  %v9373_v57 = vld [vmem:[#allocation8 + $0x234] sm:$0xf0] }
 0x2d7   :  { %5329 = vmatpush.bf16.msrb.mxu1 %v8349_v27  ;;  %v3561_v42 = vpop.f32.mrf.mxu1  ;;  %v9445_v61 = vld [vmem:[#allocation8 + $0x474] sm:$0xf0]  ;;  %v7985_v0 = vor.u32 %v9373_v57, %v7984_v56  ;;  %v8224_v56 = vld [vmem:[#allocation8 + $0x408] sm:$0xf] }
 0x2d8   :  { %5317 = vmatmul.bf16.vlgmr.msrb.gmra.mxu0 %v10034_v37  ;;  %v3562_v28 = vadd.f32 %v3561_v42, %v3549_v34  ;;  %v8320_v42 = vld [vmem:[#allocation8 + $0x4c8] sm:$0xf]  ;;  %v8701_v34 = vor.u32 %v9550_v22, %v8698_v38  ;;  %v9369_v38 = vld [vmem:[#allocation8 + $0x214] sm:$0xf0] }
 0x2d9   :  { %5361 = vmatpush.bf16.msra.mxu0 %v7825_v30  ;;  %5342 = vmatpush.bf16.msrb.mxu2 %v8477_v17  ;;  %v7873_v30 = vor.u32 %v9345_v2, %v7872_v39  ;;  %v9381_v17 = vld [vmem:[#allocation8 + $0x274] sm:$0xf0]  ;;  %v8304_v39 = vld [vmem:[#allocation8 + $0x4a8] sm:$0xf] }
 0x2da   :  { %5330 = vmatmul.bf16.vlgmr.msrb.gmra.mxu1 %v10036_v11  ;;  %v7968_v22 = vld [vmem:[#allocation8 + $0x208] sm:$0xf]  ;;  %v9433_v57 = vld [vmem:[#allocation8 + $0x414] sm:$0xf0] }
 0x2db   :  { %5374 = vmatpush.bf16.msra.mxu1 %v7953_v47  ;;  %v7728_v47 = vld [vmem:[#allocation8 + $0x28] sm:$0xf] }
 0x2dc   :  { %5343 = vmatmul.bf16.vlgmr.msrb.gmra.mxu2 %v10059_v10  ;;  %v7729_v54 = vor.u32 %v9309_v12, %v7728_v47  ;;  %v9377_v47 = vld [vmem:[#allocation8 + $0x254] sm:$0xf0]  ;;  %v10078_v12 = vld [vmem:[#allocation10] sm:$0xf] }
 0x2dd   :  { %5362 = vmatpush.bf16.msra.mxu0 %v7809_v45  ;;  %5387 = vmatpush.bf16.msra.mxu2 %v8081_v48  ;;  %v3550_v15 = vpop.f32.mrf.mxu0  ;;  %v8321_v48 = vor.u32 %v9457_v5, %v8320_v42  ;;  %v3865_v44 = vperm.slane %v10078_v12, 0  ;;  %v9441_v42 = vld [vmem:[#allocation8 + $0x454] sm:$0xf0] }
 0x2de   :  { %v8305_v15 = vor.u32 %v9453_v7, %v8304_v39  ;;  %v9521_v39 = vld [vmem:[#allocation8 + $0x6d4] sm:$0xf0]  ;;  %v8240_v7 = vld [vmem:[#allocation8 + $0x428] sm:$0xf] }
 0x2df   :  { %5375 = vmatpush.bf16.msra.mxu1 %v7937_v19  ;;  %v3574_v27 = vpop.f32.mrf.mxu2  ;;  %v3563_v45 = vpop.f32.mrf.mxu1  ;;  %v9554_v19 = vld [vmem:[#allocation8 + $0x7e4] sm:$0xf] }
 0x2e0   :  { %v3575_v31 = vadd.f32 %v3574_v27, %v3562_v28  ;;  %v8717_v3 = vor.u32 %v9554_v19, %v8714_v55  ;;  %v8432_v28 = vld [vmem:[#allocation8 + $0x5a8] sm:$0xf]  ;;  %v8685_v27 = vor.u32 %v9546_v21, %v8682_v25  ;;  %v9449_v19 = vld [vmem:[#allocation8 + $0x494] sm:$0xf0]  ;;  %v8650_v55 = vld [vmem:[#allocation8 + $0x770] sm:$0xf0] }
 0x2e1   :  { %5363 = vmatpush.bf16.msra.mxu0 %v7793_v59  ;;  %v3587_v32 = vpop.f32.mrf.mxu3  ;;  %v7840_v59 = vld [vmem:[#allocation8 + $0x108] sm:$0xf]  ;;  %5388 = vmatpush.bf16.msra.mxu2 %v8065_v40  ;;  %v8618_v21 = vld [vmem:[#allocation8 + $0x730] sm:$0xf0] }
 0x2e2   :  { %v3588_v52 = vadd.f32 %v3587_v32, %v3575_v31  ;;  %v9542_v31 = vld [vmem:[#allocation8 + $0x784] sm:$0xf]  ;;  %v8666_v32 = vld [vmem:[#allocation8 + $0x790] sm:$0xf0]  ;;  %v8288_v45 = vld [vmem:[#allocation8 + $0x488] sm:$0xf] }
 0x2e3   :  { %5376 = vmatpush.bf16.msra.mxu1 %v7921_v20  ;;  %v9337_v20 = vld [vmem:[#allocation8 + $0x114] sm:$0xf0]  ;;  %v8669_v50 = vor.u32 %v9542_v31, %v8666_v32  ;;  %v8368_v31 = vld [vmem:[#allocation8 + $0x528] sm:$0xf] }
 0x2e4   :  { %v3598_v62 = vmax.f32 %v3588_v52, 0.0  ;;  %v7841_v13 = vor.u32 %v9337_v20, %v7840_v59  ;;  %v9481_v52 = vld [vmem:[#allocation8 + $0x594] sm:$0xf0]  ;;  %v8272_v20 = vld [vmem:[#allocation8 + $0x468] sm:$0xf] }
 0x2e5   :  { %5364 = vmatpush.bf16.msra.mxu0 %v7777_v4  ;;  %v9385_v4 = vld [vmem:[#allocation8 + $0x294] sm:$0xf0]  ;;  %5389 = vmatpush.bf16.msra.mxu2 %v8049_v33  ;;  %v8417_v59 = vor.u32 %v9481_v52, %v8416_v51  ;;  %v8560_v52 = vld [vmem:[#allocation8 + $0x6a8] sm:$0xf] }
 0x2e6   :  { %v8033_v16 = vor.u32 %v9385_v4, %v8032_v41  ;;  %v9469_v32 = vld [vmem:[#allocation8 + $0x534] sm:$0xf0] }
 0x2e7   :  { %5377 = vmatpush.bf16.msra.mxu1 %v7905_v18  ;;  %v10074_v18 = vpack.c.bf16 %v3598_v62, %v3598_v62  ;;  %v3576_v8 = vpop.f32.mrf.mxu2  ;;  %v9429_v51 = vld [vmem:[#allocation8 + $0x3f4] sm:$0xf0] }
 0x2e8   :  { %v8273_v8 = vor.u32 %v9445_v61, %v8272_v20  ;;  %v9465_v20 = vld [vmem:[#allocation8 + $0x514] sm:$0xf0]  ;;  %v9331_v61 = vld [vmem:[#allocation8 + $0xec] sm:$0xf] }
 0x2e9   :  { %5365 = vmatpush.bf16.msra.mxu0 %v7761_v35  ;;  %v3589_v23 = vpop.f32.mrf.mxu3  ;;  %5252 = vmatmul.bf16.vlgmr.msrb.gmra.mxu3 %v10074_v18  ;;  %v9489_v35 = vld [vmem:[#allocation8 + $0x5d4] sm:$0xf0] }
 0x2ea   :  { %5348 = vmatpush.bf16.msrb.mxu3 %v8717_v3  ;;  %5390 = vmatpush.bf16.msra.mxu2 %v8033_v16  ;;  %v8449_v2 = vor.u32 %v9489_v35, %v8448_v63  ;;  %v9477_v3 = vld [vmem:[#allocation8 + $0x574] sm:$0xf0]  ;;  %v8256_v16 = vld [vmem:[#allocation8 + $0x448] sm:$0xf]  ;;  %v7969_v63 = vor.u32 %v9369_v38, %v7968_v22 }
 0x2eb   :  { %5378 = vmatpush.bf16.msra.mxu1 %v7889_v9  ;;  %v8016_v9 = vld [vmem:[#allocation8 + $0x268] sm:$0xf]  ;;  %v9473_v35 = vld [vmem:[#allocation8 + $0x554] sm:$0xf0]  ;;  %v8257_v25 = vor.u32 %v9441_v42, %v8256_v16  ;;  %v7810_v16 = vld [vmem:[#allocation8 + $0xd8] sm:$0xf0] }
 0x2ec   :  { %v8017_v60 = vor.u32 %v9381_v17, %v8016_v9  ;;  %v9530_v17 = vld [vmem:[#allocation8 + $0x724] sm:$0xf]  ;;  %v9513_v22 = vld [vmem:[#allocation8 + $0x694] sm:$0xf0] }
 0x2ed   :  { %5366 = vmatpush.bf16.msra.mxu0 %v7745_v46  ;;  %v9485_v46 = vld [vmem:[#allocation8 + $0x5b4] sm:$0xf0] }
 0x2ee   :  { %5349 = vmatpush.bf16.msrb.mxu3 %v8701_v34  ;;  %5391 = vmatpush.bf16.msra.mxu2 %v8017_v60  ;;  %v8433_v40 = vor.u32 %v9485_v46, %v8432_v28  ;;  %v8384_v34 = vld [vmem:[#allocation8 + $0x548] sm:$0xf]  ;;  %v9437_v28 = vld [vmem:[#allocation8 + $0x434] sm:$0xf0] }
 0x2ef   :  { %5379 = vmatpush.bf16.msra.mxu1 %v7873_v30  ;;  %v8000_v30 = vld [vmem:[#allocation8 + $0x248] sm:$0xf]  ;;  %v8385_v60 = vor.u32 %v9473_v35, %v8384_v34  ;;  %v7938_v34 = vld [vmem:[#allocation8 + $0x1d8] sm:$0xf0] }
 0x2f0   :  { %v8001_v36 = vor.u32 %v9377_v47, %v8000_v30  ;;  %v8621_v47 = vor.u32 %v9530_v17, %v8618_v21  ;;  %v8176_v35 = vld [vmem:[#allocation8 + $0x3a8] sm:$0xf]  ;;  %v9509_v21 = vld [vmem:[#allocation8 + $0x674] sm:$0xf0] }
 0x2f1   :  { %5367 = vmatpush.bf16.msra.mxu0 %v7729_v54  ;;  %v9538_v54 = vld [vmem:[#allocation8 + $0x764] sm:$0xf]  ;;  %v8528_v17 = vld [vmem:[#allocation8 + $0x668] sm:$0xf] }
 0x2f2   :  { %5350 = vmatpush.bf16.msrb.mxu3 %v8685_v27  ;;  %5392 = vmatpush.bf16.msra.mxu2 %v8001_v36  ;;  %v8653_v33 = vor.u32 %v9538_v54, %v8650_v55  ;;  %v9526_v36 = vld [vmem:[#allocation8 + $0x704] sm:$0xf]  ;;  %v9517_v54 = vld [vmem:[#allocation8 + $0x6b4] sm:$0xf0]  ;;  %v8369_v55 = vor.u32 %v9469_v32, %v8368_v31 }
 0x2f3   :  { %5380 = vmatpush.bf16.msra.mxu1 %v7857_v58  ;;  %v8289_v58 = vor.u32 %v9449_v19, %v8288_v45  ;;  %v8208_v45 = vld [vmem:[#allocation8 + $0x3e8] sm:$0xf]  ;;  %v9505_v31 = vld [vmem:[#allocation8 + $0x654] sm:$0xf0] }
 0x2f5   :  { %5368 = vmatpush.bf16.msra.mxu0 %v7713_v6  ;;  %v5162_v62 = vpop.f32.mrf.mxu0  ;;  %v8634_v6 = vld [vmem:[#allocation8 + $0x750] sm:$0xf0] }
 0x2f6   :  { %5351 = vmatpush.bf16.msrb.mxu3 %v8669_v50  ;;  %v5163_v41 = vadd.f32 %v5162_v62, %v3865_v44  ;;  %5393 = vmatpush.bf16.msra.mxu2 %v7985_v0  ;;  %v8637_v5 = vor.u32 %v9534_v49, %v8634_v6  ;;  %v8602_v44 = vld [vmem:[#allocation8 + $0x710] sm:$0xf0]  ;;  %v8241_v50 = vor.u32 %v9437_v28, %v8240_v7  ;;  %v7826_v62 = vld [vmem:[#allocation8 + $0xf8] sm:$0xf0]  ;;  %v8192_v49 = vld [vmem:[#allocation8 + $0x3c8] sm:$0xf] }
 0x2f7   :  { %5381 = vmatpush.bf16.msra.mxu1 %v7841_v13  ;;  %v5175_v4 = vpop.f32.mrf.mxu1  ;;  %v8592_v13 = vld [vmem:[#allocation8 + $0x6e8] sm:$0xf]  ;;  %v8561_v0 = vor.u32 %v9517_v54, %v8560_v52  ;;  %v8529_v7 = vor.u32 %v9509_v21, %v8528_v17  ;;  %v9355_v28 = vld [vmem:[#allocation8 + $0x1ac] sm:$0xf]  ;;  %v9413_v54 = vld [vmem:[#allocation8 + $0x374] sm:$0xf0] }
 0x2f8   :  { %5369 = vmatmul.bf16.vlgmr.msra.gmra.mxu0 %v10012_v24  ;;  %v5176_v23 = vadd.f32 %v5175_v4, %v5163_v41  ;;  %v8225_v41 = vor.u32 %v9433_v57, %v8224_v56  ;;  %v9425_v4 = vld [vmem:[#allocation8 + $0x3d4] sm:$0xf0]  ;;  %v8544_v6 = vld [vmem:[#allocation8 + $0x688] sm:$0xf]  ;;  %v9391_v17 = vld [vmem:[#allocation8 + $0x2cc] sm:$0xf] }
 0x2f9   :  { %5413 = vmatpush.bf16.msrb.mxu0 %v8337_v53  ;;  %v9525_v53 = vld [vmem:[#allocation8 + $0x6f4] sm:$0xf0]  ;;  %5304 = vmatmul.bf16.vlgmr.msra.gmra.mxu3 %v10019_v29  ;;  %v8193_v42 = vor.u32 %v9425_v4, %v8192_v49  ;;  %v8144_v52 = vld [vmem:[#allocation8 + $0x368] sm:$0xf]  ;;  %v8066_v21 = vld [vmem:[#allocation8 + $0x2d8] sm:$0xf0] }
 0x2fa   :  { %5382 = vmatmul.bf16.vlgmr.msra.gmra.mxu1 %v10014_v1  ;;  %5352 = vmatpush.bf16.msrb.mxu3 %v8653_v33  ;;  %v8593_v9 = vor.u32 %v9525_v53, %v8592_v13  ;;  %v8209_v33 = vor.u32 %v9429_v51, %v8208_v45  ;;  %v7829_v53 = vor.u32 %v9331_v61, %v7826_v62  ;;  %v7906_v51 = vld [vmem:[#allocation8 + $0x198] sm:$0xf0]  ;;  %v9501_v56 = vld [vmem:[#allocation8 + $0x634] sm:$0xf0] }
 0x2fb   :  { %5426 = vmatpush.bf16.msrb.mxu1 %v8465_v14  ;;  %v8401_v14 = vor.u32 %v9477_v3, %v8400_v43  ;;  %5394 = vmatpush.bf16.msra.mxu2 %v7969_v63  ;;  %v9363_v43 = vld [vmem:[#allocation8 + $0x1ec] sm:$0xf]  ;;  %v7954_v3 = vld [vmem:[#allocation8 + $0x1f8] sm:$0xf0]  ;;  %v8145_v61 = vor.u32 %v9413_v54, %v8144_v52  ;;  %v9409_v49 = vld [vmem:[#allocation8 + $0x354] sm:$0xf0] }
 0x2fc   :  { %v9359_v63 = vld [vmem:[#allocation8 + $0x1cc] sm:$0xf]  ;;  %v9497_v4 = vld [vmem:[#allocation8 + $0x614] sm:$0xf0]  ;;  %v7714_v52 = vld [vmem:[#allocation8 + $0x18] sm:$0xf0] }
 0x2fd   :  { %5414 = vmatpush.bf16.msrb.mxu0 %v8321_v48  ;;  %v8576_v48 = vld [vmem:[#allocation8 + $0x6c8] sm:$0xf]  ;;  %v5164_v30 = vpop.f32.mrf.mxu0  ;;  %v9335_v54 = vld [vmem:[#allocation8 + $0x10c] sm:$0xf] }
 0x2fe   :  { %5353 = vmatpush.bf16.msrb.mxu3 %v8637_v5  ;;  %5395 = vmatmul.bf16.vlgmr.msra.gmra.mxu2 %v10016_v26  ;;  %v8545_v5 = vor.u32 %v9513_v22, %v8544_v6  ;;  %v9417_v30 = vld [vmem:[#allocation8 + $0x394] sm:$0xf0] }
 0x2ff   :  { %5427 = vmatpush.bf16.msrb.mxu1 %v8449_v2  ;;  %v5188_v2 = vpop.f32.mrf.mxu2  ;;  %5439 = vmatpush.bf16.msrb.mxu2 %v8593_v9  ;;  %v9421_v9 = vld [vmem:[#allocation8 + $0x3b4] sm:$0xf0] }
 0x300   :  { %v5189_v46 = vadd.f32 %v5188_v2, %v5176_v23  ;;  %v7957_v23 = vor.u32 %v9363_v43, %v7954_v3  ;;  %v7794_v2 = vld [vmem:[#allocation8 + $0xb8] sm:$0xf0]  ;;  %v8128_v43 = vld [vmem:[#allocation8 + $0x348] sm:$0xf] }
 0x301   :  { %5415 = vmatpush.bf16.msrb.mxu0 %v8305_v15  ;;  %v5201_v27 = vpop.f32.mrf.mxu3  ;;  %v5177_v15 = vpop.f32.mrf.mxu1 }
 0x302   :  { %v10083_v19 = vadd.f32 %v5201_v27, %v5189_v46  ;;  %5354 = vmatpush.bf16.msrb.mxu3 %v8621_v47  ;;  %v7922_v46 = vld [vmem:[#allocation8 + $0x1b8] sm:$0xf0]  ;;  %v8160_v27 = vld [vmem:[#allocation8 + $0x388] sm:$0xf] }
 0x303   :  { %5428 = vmatpush.bf16.msrb.mxu1 %v8433_v40  ;;  %v8577_v40 = vor.u32 %v9521_v39, %v8576_v48  ;;  %v7941_v48 = vor.u32 %v9359_v63, %v7938_v34  ;;  %v9323_v39 = vld [vmem:[#allocation8 + $0xac] sm:$0xf]  ;;  %v8512_v47 = vld [vmem:[#allocation8 + $0x648] sm:$0xf]  ;;  %v7925_v15 = vor.u32 %v9355_v28, %v7922_v46  ;;  %v7858_v28 = vld [vmem:[#allocation8 + $0x138] sm:$0xf0] }
 0x304   :  { %v7797_v32 = vor.u32 %v9323_v39, %v7794_v2  ;;  %v8513_v45 = vor.u32 %v9505_v31, %v8512_v47  ;;  %v9343_v63 = vld [vmem:[#allocation8 + $0x14c] sm:$0xf]  ;;  %v9401_v47 = vld [vmem:[#allocation8 + $0x314] sm:$0xf0]  ;;  %v8720_v31 = vld [vmem:[#allocation8 + $0x7e8] sm:$0xf] }
 0x305   :  { %5416 = vmatpush.bf16.msrb.mxu0 %v8289_v58  ;;  %v8352_v58 = vld [vmem:[#allocation8 + $0x508] sm:$0xf]  ;;  %5440 = vmatpush.bf16.msrb.mxu2 %v8577_v40  ;;  %v9319_v40 = vld [vmem:[#allocation8 + $0x8c] sm:$0xf] }
 0x307   :  { %5429 = vmatpush.bf16.msrb.mxu1 %v8417_v59  ;;  %v8605_v59 = vor.u32 %v9526_v36, %v8602_v44  ;;  %v5190_v38 = vpop.f32.mrf.mxu2  ;;  %v7778_v36 = vld [vmem:[#allocation8 + $0x98] sm:$0xf0]  ;;  %v8161_v44 = vor.u32 %v9417_v30, %v8160_v27  ;;  %v8069_v27 = vor.u32 %v9391_v17, %v8066_v21  ;;  %v8096_v30 = vld [vmem:[#allocation8 + $0x308] sm:$0xf]  ;;  %v9483_v17 = vld [vmem:[#allocation8 + $0x5ac] sm:$0xf] }
 0x308   :  { %v7781_v57 = vor.u32 %v9319_v40, %v7778_v36  ;;  %v9395_v38 = vld [vmem:[#allocation8 + $0x2ec] sm:$0xf]  ;;  %v8050_v36 = vld [vmem:[#allocation8 + $0x2b8] sm:$0xf0] }
 0x309   :  { %5417 = vmatpush.bf16.msrb.mxu0 %v8273_v8  ;;  %v8353_v8 = vor.u32 %v9465_v20, %v8352_v58  ;;  %v5203_v13 = vpop.f32.mrf.mxu3  ;;  %5355 = vmatpush.bf16.msrb.mxu3 %v8605_v59  ;;  %v9315_v59 = vld [vmem:[#allocation8 + $0x6c] sm:$0xf]  ;;  %v7762_v20 = vld [vmem:[#allocation8 + $0x78] sm:$0xf0] }
 0x30a   :  { %5441 = vmatpush.bf16.msrb.mxu2 %v8561_v0  ;;  %v7890_v0 = vld [vmem:[#allocation8 + $0x178] sm:$0xf0]  ;;  %v7765_v13 = vor.u32 %v9315_v59, %v7762_v20  ;;  %v9387_v40 = vld [vmem:[#allocation8 + $0x2ac] sm:$0xf] }
 0x30b   :  { %5430 = vmatpush.bf16.msrb.mxu1 %v8401_v14  ;;  %v9327_v14 = vld [vmem:[#allocation8 + $0xcc] sm:$0xf]  ;;  %v8338_v59 = vld [vmem:[#allocation8 + $0x4f8] sm:$0xf0] }
 0x30c   :  { %5356 = vmatmul.bf16.vlgmr.msrb.gmra.mxu3 %v10074_v18  ;;  %v9491_v20 = vld [vmem:[#allocation8 + $0x5ec] sm:$0xf] }
 0x30d   :  { %5418 = vmatpush.bf16.msrb.mxu0 %v8257_v25  ;;  %5400 = vmatpush.bf16.msra.mxu3 %v8209_v33  ;;  %v7813_v25 = vor.u32 %v9327_v14, %v7810_v16  ;;  %v9347_v33 = vld [vmem:[#allocation8 + $0x16c] sm:$0xf]  ;;  %v8129_v14 = vor.u32 %v9409_v49, %v8128_v43 }
 0x30e   :  { %5442 = vmatpush.bf16.msrb.mxu2 %v8545_v5  ;;  %v7746_v5 = vld [vmem:[#allocation8 + $0x58] sm:$0xf0]  ;;  %v9383_v43 = vld [vmem:[#allocation8 + $0x28c] sm:$0xf] }
 0x30f   :  { %5431 = vmatpush.bf16.msrb.mxu1 %v8385_v60  ;;  %v8177_v60 = vor.u32 %v9421_v9, %v8176_v35  ;;  %v7874_v35 = vld [vmem:[#allocation8 + $0x158] sm:$0xf0]  ;;  %v8112_v9 = vld [vmem:[#allocation8 + $0x328] sm:$0xf] }
 0x310   :  { %v7877_v39 = vor.u32 %v9343_v63, %v7874_v35 }
 0x311   :  { %5419 = vmatpush.bf16.msrb.mxu0 %v8241_v50  ;;  %5401 = vmatpush.bf16.msra.mxu3 %v8193_v42  ;;  %v9351_v50 = vld [vmem:[#allocation8 + $0x18c] sm:$0xf] }
 0x312   :  { %5443 = vmatpush.bf16.msrb.mxu2 %v8529_v7  ;;  %v7909_v58 = vor.u32 %v9351_v50, %v7906_v51  ;;  %v9311_v42 = vld [vmem:[#allocation8 + $0x4c] sm:$0xf]  ;;  %v8097_v51 = vor.u32 %v9401_v47, %v8096_v30  ;;  %v8290_v30 = vld [vmem:[#allocation8 + $0x498] sm:$0xf0] }
 0x313   :  { %5432 = vmatpush.bf16.msrb.mxu1 %v8369_v55  ;;  %v8496_v55 = vld [vmem:[#allocation8 + $0x628] sm:$0xf]  ;;  %v9339_v7 = vld [vmem:[#allocation8 + $0x12c] sm:$0xf] }
 0x314   :  { %v8497_v62 = vor.u32 %v9501_v56, %v8496_v55  ;;  %v7861_v50 = vor.u32 %v9339_v7, %v7858_v28  ;;  %v7842_v55 = vld [vmem:[#allocation8 + $0x118] sm:$0xf0]  ;;  %v9479_v47 = vld [vmem:[#allocation8 + $0x58c] sm:$0xf] }
 0x315   :  { %5420 = vmatpush.bf16.msrb.mxu0 %v8225_v41  ;;  %5402 = vmatpush.bf16.msra.mxu3 %v8177_v60  ;;  %v5214_v3 = vpop.f32.mrf.mxu0  ;;  %v8480_v41 = vld [vmem:[#allocation8 + $0x608] sm:$0xf]  ;;  %v7730_v60 = vld [vmem:[#allocation8 + $0x38] sm:$0xf0]  ;;  %v7845_v49 = vor.u32 %v9335_v54, %v7842_v55  ;;  %v9475_v54 = vld [vmem:[#allocation8 + $0x56c] sm:$0xf] }
 0x316   :  { %5444 = vmatpush.bf16.msrb.mxu2 %v8513_v45  ;;  %v5215_v6 = vadd.f32 %v5214_v3, %v10083_v19  ;;  %v8481_v16 = vor.u32 %v9497_v4, %v8480_v41  ;;  %v9405_v19 = vld [vmem:[#allocation8 + $0x334] sm:$0xf0]  ;;  %v9303_v45 = vld [vmem:[#allocation8 + $0xc] sm:$0xf]  ;;  %v8034_v3 = vld [vmem:[#allocation8 + $0x298] sm:$0xf0] }
 0x317   :  { %5433 = vmatpush.bf16.msrb.mxu1 %v8353_v8  ;;  %v5227_v22 = vpop.f32.mrf.mxu1  ;;  %v8082_v8 = vld [vmem:[#allocation8 + $0x2f8] sm:$0xf0]  ;;  %v8113_v2 = vor.u32 %v9405_v19, %v8112_v9  ;;  %v9451_v9 = vld [vmem:[#allocation8 + $0x4ac] sm:$0xf] }
 0x318   :  { %5421 = vmatmul.bf16.vlgmr.msrb.gmra.mxu0 %v10034_v37  ;;  %v8085_v34 = vor.u32 %v9395_v38, %v8082_v8  ;;  %v8322_v38 = vld [vmem:[#allocation8 + $0x4d8] sm:$0xf0]  ;;  %v9487_v8 = vld [vmem:[#allocation8 + $0x5cc] sm:$0xf] }
 0x319   :  { %5465 = vmatpush.bf16.msra.mxu0 %v7829_v53  ;;  %5403 = vmatpush.bf16.msra.mxu3 %v8161_v44  ;;  %v7893_v53 = vor.u32 %v9347_v33, %v7890_v0  ;;  %v9553_v33 = vld [vmem:[#allocation8 + $0x7d4] sm:$0xf0]  ;;  %v7717_v0 = vor.u32 %v9303_v45, %v7714_v52  ;;  %v8306_v19 = vld [vmem:[#allocation8 + $0x4b8] sm:$0xf0] }
 0x31a   :  { %5434 = vmatmul.bf16.vlgmr.msrb.gmra.mxu1 %v10036_v11  ;;  %5445 = vmatpush.bf16.msrb.mxu2 %v8497_v62  ;;  %v8704_v62 = vld [vmem:[#allocation8 + $0x7c8] sm:$0xf]  ;;  %v8309_v7 = vor.u32 %v9451_v9, %v8306_v19  ;;  %v8274_v52 = vld [vmem:[#allocation8 + $0x478] sm:$0xf0] }
 0x31b   :  { %5478 = vmatpush.bf16.msra.mxu1 %v7957_v23  ;;  %v10090_v23 = vadd.f32 %v5227_v22, %v5215_v6  ;;  %v8705_v6 = vor.u32 %v9553_v33, %v8704_v62  ;;  %v9455_v22 = vld [vmem:[#allocation8 + $0x4cc] sm:$0xf]  ;;  %v7970_v33 = vld [vmem:[#allocation8 + $0x218] sm:$0xf0] }
 0x31c   :  { %v8325_v63 = vor.u32 %v9455_v22, %v8322_v38  ;;  %v9367_v62 = vld [vmem:[#allocation8 + $0x20c] sm:$0xf]  ;;  %v8258_v22 = vld [vmem:[#allocation8 + $0x458] sm:$0xf0] }
 0x31d   :  { %5466 = vmatpush.bf16.msra.mxu0 %v7813_v25  ;;  %5404 = vmatpush.bf16.msra.mxu3 %v8145_v61  ;;  %v7749_v25 = vor.u32 %v9311_v42, %v7746_v5  ;;  %v5216_v46 = vpop.f32.mrf.mxu0  ;;  %v8466_v61 = vld [vmem:[#allocation8 + $0x5f8] sm:$0xf0]  ;;  %v9379_v42 = vld [vmem:[#allocation8 + $0x26c] sm:$0xf]  ;;  %v7973_v38 = vor.u32 %v9367_v62, %v7970_v33  ;;  %v9564_v62 = vld [vmem:[#allocation11 + $0x30] sm:$0xff] }
 0x31e   :  { %5446 = vmatpush.bf16.msrb.mxu2 %v8481_v16  ;;  %v8469_v4 = vor.u32 %v9491_v20, %v8466_v61  ;;  %v9549_v16 = vld [vmem:[#allocation8 + $0x7b4] sm:$0xf0]  ;;  %v8018_v5 = vld [vmem:[#allocation8 + $0x278] sm:$0xf0] }
 0x31f   :  { %5479 = vmatpush.bf16.msra.mxu1 %v7941_v48  ;;  %v9307_v48 = vld [vmem:[#allocation8 + $0x2c] sm:$0xf]  ;;  %v8021_v21 = vor.u32 %v9379_v42, %v8018_v5  ;;  %v8242_v9 = vld [vmem:[#allocation8 + $0x438] sm:$0xf0] }
 0x320   :  { %v7733_v44 = vor.u32 %v9307_v48, %v7730_v60  ;;  %v8672_v48 = vld [vmem:[#allocation8 + $0x788] sm:$0xf]  ;;  %v8002_v60 = vld [vmem:[#allocation8 + $0x258] sm:$0xf0]  ;;  %v9519_v5 = vld [vmem:[#allocation8 + $0x6cc] sm:$0xf] }
 0x321   :  { %5467 = vmatpush.bf16.msra.mxu0 %v7797_v32  ;;  %5405 = vmatpush.bf16.msra.mxu3 %v8129_v14  ;;  %v5229_v32 = vpop.f32.mrf.mxu1  ;;  %v8688_v14 = vld [vmem:[#allocation8 + $0x7a8] sm:$0xf] }
 0x322   :  { %5491 = vmatpush.bf16.msra.mxu2 %v8085_v34  ;;  %v8689_v35 = vor.u32 %v9549_v16, %v8688_v14  ;;  %v8656_v32 = vld [vmem:[#allocation8 + $0x768] sm:$0xf]  ;;  %v9533_v16 = vld [vmem:[#allocation8 + $0x734] sm:$0xf0] }
 0x323   :  { %5480 = vmatpush.bf16.msra.mxu1 %v7925_v15  ;;  %v9557_v15 = vld [vmem:[#allocation8 + $0x7f4] sm:$0xf0]  ;;  %5447 = vmatmul.bf16.vlgmr.msrb.gmra.mxu2 %v10059_v10  ;;  %v8624_v14 = vld [vmem:[#allocation8 + $0x728] sm:$0xf] }
 0x324   :  { %v8721_v56 = vor.u32 %v9557_v15, %v8720_v31  ;;  %v9541_v15 = vld [vmem:[#allocation8 + $0x774] sm:$0xf0] }
 0x325   :  { %5468 = vmatpush.bf16.msra.mxu0 %v7781_v57  ;;  %5406 = vmatpush.bf16.msra.mxu3 %v8113_v2  ;;  %v8053_v57 = vor.u32 %v9387_v40, %v8050_v36  ;;  %v9375_v2 = vld [vmem:[#allocation8 + $0x24c] sm:$0xf]  ;;  %v3866_v40 = vperm.slane %v10078_v12, 1 }
 0x326   :  { %5492 = vmatpush.bf16.msra.mxu2 %v8069_v27  ;;  %v9447_v27 = vld [vmem:[#allocation8 + $0x48c] sm:$0xf]  ;;  %v8005_v31 = vor.u32 %v9375_v2, %v8002_v60  ;;  %v8608_v2 = vld [vmem:[#allocation8 + $0x708] sm:$0xf]  ;;  %v9529_v60 = vld [vmem:[#allocation8 + $0x714] sm:$0xf0] }
 0x327   :  { %5481 = vmatpush.bf16.msra.mxu1 %v7909_v58  ;;  %v9459_v58 = vld [vmem:[#allocation8 + $0x4ec] sm:$0xf] }
 0x328   :  { %v8341_v41 = vor.u32 %v9459_v58, %v8338_v59  ;;  %v9371_v36 = vld [vmem:[#allocation8 + $0x22c] sm:$0xf]  ;;  %v8640_v58 = vld [vmem:[#allocation8 + $0x748] sm:$0xf]  ;;  %v9537_v59 = vld [vmem:[#allocation8 + $0x754] sm:$0xf0] }
 0x329   :  { %5469 = vmatpush.bf16.msra.mxu0 %v7765_v13  ;;  %5407 = vmatpush.bf16.msra.mxu3 %v8097_v51  ;;  %v8037_v13 = vor.u32 %v9383_v43, %v8034_v3  ;;  %v9443_v51 = vld [vmem:[#allocation8 + $0x46c] sm:$0xf]  ;;  %v8594_v3 = vld [vmem:[#allocation8 + $0x6f8] sm:$0xf0] }
 0x32a   :  { %5493 = vmatpush.bf16.msra.mxu2 %v8053_v57  ;;  %v8402_v57 = vld [vmem:[#allocation8 + $0x578] sm:$0xf0]  ;;  %v9523_v43 = vld [vmem:[#allocation8 + $0x6ec] sm:$0xf] }
 0x32b   :  { %5482 = vmatpush.bf16.msra.mxu1 %v7893_v53  ;;  %v8450_v53 = vld [vmem:[#allocation8 + $0x5d8] sm:$0xf0] }
 0x32c   :  { %5408 = vmatmul.bf16.vlgmr.msra.gmra.mxu3 %v10019_v29  ;;  %v8453_v34 = vor.u32 %v9487_v8, %v8450_v53  ;;  %v9471_v8 = vld [vmem:[#allocation8 + $0x54c] sm:$0xf]  ;;  %v8597_v53 = vor.u32 %v9523_v43, %v8594_v3  ;;  %v8162_v3 = vld [vmem:[#allocation8 + $0x398] sm:$0xf0] }
 0x32d   :  { %5470 = vmatpush.bf16.msra.mxu0 %v7749_v25  ;;  %5452 = vmatpush.bf16.msrb.mxu3 %v8721_v56  ;;  %v8434_v25 = vld [vmem:[#allocation8 + $0x5b8] sm:$0xf0]  ;;  %v9415_v43 = vld [vmem:[#allocation8 + $0x38c] sm:$0xf] }
 0x32e   :  { %5494 = vmatpush.bf16.msra.mxu2 %v8037_v13  ;;  %v8437_v28 = vor.u32 %v9483_v17, %v8434_v25  ;;  %v8386_v13 = vld [vmem:[#allocation8 + $0x558] sm:$0xf0]  ;;  %v8625_v17 = vor.u32 %v9533_v16, %v8624_v14 }
 0x32f   :  { %5483 = vmatpush.bf16.msra.mxu1 %v7877_v39  ;;  %v9545_v39 = vld [vmem:[#allocation8 + $0x794] sm:$0xf0]  ;;  %v8370_v25 = vld [vmem:[#allocation8 + $0x538] sm:$0xf0] }
 0x330   :  { %v8673_v46 = vor.u32 %v9545_v39, %v8672_v48  ;;  %v8498_v14 = vld [vmem:[#allocation8 + $0x638] sm:$0xf0] }
 0x331   :  { %5471 = vmatpush.bf16.msra.mxu0 %v7733_v44  ;;  %5453 = vmatpush.bf16.msrb.mxu3 %v8705_v6  ;;  %v8293_v44 = vor.u32 %v9447_v27, %v8290_v30  ;;  %v9439_v6 = vld [vmem:[#allocation8 + $0x44c] sm:$0xf]  ;;  %v8562_v30 = vld [vmem:[#allocation8 + $0x6b8] sm:$0xf0] }
 0x332   :  { %5495 = vmatpush.bf16.msra.mxu2 %v8021_v21  ;;  %v8261_v42 = vor.u32 %v9439_v6, %v8258_v22  ;;  %v9467_v21 = vld [vmem:[#allocation8 + $0x52c] sm:$0xf]  ;;  %v8165_v22 = vor.u32 %v9415_v43, %v8162_v3  ;;  %v9568_v43 = vld [vmem:[#allocation11 + $0x50] sm:$0xff] }
 0x333   :  { %5484 = vmatpush.bf16.msra.mxu1 %v7861_v50  ;;  %v8657_v50 = vor.u32 %v9541_v15, %v8656_v32  ;;  %v9515_v27 = vld [vmem:[#allocation8 + $0x6ac] sm:$0xf]  ;;  %v8609_v32 = vor.u32 %v9529_v60, %v8608_v2  ;;  %v9573_v2 = vld [vmem:[#allocation11 + $0x78] sm:$0xff] }
 0x334   :  { %v9463_v15 = vld [vmem:[#allocation8 + $0x50c] sm:$0xf] }
 0x335   :  { %5472 = vmatpush.bf16.msra.mxu0 %v7717_v0  ;;  %5454 = vmatpush.bf16.msrb.mxu3 %v8689_v35  ;;  %v5266_v55 = vpop.f32.mrf.mxu0  ;;  %v8277_v0 = vor.u32 %v9443_v51, %v8274_v52  ;;  %v9435_v35 = vld [vmem:[#allocation8 + $0x42c] sm:$0xf]  ;;  %v8546_v52 = vld [vmem:[#allocation8 + $0x698] sm:$0xf0] }
 0x336   :  { %5496 = vmatpush.bf16.msra.mxu2 %v8005_v31  ;;  %v5267_v20 = vadd.f32 %v5266_v55, %v3866_v40  ;;  %v9431_v31 = vld [vmem:[#allocation8 + $0x40c] sm:$0xf]  ;;  %v8354_v40 = vld [vmem:[#allocation8 + $0x518] sm:$0xf0] }
 0x337   :  { %5485 = vmatpush.bf16.msra.mxu1 %v7845_v49  ;;  %v5279_v61 = vpop.f32.mrf.mxu1  ;;  %v9511_v51 = vld [vmem:[#allocation8 + $0x68c] sm:$0xf] }
 0x338   :  { %5473 = vmatmul.bf16.vlgmr.msra.gmra.mxu0 %v10012_v24  ;;  %v8418_v24 = vld [vmem:[#allocation8 + $0x598] sm:$0xf0]  ;;  %v10097_v49 = vadd.f32 %v5279_v61, %v5267_v20  ;;  %v9563_v6 = vld [vmem:[#allocation11 + $0x28] sm:$0xff] }
 0x339   :  { %5517 = vmatpush.bf16.msrb.mxu0 %v8341_v41  ;;  %5455 = vmatpush.bf16.msrb.mxu3 %v8673_v46  ;;  %v8421_v45 = vor.u32 %v9479_v47, %v8418_v24  ;;  %v8405_v41 = vor.u32 %v9475_v54, %v8402_v57  ;;  %v8210_v46 = vld [vmem:[#allocation8 + $0x3f8] sm:$0xf0]  ;;  %v8373_v47 = vor.u32 %v9467_v21, %v8370_v25  ;;  %v9419_v57 = vld [vmem:[#allocation8 + $0x3ac] sm:$0xf] }
 0x33a   :  { %5486 = vmatmul.bf16.vlgmr.msra.gmra.mxu1 %v10014_v1  ;;  %v7986_v1 = vld [vmem:[#allocation8 + $0x238] sm:$0xf0]  ;;  %v8357_v54 = vor.u32 %v9463_v15, %v8354_v40  ;;  %v9559_v15 = vld [vmem:[#allocation11 + $0x8] sm:$0xff] }
 0x33b   :  { %5530 = vmatpush.bf16.msrb.mxu1 %v8469_v4  ;;  %v7989_v56 = vor.u32 %v9371_v36, %v7986_v1  ;;  %v8641_v4 = vor.u32 %v9537_v59, %v8640_v58  ;;  %v8226_v24 = vld [vmem:[#allocation8 + $0x418] sm:$0xf0]  ;;  %v8565_v1 = vor.u32 %v9515_v27, %v8562_v30  ;;  %v9507_v59 = vld [vmem:[#allocation8 + $0x66c] sm:$0xf] }
 0x33c   :  { %v8178_v58 = vld [vmem:[#allocation8 + $0x3b8] sm:$0xf0]  ;;  %v9399_v30 = vld [vmem:[#allocation8 + $0x30c] sm:$0xf] }
 0x33d   :  { %5518 = vmatpush.bf16.msrb.mxu0 %v8325_v63  ;;  %5456 = vmatpush.bf16.msrb.mxu3 %v8657_v50  ;;  %v8578_v63 = vld [vmem:[#allocation8 + $0x6d8] sm:$0xf0]  ;;  %v5268_v19 = vpop.f32.mrf.mxu0  ;;  %v8181_v33 = vor.u32 %v9419_v57, %v8178_v58 }
 0x33e   :  { %5497 = vmatpush.bf16.msra.mxu2 %v7989_v56  ;;  %v8581_v39 = vor.u32 %v9519_v5, %v8578_v63  ;;  %v8194_v50 = vld [vmem:[#allocation8 + $0x3d8] sm:$0xf0]  ;;  %v8549_v56 = vor.u32 %v9511_v51, %v8546_v52  ;;  %v10101_v61 = vpop.f32.mrf.mxu2  ;;  %v9407_v63 = vld [vmem:[#allocation8 + $0x34c] sm:$0xf]  ;;  %v9558_v51 = vld [vmem:[#allocation11] sm:$0xff] }
 0x33f   :  { %5531 = vmatpush.bf16.msrb.mxu1 %v8453_v34  ;;  %v8389_v34 = vor.u32 %v9471_v8, %v8386_v13  ;;  %v5281_v48 = vpop.f32.mrf.mxu1  ;;  %v8530_v20 = vld [vmem:[#allocation8 + $0x678] sm:$0xf0]  ;;  %v9411_v8 = vld [vmem:[#allocation8 + $0x36c] sm:$0xf]  ;;  %v5241_v3 = vadd.f32 %v10101_v61, %v10090_v23  ;;  %v9566_v61 = vld [vmem:[#allocation11 + $0x40] sm:$0xff] }
 0x340   :  { %v8146_v13 = vld [vmem:[#allocation8 + $0x378] sm:$0xf0]  ;;  %v9403_v48 = vld [vmem:[#allocation8 + $0x32c] sm:$0xf] }
 0x341   :  { %5519 = vmatpush.bf16.msrb.mxu0 %v8309_v7  ;;  %5457 = vmatpush.bf16.msrb.mxu3 %v8641_v4  ;;  %v9427_v7 = vld [vmem:[#allocation8 + $0x3ec] sm:$0xf]  ;;  %v8514_v4 = vld [vmem:[#allocation8 + $0x658] sm:$0xf0] }
 0x342   :  { %5498 = vmatpush.bf16.msra.mxu2 %v7973_v38  ;;  %v8213_v36 = vor.u32 %v9427_v7, %v8210_v46  ;;  %v8482_v19 = vld [vmem:[#allocation8 + $0x618] sm:$0xf0]  ;;  %v9560_v7 = vld [vmem:[#allocation11 + $0x10] sm:$0xff] }
 0x343   :  { %5532 = vmatpush.bf16.msrb.mxu1 %v8437_v28  ;;  %v8245_v28 = vor.u32 %v9435_v35, %v8242_v9  ;;  %v8130_v35 = vld [vmem:[#allocation8 + $0x358] sm:$0xf0]  ;;  %v9495_v9 = vld [vmem:[#allocation8 + $0x60c] sm:$0xf] }
 0x344   :  { %v8133_v21 = vor.u32 %v9407_v63, %v8130_v35  ;;  %v8485_v25 = vor.u32 %v9495_v9, %v8482_v19  ;;  %v8674_v57 = vld [vmem:[#allocation8 + $0x798] sm:$0xf0] }
 0x345   :  { %5520 = vmatpush.bf16.msrb.mxu0 %v8293_v44  ;;  %5499 = vmatmul.bf16.vlgmr.msra.gmra.mxu2 %v10016_v26  ;;  %v9423_v44 = vld [vmem:[#allocation8 + $0x3cc] sm:$0xf]  ;;  %v9565_v26 = vld [vmem:[#allocation11 + $0x38] sm:$0xff] }
 0x346   :  { %5543 = vmatpush.bf16.msrb.mxu2 %v8597_v53  ;;  %5458 = vmatpush.bf16.msrb.mxu3 %v8625_v17  ;;  %v8197_v55 = vor.u32 %v9423_v44, %v8194_v50  ;;  %v9499_v53 = vld [vmem:[#allocation8 + $0x62c] sm:$0xf]  ;;  %v5242_v16 = vpop.f32.mrf.mxu2  ;;  %v9561_v17 = vld [vmem:[#allocation11 + $0x18] sm:$0xff] }
 0x347   :  { %5533 = vmatpush.bf16.msrb.mxu1 %v8421_v45  ;;  %v8229_v45 = vor.u32 %v9431_v31, %v8226_v24  ;;  %v8501_v5 = vor.u32 %v9499_v53, %v8498_v14  ;;  %v9572_v31 = vld [vmem:[#allocation11 + $0x70] sm:$0xff]  ;;  %v9555_v24 = vld [vmem:[#allocation8 + $0x7ec] sm:$0xf]  ;;  %v8706_v44 = vld [vmem:[#allocation8 + $0x7d8] sm:$0xf0] }
 0x348   :  { %v9569_v58 = vld [vmem:[#allocation11 + $0x58] sm:$0xff] }
 0x349   :  { %5521 = vmatpush.bf16.msrb.mxu0 %v8277_v0  ;;  %v8533_v0 = vor.u32 %v9507_v59, %v8530_v20  ;;  %v8626_v23 = vld [vmem:[#allocation8 + $0x738] sm:$0xf0] }
 0x34a   :  { %5544 = vmatpush.bf16.msrb.mxu2 %v8581_v39  ;;  %5459 = vmatpush.bf16.msrb.mxu3 %v8609_v32  ;;  %v8114_v39 = vld [vmem:[#allocation8 + $0x338] sm:$0xf0] }
 0x34b   :  { %5534 = vmatpush.bf16.msrb.mxu1 %v8405_v41  ;;  %v9503_v41 = vld [vmem:[#allocation8 + $0x64c] sm:$0xf]  ;;  %v8117_v46 = vor.u32 %v9403_v48, %v8114_v39  ;;  %v8722_v32 = vld [vmem:[#allocation8 + $0x7f8] sm:$0xf0] }
 0x34c   :  { %v8517_v38 = vor.u32 %v9503_v41, %v8514_v4 }
 0x34d   :  { %5522 = vmatpush.bf16.msrb.mxu0 %v8261_v42  ;;  %5460 = vmatmul.bf16.vlgmr.msrb.gmra.mxu3 %v10074_v18  ;;  %v9562_v42 = vld [vmem:[#allocation11 + $0x20] sm:$0xff] }
 0x34e   :  { %5504 = vmatpush.bf16.msra.mxu3 %v8213_v36  ;;  %5545 = vmatpush.bf16.msrb.mxu2 %v8565_v1  ;;  %v10109_v60 = vpop.f32.mrf.mxu2  ;;  %v8725_v36 = vor.u32 %v9555_v24, %v8722_v32  ;;  %v9551_v1 = vld [vmem:[#allocation8 + $0x7cc] sm:$0xf] }
 0x34f   :  { %5535 = vmatpush.bf16.msrb.mxu1 %v8389_v34  ;;  %v8709_v52 = vor.u32 %v9551_v1, %v8706_v44  ;;  %v5293_v39 = vadd.f32 %v10109_v60, %v10097_v49 }
 0x351   :  { %5523 = vmatpush.bf16.msrb.mxu0 %v8245_v28 }
 0x352   :  { %5505 = vmatpush.bf16.msra.mxu3 %v8197_v55  ;;  %5546 = vmatpush.bf16.msrb.mxu2 %v8549_v56  ;;  %v8690_v55 = vld [vmem:[#allocation8 + $0x7b8] sm:$0xf0]  ;;  %v9543_v56 = vld [vmem:[#allocation8 + $0x78c] sm:$0xf] }
 0x353   :  { %5536 = vmatpush.bf16.msrb.mxu1 %v8373_v47  ;;  %v8098_v47 = vld [vmem:[#allocation8 + $0x318] sm:$0xf0]  ;;  %v8677_v20 = vor.u32 %v9543_v56, %v8674_v57 }
 0x354   :  { %v8101_v40 = vor.u32 %v9399_v30, %v8098_v47 }
 0x355   :  { %5524 = vmatpush.bf16.msrb.mxu0 %v8229_v45  ;;  %v9571_v45 = vld [vmem:[#allocation11 + $0x68] sm:$0xff] }
 0x356   :  { %5506 = vmatpush.bf16.msra.mxu3 %v8181_v33  ;;  %5547 = vmatpush.bf16.msrb.mxu2 %v8533_v0  ;;  %v5294_v50 = vpop.f32.mrf.mxu2  ;;  %v9539_v33 = vld [vmem:[#allocation8 + $0x76c] sm:$0xf]  ;;  %v8658_v0 = vld [vmem:[#allocation8 + $0x778] sm:$0xf0] }
 0x357   :  { %5537 = vmatpush.bf16.msrb.mxu1 %v8357_v54  ;;  %v10107_v34 = vpop.f32.mrf.mxu1  ;;  %v9570_v54 = vld [vmem:[#allocation11 + $0x60] sm:$0xff]  ;;  %v8661_v41 = vor.u32 %v9539_v33, %v8658_v0  ;;  %v9576_v50 = vld [vmem:[#allocation11 + $0x90] sm:$0xff] }
 0x358   :  { %5525 = vmatmul.bf16.vlgmr.msrb.gmra.mxu0 %v10034_v37  ;;  %v10105_v37 = vpop.f32.mrf.mxu0 }
 0x359   :  { %5837 = vmatpush.bf16.msra.mxu0 %v9565_v26  ;;  %v9547_v26 = vld [vmem:[#allocation8 + $0x7ac] sm:$0xf] }
 0x35a   :  { %5538 = vmatmul.bf16.vlgmr.msrb.gmra.mxu1 %v10036_v11  ;;  %5507 = vmatpush.bf16.msra.mxu3 %v8165_v22  ;;  %v8149_v11 = vor.u32 %v9411_v8, %v8146_v13  ;;  %v8642_v8 = vld [vmem:[#allocation8 + $0x758] sm:$0xf0]  ;;  %v9567_v13 = vld [vmem:[#allocation11 + $0x48] sm:$0xff] }
 0x35b   :  { %5548 = vmatpush.bf16.msrb.mxu2 %v8517_v38  ;;  %5850 = vmatpush.bf16.msra.mxu1 %v9573_v2  ;;  %v9535_v38 = vld [vmem:[#allocation8 + $0x74c] sm:$0xf] }
 0x35d   :  { %5838 = vmatpush.bf16.msra.mxu0 %v9564_v62  ;;  %v3867_v62 = vperm.slane %v10078_v12, 2 }
 0x35e   :  { %5508 = vmatpush.bf16.msra.mxu3 %v8149_v11  ;;  %v9531_v11 = vld [vmem:[#allocation8 + $0x72c] sm:$0xf] }
 0x35f   :  { %5549 = vmatpush.bf16.msrb.mxu2 %v8501_v5  ;;  %v5333_v27 = vpop.f32.mrf.mxu1  ;;  %5851 = vmatpush.bf16.msra.mxu1 %v9572_v31  ;;  %v5344_v59 = vpop.f32.mrf.mxu2  ;;  %v8629_v35 = vor.u32 %v9531_v11, %v8626_v23 }
 0x360   :  { %v5320_v28 = vpop.f32.mrf.mxu0 }
 0x361   :  { %5839 = vmatpush.bf16.msra.mxu0 %v9563_v6 }
 0x362   :  { %5509 = vmatpush.bf16.msra.mxu3 %v8133_v21  ;;  %v8610_v21 = vld [vmem:[#allocation8 + $0x718] sm:$0xf0] }
 0x363   :  { %5550 = vmatpush.bf16.msrb.mxu2 %v8485_v25  ;;  %5852 = vmatpush.bf16.msra.mxu1 %v9571_v45  ;;  %v9578_v45 = vld [vmem:[#allocation11 + $0xa0] sm:$0xff] }
 0x365   :  { %5840 = vmatpush.bf16.msra.mxu0 %v9562_v42  ;;  %v8645_v42 = vor.u32 %v9535_v38, %v8642_v8 }
 0x366   :  { %5551 = vmatmul.bf16.vlgmr.msrb.gmra.mxu2 %v10059_v10  ;;  %5510 = vmatpush.bf16.msra.mxu3 %v8117_v46  ;;  %v8693_v10 = vor.u32 %v9547_v26, %v8690_v55  ;;  %v9575_v26 = vld [vmem:[#allocation11 + $0x88] sm:$0xff] }
 0x367   :  { %5853 = vmatpush.bf16.msra.mxu1 %v9570_v54  ;;  %v5346_v12 = vpop.f32.mrf.mxu2 }
 0x369   :  { %5841 = vmatpush.bf16.msra.mxu0 %v9561_v17  ;;  %v9527_v17 = vld [vmem:[#allocation8 + $0x70c] sm:$0xf] }
 0x36a   :  { %5511 = vmatpush.bf16.msra.mxu3 %v8101_v40  ;;  %v8613_v25 = vor.u32 %v9527_v17, %v8610_v21  ;;  %v9581_v40 = vld [vmem:[#allocation11 + $0xb8] sm:$0xff]  ;;  %v9583_v17 = vld [vmem:[#allocation11 + $0xc8] sm:$0xff]  ;;  %v9582_v21 = vld [vmem:[#allocation11 + $0xc0] sm:$0xff] }
 0x36b   :  { %5854 = vmatpush.bf16.msra.mxu1 %v9569_v58  ;;  %5863 = vmatpush.bf16.msra.mxu2 %v9581_v40 }
 0x36c   :  { %v5253_v22 = vpop.f32.mrf.mxu3 }
 0x36d   :  { %5842 = vmatpush.bf16.msra.mxu0 %v9560_v7  ;;  %5512 = vmatmul.bf16.vlgmr.msra.gmra.mxu3 %v10019_v29  ;;  %v5254_v53 = vadd.f32 %v5253_v22, %v5241_v3 }
 0x36e   :  { %5556 = vmatpush.bf16.msrb.mxu3 %v8725_v36 }
 0x36f   :  { %5855 = vmatpush.bf16.msra.mxu1 %v9568_v43  ;;  %v5569_v16 = vmax.f32 %v5254_v53, 0.0  ;;  %v9589_v53 = vld [vmem:[#allocation11 + $0xf8] sm:$0xff] }
 0x371   :  { %5843 = vmatpush.bf16.msra.mxu0 %v9559_v15  ;;  %v5573_v5 = vpack.c.bf16 %v5569_v16, %v5569_v16 }
 0x372   :  { %5557 = vmatpush.bf16.msrb.mxu3 %v8709_v52  ;;  %v9607_v52 = vld [vmem:[#allocation10] sm:$0xf] }
 0x373   :  { %5856 = vmatpush.bf16.msra.mxu1 %v9567_v13  ;;  %v3868_v54 = vperm.slane %v9607_v52, 3 }
 0x374   :  { %v5255_v19 = vpop.f32.mrf.mxu3 }
 0x375   :  { %5844 = vmatpush.bf16.msra.mxu0 %v9558_v51  ;;  %v5370_v29 = vpop.f32.mrf.mxu0 }
 0x376   :  { %5558 = vmatpush.bf16.msrb.mxu3 %v8693_v10  ;;  %v5371_v4 = vadd.f32 %v5370_v29, %v3867_v62 }
 0x377   :  { %v5383_v6 = vpop.f32.mrf.mxu1  ;;  %5857 = vmatpush.bf16.msra.mxu1 %v9566_v61 }
 0x378   :  { %v10116_v14 = vadd.f32 %v5383_v6, %v5371_v4  ;;  %5845 = vmatmul.bf16.vlgmr.msra.gmra.mxu0 %v5573_v5  ;;  %v9587_v5 = vld [vmem:[#allocation11 + $0xe8] sm:$0xff] }
 0x37a   :  { %5559 = vmatpush.bf16.msrb.mxu3 %v8677_v20  ;;  %v9574_v20 = vld [vmem:[#allocation11 + $0x80] sm:$0xff] }
 0x37c   :  { %v5305_v48 = vpop.f32.mrf.mxu3 }
 0x37d   :  { %v5372_v63 = vpop.f32.mrf.mxu0  ;;  %v5306_v2 = vadd.f32 %v5305_v48, %v5293_v39 }
 0x37e   :  { %5560 = vmatpush.bf16.msrb.mxu3 %v8661_v41  ;;  %v9586_v63 = vld [vmem:[#allocation11 + $0xe0] sm:$0xff] }
 0x37f   :  { %v5385_v9 = vpop.f32.mrf.mxu1  ;;  %v5319_v7 = vadd.f32 %v10105_v37, %v5306_v2  ;;  %v9579_v37 = vld [vmem:[#allocation11 + $0xa8] sm:$0xff] }
 0x380   :  { %v9584_v9 = vld [vmem:[#allocation11 + $0xd0] sm:$0xff] }
 0x381   :  { %v5396_v28 = vpop.f32.mrf.mxu2  ;;  %v5332_v27 = vadd.f32 %v10107_v34, %v5319_v7  ;;  %v9577_v34 = vld [vmem:[#allocation11 + $0x98] sm:$0xff] }
 0x382   :  { %5561 = vmatpush.bf16.msrb.mxu3 %v8645_v42  ;;  %v5397_v43 = vadd.f32 %v5396_v28, %v10116_v14  ;;  %v9588_v42 = vld [vmem:[#allocation11 + $0xf0] sm:$0xff] }
 0x383   :  { %v5345_v31 = vadd.f32 %v5344_v59, %v5332_v27 }
 0x384   :  { %v5307_v46 = vpop.f32.mrf.mxu3 }
 0x386   :  { %5562 = vmatpush.bf16.msrb.mxu3 %v8629_v35  ;;  %v9585_v35 = vld [vmem:[#allocation11 + $0xd8] sm:$0xff] }
 0x389   :  { %v5398_v24 = vpop.f32.mrf.mxu2 }
 0x38a   :  { %5563 = vmatpush.bf16.msrb.mxu3 %v8613_v25 }
 0x38d   :  { %5564 = vmatmul.bf16.vlgmr.msrb.gmra.mxu3 %v10074_v18  ;;  %v9580_v18 = vld [vmem:[#allocation11 + $0xb0] sm:$0xff] }
 0x38e   :  { %5864 = vmatpush.bf16.msra.mxu2 %v9580_v18  ;;  %5876 = vmatpush.bf16.msra.mxu3 %v9589_v53 }
 0x38f   :  { %v5357_v32 = vpop.f32.mrf.mxu3 }
 0x390   :  { %v5358_v15 = vadd.f32 %v5357_v32, %v5345_v31 }
 0x392   :  { %v5570_v36 = vmax.f32 %v5358_v15, 0.0  ;;  %5865 = vmatpush.bf16.msra.mxu2 %v9579_v37  ;;  %5877 = vmatpush.bf16.msra.mxu3 %v9588_v42 }
 0x394   :  { %v5574_v1 = vpack.c.bf16 %v5570_v36, %v5570_v36  ;;  %v9604_v36 = vld [vmem:[#allocation13] ss:$0 sm:$0xff] }
 0x395   :  { %v5422_v30 = vpop.f32.mrf.mxu0 }
 0x396   :  { %5858 = vmatmul.bf16.vlgmr.msra.gmra.mxu1 %v5574_v1  ;;  %5866 = vmatpush.bf16.msra.mxu2 %v9578_v45 }
 0x397   :  { %v5435_v47 = vpop.f32.mrf.mxu1  ;;  %v5359_v44 = vpop.f32.mrf.mxu3  ;;  %5878 = vmatpush.bf16.msra.mxu3 %v9587_v5 }
 0x39a   :  { %5867 = vmatpush.bf16.msra.mxu2 %v9577_v34 }
 0x39b   :  { %5879 = vmatpush.bf16.msra.mxu3 %v9586_v63 }
 0x39d   :  { %v5424_v49 = vpop.f32.mrf.mxu0 }
 0x39e   :  { %5868 = vmatpush.bf16.msra.mxu2 %v9576_v50 }
 0x39f   :  { %v5437_v60 = vpop.f32.mrf.mxu1  ;;  %5880 = vmatpush.bf16.msra.mxu3 %v9585_v35 }
 0x3a2   :  { %5869 = vmatpush.bf16.msra.mxu2 %v9575_v26 }
 0x3a3   :  { %5881 = vmatpush.bf16.msra.mxu3 %v9584_v9 }
 0x3a6   :  { %v5448_v51 = vpop.f32.mrf.mxu2  ;;  %5870 = vmatpush.bf16.msra.mxu2 %v9574_v20 }
 0x3a7   :  { %5882 = vmatpush.bf16.msra.mxu3 %v9583_v17 }
 0x3ab   :  { %5883 = vmatpush.bf16.msra.mxu3 %v9582_v21 }
 0x3ae   :  { %v5450_v59 = vpop.f32.mrf.mxu2 }
 0x3af   :  { %v5409_v58 = vpop.f32.mrf.mxu3 }
 0x3b0   :  { %v5410_v3 = vadd.f32 %v5409_v58, %v5397_v43 }
 0x3b2   :  { %v5423_v29 = vadd.f32 %v5422_v30, %v5410_v3 }
 0x3b4   :  { %v5436_v4 = vadd.f32 %v5435_v47, %v5423_v29 }
 0x3b5   :  { %v5474_v55 = vpop.f32.mrf.mxu0 }
 0x3b6   :  { %v5475_v10 = vadd.f32 %v5474_v55, %v3868_v54  ;;  %v5449_v38 = vadd.f32 %v5448_v51, %v5436_v4 }
 0x3b7   :  { %v5487_v56 = vpop.f32.mrf.mxu1  ;;  %v5411_v0 = vpop.f32.mrf.mxu3 }
 0x3b8   :  { %v5488_v57 = vadd.f32 %v5487_v56, %v5475_v10 }
 0x3bd   :  { %v5476_v62 = vpop.f32.mrf.mxu0 }
 0x3bf   :  { %v5489_v33 = vpop.f32.mrf.mxu1 }
 0x3c8   :  { %v5500_v41 = vpop.f32.mrf.mxu2 }
 0x3c9   :  { %v5501_v7 = vadd.f32 %v5500_v41, %v5488_v57 }
 0x3d0   :  { %v5461_v8 = vpop.f32.mrf.mxu3  ;;  %v5502_v13 = vpop.f32.mrf.mxu2 }
 0x3d1   :  { %v5462_v12 = vadd.f32 %v5461_v8, %v5449_v38 }
 0x3d3   :  { %v5571_v16 = vmax.f32 %v5462_v12, 0.0 }
 0x3d5   :  { %v5526_v6 = vpop.f32.mrf.mxu0  ;;  %v5575_v11 = vpack.c.bf16 %v5571_v16, %v5571_v16 }
 0x3d7   :  { %v5539_v22 = vpop.f32.mrf.mxu1  ;;  %5871 = vmatmul.bf16.vlgmr.msra.gmra.mxu2 %v5575_v11 }
 0x3d8   :  { %v5463_v14 = vpop.f32.mrf.mxu3 }
 0x3dd   :  { %v5528_v23 = vpop.f32.mrf.mxu0 }
 0x3df   :  { %v5541_v61 = vpop.f32.mrf.mxu1 }
 0x3e9   :  { %v5552_v19 = vpop.f32.mrf.mxu2 }
 0x3f0   :  { %v5513_v25 = vpop.f32.mrf.mxu3 }
 0x3f1   :  { %v5554_v48 = vpop.f32.mrf.mxu2  ;;  %v5514_v28 = vadd.f32 %v5513_v25, %v5501_v7 }
 0x3f3   :  { %v5527_v46 = vadd.f32 %v5526_v6, %v5514_v28 }
 0x3f5   :  { %v5846_v2 = vpop.f32.mrf.mxu0  ;;  %v5540_v30 = vadd.f32 %v5539_v22, %v5527_v46 }
 0x3f6   :  { %v5847_v1 = vadd.f32 %v9604_v36, %v5846_v2 }
 0x3f7   :  { %v5553_v47 = vadd.f32 %v5552_v19, %v5540_v30 }
 0x3f8   :  { %v5515_v39 = vpop.f32.mrf.mxu3 }
 0x3fd   :  { %v5848_v27 = vpop.f32.mrf.mxu0 }
 0x410   :  { %v5565_v31 = vpop.f32.mrf.mxu3 }
 0x411   :  { %v5566_v24 = vadd.f32 %v5565_v31, %v5553_v47 }
 0x413   :  { %v5572_v32 = vmax.f32 %v5566_v24, 0.0  ;;  %v5859_v49 = vpop.f32.mrf.mxu1 }
 0x414   :  { %v5860_v60 = vadd.f32 %v5859_v49, %v5847_v1 }
 0x415   :  { %v5576_v15 = vpack.c.bf16 %v5572_v32, %v5572_v32 }
 0x417   :  { %5884 = vmatmul.bf16.vlgmr.msra.gmra.mxu3 %v5576_v15 }
 0x418   :  { %v5567_v40 = vpop.f32.mrf.mxu3 }
 0x41b   :  { %v5861_v18 = vpop.f32.mrf.mxu1 }
 0x45a   :  { %v5872_v37 = vpop.f32.mrf.mxu2 }
 0x45b   :  { %v5873_v45 = vadd.f32 %v5872_v37, %v5860_v60 }
 0x462   :  { %v5874_v44 = vpop.f32.mrf.mxu2 }
 0x49a   :  { %v5885_v34 = vpop.f32.mrf.mxu3 }
 0x49b   :  { %v5886_v50 = vadd.f32 %v5885_v34, %v5873_v45 }
 0x49d   :  { %5889 = vst [vmem:[#allocation14] sm:$0xff] %v5886_v50 }
 0x49e   :  { %5900 = dma.vmem_to_hbm [thread:$0]  %s5896_s6, 128, %s5898_s15, [#allocation4]  }
 0x4a2   :  { %v5887_v51 = vpop.f32.mrf.mxu3 }
 0x4a3   :  { %9808 = dma.done.wait [#allocation4], 128  }
 0x4a4   :  { %9809 = vsyncadd [#allocation4], 4294967168 }
 0x4a5   :  { %5905 = vsyncpa [#allocation3], 1 }
 0x4a6   :  { %5906 = vsyncpa [#allocation6], 1 }
 0x4a7   :  { %5907 = vsyncpa [#allocation9], 1 }
 0x4a8   :  { %5908 = vsyncpa [#allocation12], 1 }
 0x4a9   :  { %5909 = vsyncpa [#allocation4], 1 }

</bundles_post_ra>
